<compile_context>
chip_gen: v7x
topology: tpu7x:2x2x1
jax: 0.10.0
libtpu: 0.0.40
codegen_flags: <defaults>
</compile_context>

<pallas_src>
import functools
import math

import jax
import jax.numpy as jnp
from jax.experimental import pallas as pl
from jax.experimental.pallas import tpu as pltpu

# ---------------- model config (small, consistent with the module's shapes) ---
B = 2            # batch
S = 8            # wordpiece sequence length
H = 32           # bert_dim (768 in the real model)
NH = 4           # attention heads
DH = H // NH     # head dim
FF = 64          # intermediate size
NUM_LAYERS = 2
VOCAB = 50
MAX_POS = 16
L = 5            # number of word-level labels per sentence (rows of `transforms`)
L_PAD = 8        # sublane-padded label axis
NUM_LABELS = 4
CLS_PAD = 128    # lane-dense padded classifier width (sliced back to NUM_LABELS)

_ATTN_SCALE = 1.0 / math.sqrt(DH)


def _layernorm(x, g, b):
    # single-pass statistics (independent reductions), f32 throughout
    mu = jnp.mean(x, axis=-1, keepdims=True)
    mu2 = jnp.mean(x * x, axis=-1, keepdims=True)
    var = jnp.maximum(mu2 - mu * mu, 0.0)
    return (x - mu) * jax.lax.rsqrt(var + 1e-12) * g + b


# ---------------------------- fused Pallas kernel ------------------------------
def _bert_fused_kernel(
    x_ref,        # (b_blk, S, H)       summed embeddings for this batch block
    mask_ref,     # (b_blk, 1, S)       float attention mask
    t_ref,        # (b_blk, L_PAD, S)   word->wordpiece averaging transforms (padded)
    emb_g_ref, emb_b_ref,               # (1, H)
    wqkv_ref, bqkv_ref,                 # (NL, H, 3H) bf16, (NL, 1, 3H) f32
    wo_ref, bo_ref,                     # (NL, H, H) bf16,  (NL, 1, H) f32
    ln1_g_ref, ln1_b_ref,               # (NL, 1, H)
    wi_ref, bi_ref,                     # (NL, H, FF) bf16, (NL, 1, FF) f32
    wf_ref, bf_ref,                     # (NL, FF, H) bf16, (NL, 1, H) f32
    ln2_g_ref, ln2_b_ref,               # (NL, 1, H)
    wcls_ref, bcls_ref,                 # (H, CLS_PAD) bf16, (1, CLS_PAD) f32
    o_ref,                              # (b_blk, L_PAD, CLS_PAD) f32
    *, b_blk,
):
    rows = b_blk * S
    x = x_ref[...].reshape(rows, H)                      # merged batch activations

    # HF-style additive mask bias: broadcast once per batch row, hoisted out of
    # the layer/head loops (JAX does not CSE broadcast_in_dim).
    bias = [jnp.broadcast_to((1.0 - mask_ref[b]) * -10000.0, (S, S))
            for b in range(b_blk)]

    hidden = _layernorm(x, emb_g_ref[...], emb_b_ref[...])

    for layer in range(NUM_LAYERS):
        # --- self-attention: fused QKV projection over ALL rows, one MXU pass ---
        qkv = (
            jnp.dot(hidden.astype(jnp.bfloat16), wqkv_ref[layer],
                    preferred_element_type=jnp.float32)
            + bqkv_ref[layer]
        )                                                # (rows, 3H) f32
        wo_l = wo_ref[layer]                             # (H, H) bf16

        attn_acc = [None] * b_blk                        # per-row-block (S, H) f32
        for h in range(NH):
            # per-head lane slices done ONCE per layer (shared by all batch rows)
            q_h = qkv[:, h * DH:(h + 1) * DH]
            k_h = qkv[:, H + h * DH:H + (h + 1) * DH]
            v_h = qkv[:, 2 * H + h * DH:2 * H + (h + 1) * DH]
            wo_h = wo_l[h * DH:(h + 1) * DH, :]          # (DH, H), sublane-aligned
            for b in range(b_blk):
                r = slice(b * S, (b + 1) * S)            # cheap sublane slice
                scores = (
                    jax.lax.dot_general(q_h[r], k_h[r], (((1,), (1,)), ((), ())),
                                        preferred_element_type=jnp.float32)
                    * _ATTN_SCALE + bias[b]
                )                                        # (S, S)
                m = jnp.max(scores, axis=-1, keepdims=True)
                e = jnp.exp(scores - m)
                p = e * pl.reciprocal(jnp.sum(e, axis=-1, keepdims=True), approx=True)
                ctx = jnp.dot(p, v_h[r], preferred_element_type=jnp.float32)
                # accumulate through this head's W_O slice: no lane concatenate
                contrib = jnp.dot(ctx.astype(jnp.bfloat16), wo_h,
                                  preferred_element_type=jnp.float32)
                attn_acc[b] = contrib if attn_acc[b] is None else attn_acc[b] + contrib

        attn_out = attn_acc[0] if b_blk == 1 else jnp.concatenate(attn_acc, axis=0)
        # residual add + output bias fused into the LayerNorm input
        hidden = _layernorm(attn_out + bo_ref[layer] + hidden,
                            ln1_g_ref[layer], ln1_b_ref[layer])

        # --- feed-forward ------------------------------------------------------
        inter = (
            jnp.dot(hidden.astype(jnp.bfloat16), wi_ref[layer],
                    preferred_element_type=jnp.float32)
            + bi_ref[layer]
        )
        # tanh-approximate GELU (EUP slot) instead of exact erf (VPU polynomial)
        inter = jax.nn.gelu(inter, approximate=True)
        ffn_out = (
            jnp.dot(inter.astype(jnp.bfloat16), wf_ref[layer],
                    preferred_element_type=jnp.float32)
            + bf_ref[layer]
        )
        hidden = _layernorm(ffn_out + hidden, ln2_g_ref[layer], ln2_b_ref[layer])

    # --- transforms @ seq_out ; classifier (full (8,128) unmasked stores) -------
    for b in range(b_blk):
        r = slice(b * S, (b + 1) * S)
        word_out = jnp.dot(t_ref[b], hidden[r],
                           preferred_element_type=jnp.float32)       # (L_PAD, H)
        o_ref[b] = (
            jnp.dot(word_out.astype(jnp.bfloat16), wcls_ref[...],
                    preferred_element_type=jnp.float32)
            + bcls_ref[...]
        )                                                             # (L_PAD, CLS_PAD)


# ---------------------------- parameter init -----------------------------------
def init_params(key):
    keys = iter(jax.random.split(key, 32))

    def w(shape, dtype=jnp.bfloat16, scale=0.02):
        return (scale * jax.random.normal(next(keys), shape)).astype(dtype)

    cls_w = w((H, NUM_LABELS), jnp.float32)
    cls_b = jnp.zeros((NUM_LABELS,), jnp.float32)

    params = {
        "word_emb": w((VOCAB, H), jnp.float32),
        "pos_emb": w((MAX_POS, H), jnp.float32),
        "tok_emb": w((2, H), jnp.float32),
        "emb_ln_g": jnp.ones((1, H), jnp.float32),
        "emb_ln_b": jnp.zeros((1, H), jnp.float32),
        # per-layer dense weights stacked on a leading layer axis; QKV fused [wq|wk|wv]
        "wqkv": w((NUM_LAYERS, H, 3 * H)),
        "bqkv": jnp.zeros((NUM_LAYERS, 1, 3 * H), jnp.float32),
        "wo": w((NUM_LAYERS, H, H)),
        "bo": jnp.zeros((NUM_LAYERS, 1, H), jnp.float32),
        "ln1_g": jnp.ones((NUM_LAYERS, 1, H), jnp.float32),
        "ln1_b": jnp.zeros((NUM_LAYERS, 1, H), jnp.float32),
        "wi": w((NUM_LAYERS, H, FF)),
        "bi": jnp.zeros((NUM_LAYERS, 1, FF), jnp.float32),
        "wf": w((NUM_LAYERS, FF, H)),
        "bf": jnp.zeros((NUM_LAYERS, 1, H), jnp.float32),
        "ln2_g": jnp.ones((NUM_LAYERS, 1, H), jnp.float32),
        "ln2_b": jnp.zeros((NUM_LAYERS, 1, H), jnp.float32),
        # classifier weights pre-padded ONCE at init to a lane-dense (H, 128) tile
        "cls_w_pad": jnp.zeros((H, CLS_PAD), jnp.bfloat16)
                        .at[:, :NUM_LABELS].set(cls_w.astype(jnp.bfloat16)),
        "cls_b_pad": jnp.zeros((1, CLS_PAD), jnp.float32)
                        .at[:, :NUM_LABELS].set(cls_b),
        # keep unpadded copies around for reference / export
        "cls_w": cls_w,
        "cls_b": cls_b,
    }
    return params


def _num_batch_blocks(batch):
    # v7x has 2 TensorCores/chip: keep a 2-wide "parallel" batch grid so both cores
    # get work.  v5e/v6e (1 TC): collapse to a single merged-batch grid step to
    # avoid per-step pipeline overhead in this latency-bound micro-kernel.
    try:
        kind = jax.devices()[0].device_kind.lower()
    except Exception:
        kind = ""
    if "v7" in kind and batch % 2 == 0:
        return 2
    return 1


# ---------------------------- forward pass --------------------------------------
def forward(params, input_ids, attention_mask, transforms, labels=None):
    Bb, Ss = input_ids.shape
    Ll = transforms.shape[1]

    # embeddings (gather is glue; everything downstream is the fused Pallas kernel)
    pos_ids = jnp.arange(Ss, dtype=jnp.int32)
    x_emb = (
        params["word_emb"][input_ids]
        + params["pos_emb"][pos_ids][None, :, :]
        + params["tok_emb"][0][None, None, :]            # token_type_ids=None -> 0
    ).astype(jnp.float32)
    mask3 = attention_mask.astype(jnp.float32).reshape(Bb, 1, Ss)
    # pad label axis to a sublane multiple so the classifier stores full vregs
    t_pad = jnp.pad(transforms.astype(jnp.float32), ((0, 0), (0, L_PAD - Ll), (0, 0)))

    nb = _num_batch_blocks(Bb)
    b_blk = Bb // nb

    weight_spec = pl.BlockSpec(memory_space=pltpu.MemorySpace.VMEM)

    logits_pad = pl.pallas_call(
        functools.partial(_bert_fused_kernel, b_blk=b_blk),
        grid=(nb,),
        out_shape=jax.ShapeDtypeStruct((Bb, L_PAD, CLS_PAD), jnp.float32),
        in_specs=[
            pl.BlockSpec((b_blk, Ss, H), lambda g: (g, 0, 0)),        # embeddings
            pl.BlockSpec((b_blk, 1, Ss), lambda g: (g, 0, 0)),        # attention mask
            pl.BlockSpec((b_blk, L_PAD, Ss), lambda g: (g, 0, 0)),    # transforms
        ] + [weight_spec] * 16,
        out_specs=pl.BlockSpec((b_blk, L_PAD, CLS_PAD), lambda g: (g, 0, 0)),
        compiler_params=pltpu.CompilerParams(dimension_semantics=("parallel",)),
    )(
        x_emb, mask3, t_pad,
        params["emb_ln_g"], params["emb_ln_b"],
        params["wqkv"], params["bqkv"], params["wo"], params["bo"],
        params["ln1_g"], params["ln1_b"],
        params["wi"], params["bi"], params["wf"], params["bf"],
        params["ln2_g"], params["ln2_b"],
        params["cls_w_pad"], params["cls_b_pad"],
    )
    logits = logits_pad[:, :Ll, :NUM_LABELS]
    # TODO(synk): BertModel's pooled_outputs (tanh pooler on [CLS]) is returned by
    # self.bert but never used in this module's forward, so it is not computed.

    if labels is not None:
        # CrossEntropyLoss(ignore_index=-100) over flattened (B*L, num_labels) -- glue.
        flat_logits = logits.reshape(-1, NUM_LABELS)
        flat_labels = labels.reshape(-1)
        valid = flat_labels != -100
        safe_labels = jnp.where(valid, flat_labels, 0)
        logp = jax.nn.log_softmax(flat_logits, axis=-1)
        nll = -jnp.take_along_axis(logp, safe_labels[:, None], axis=-1)[:, 0]
        loss = jnp.sum(jnp.where(valid, nll, 0.0)) / jnp.maximum(jnp.sum(valid), 1)
        return loss
    return logits


forward_jit = jax.jit(forward)


# ---------------------------- main ----------------------------------------------
if __name__ == "__main__":
    key = jax.random.PRNGKey(0)
    kp, kid, kmask, ktr = jax.random.split(key, 4)

    params = init_params(kp)

    # synthetic batch: wordpiece ids, attention mask with some padding,
    # and word->wordpiece averaging `transforms` (rows sum to 1 over real tokens).
    input_ids = jax.random.randint(kid, (B, S), 0, VOCAB, dtype=jnp.int32)
    seq_lens = jnp.array([S, S - 2], dtype=jnp.int32)
    attention_mask = (jnp.arange(S)[None, :] < seq_lens[:, None]).astype(jnp.float32)
    raw = jax.random.uniform(ktr, (B, L, S), dtype=jnp.float32) * attention_mask[:, None, :]
    transforms = raw / jnp.maximum(jnp.sum(raw, axis=-1, keepdims=True), 1e-6)

    logits = forward_jit(params, input_ids, attention_mask, transforms)
    logits = jax.block_until_ready(logits)
    assert logits.shape == (B, L, NUM_LABELS)
    assert bool(jnp.all(jnp.isfinite(logits)))
    print("KERNEL_OK")
</pallas_src>

<mosaic_0001>
module attributes {stable_mosaic.version = 11 : i64} {
  func.func @_bert_fused_kernel(%arg0: i32, %arg1: memref<2x8x32xf32, #tpu.memory_space<vmem>>, %arg2: memref<2x1x8xf32, #tpu.memory_space<vmem>>, %arg3: memref<2x8x8xf32, #tpu.memory_space<vmem>>, %arg4: memref<1x32xf32, #tpu.memory_space<vmem>>, %arg5: memref<1x32xf32, #tpu.memory_space<vmem>>, %arg6: memref<2x32x96xbf16, #tpu.memory_space<vmem>>, %arg7: memref<2x1x96xf32, #tpu.memory_space<vmem>>, %arg8: memref<2x32x32xbf16, #tpu.memory_space<vmem>>, %arg9: memref<2x1x32xf32, #tpu.memory_space<vmem>>, %arg10: memref<2x1x32xf32, #tpu.memory_space<vmem>>, %arg11: memref<2x1x32xf32, #tpu.memory_space<vmem>>, %arg12: memref<2x32x64xbf16, #tpu.memory_space<vmem>>, %arg13: memref<2x1x64xf32, #tpu.memory_space<vmem>>, %arg14: memref<2x64x32xbf16, #tpu.memory_space<vmem>>, %arg15: memref<2x1x32xf32, #tpu.memory_space<vmem>>, %arg16: memref<2x1x32xf32, #tpu.memory_space<vmem>>, %arg17: memref<2x1x32xf32, #tpu.memory_space<vmem>>, %arg18: memref<32x128xbf16, #tpu.memory_space<vmem>>, %arg19: memref<1x128xf32, #tpu.memory_space<vmem>>, %arg20: memref<2x8x128xf32, #tpu.memory_space<vmem>>) attributes {dimension_semantics = [#tpu.dimension_semantics<parallel>], iteration_bounds = array<i64: 1>, scalar_prefetch = 0 : i64, scratch_operands = 0 : i64, tpu.core_type = #tpu.core_type<tc>, window_params = [{transform_indices = @transform_0, window_bounds = array<i64: 2, 8, 32>}, {transform_indices = @transform_1, window_bounds = array<i64: 2, 1, 8>}, {transform_indices = @transform_2, window_bounds = array<i64: 2, 8, 8>}, {pipeline_mode = #tpu.pipeline_mode<synchronous>, transform_indices = @transform_3, window_bounds = array<i64: 1, 32>}, {pipeline_mode = #tpu.pipeline_mode<synchronous>, transform_indices = @transform_4, window_bounds = array<i64: 1, 32>}, {pipeline_mode = #tpu.pipeline_mode<synchronous>, transform_indices = @transform_5, window_bounds = array<i64: 2, 32, 96>}, {pipeline_mode = #tpu.pipeline_mode<synchronous>, transform_indices = @transform_6, window_bounds = array<i64: 2, 1, 96>}, {pipeline_mode = #tpu.pipeline_mode<synchronous>, transform_indices = @transform_7, window_bounds = array<i64: 2, 32, 32>}, {pipeline_mode = #tpu.pipeline_mode<synchronous>, transform_indices = @transform_8, window_bounds = array<i64: 2, 1, 32>}, {pipeline_mode = #tpu.pipeline_mode<synchronous>, transform_indices = @transform_9, window_bounds = array<i64: 2, 1, 32>}, {pipeline_mode = #tpu.pipeline_mode<synchronous>, transform_indices = @transform_10, window_bounds = array<i64: 2, 1, 32>}, {pipeline_mode = #tpu.pipeline_mode<synchronous>, transform_indices = @transform_11, window_bounds = array<i64: 2, 32, 64>}, {pipeline_mode = #tpu.pipeline_mode<synchronous>, transform_indices = @transform_12, window_bounds = array<i64: 2, 1, 64>}, {pipeline_mode = #tpu.pipeline_mode<synchronous>, transform_indices = @transform_13, window_bounds = array<i64: 2, 64, 32>}, {pipeline_mode = #tpu.pipeline_mode<synchronous>, transform_indices = @transform_14, window_bounds = array<i64: 2, 1, 32>}, {pipeline_mode = #tpu.pipeline_mode<synchronous>, transform_indices = @transform_15, window_bounds = array<i64: 2, 1, 32>}, {pipeline_mode = #tpu.pipeline_mode<synchronous>, transform_indices = @transform_16, window_bounds = array<i64: 2, 1, 32>}, {pipeline_mode = #tpu.pipeline_mode<synchronous>, transform_indices = @transform_17, window_bounds = array<i64: 32, 128>}, {pipeline_mode = #tpu.pipeline_mode<synchronous>, transform_indices = @transform_18, window_bounds = array<i64: 1, 128>}, {transform_indices = @transform_19, window_bounds = array<i64: 2, 8, 128>}]} {
    %c0 = arith.constant 0 : index
    %c0_0 = arith.constant 0 : index
    %c0_1 = arith.constant 0 : index
    %0 = vector.load %arg1[%c0, %c0_0, %c0_1] : memref<2x8x32xf32, #tpu.memory_space<vmem>>, vector<2x8x32xf32>
    %1 = vector.shape_cast %0 : vector<2x8x32xf32> to vector<16x32xf32>
    %c0_2 = arith.constant 0 : index
    %c0_3 = arith.constant 0 : index
    %c0_4 = arith.constant 0 : index
    %2 = vector.load %arg2[%c0_2, %c0_3, %c0_4] : memref<2x1x8xf32, #tpu.memory_space<vmem>>, vector<1x1x8xf32>
    %3 = vector.shape_cast %2 : vector<1x1x8xf32> to vector<1x8xf32>
    %cst = arith.constant 1.000000e+00 : f32
    %4 = vector.broadcast %cst : f32 to vector<1x8xf32>
    %5 = arith.subf %4, %3 : vector<1x8xf32>
    %cst_5 = arith.constant -1.000000e+04 : f32
    %6 = vector.broadcast %cst_5 : f32 to vector<1x8xf32>
    %7 = arith.mulf %5, %6 : vector<1x8xf32>
    %8 = vector.shape_cast %7 : vector<1x8xf32> to vector<1x8xf32>
    %9 = vector.broadcast %8 : vector<1x8xf32> to vector<8x8xf32>
    %c1 = arith.constant 1 : index
    %c0_6 = arith.constant 0 : index
    %c0_7 = arith.constant 0 : index
    %10 = vector.load %arg2[%c1, %c0_6, %c0_7] : memref<2x1x8xf32, #tpu.memory_space<vmem>>, vector<1x1x8xf32>
    %11 = vector.shape_cast %10 : vector<1x1x8xf32> to vector<1x8xf32>
    %cst_8 = arith.constant 1.000000e+00 : f32
    %12 = vector.broadcast %cst_8 : f32 to vector<1x8xf32>
    %13 = arith.subf %12, %11 : vector<1x8xf32>
    %cst_9 = arith.constant -1.000000e+04 : f32
    %14 = vector.broadcast %cst_9 : f32 to vector<1x8xf32>
    %15 = arith.mulf %13, %14 : vector<1x8xf32>
    %16 = vector.shape_cast %15 : vector<1x8xf32> to vector<1x8xf32>
    %17 = vector.broadcast %16 : vector<1x8xf32> to vector<8x8xf32>
    %c0_10 = arith.constant 0 : index
    %c0_11 = arith.constant 0 : index
    %18 = vector.load %arg4[%c0_10, %c0_11] : memref<1x32xf32, #tpu.memory_space<vmem>>, vector<1x32xf32>
    %c0_12 = arith.constant 0 : index
    %c0_13 = arith.constant 0 : index
    %19 = vector.load %arg5[%c0_12, %c0_13] : memref<1x32xf32, #tpu.memory_space<vmem>>, vector<1x32xf32>
    %cst_14 = arith.constant dense<0.000000e+00> : vector<16xf32>
    %20 = vector.multi_reduction <add>, %1, %cst_14 [1] : vector<16x32xf32> to vector<16xf32>
    %21 = vector.shape_cast %20 : vector<16xf32> to vector<16x1xf32>
    %cst_15 = arith.constant 3.200000e+01 : f32
    %22 = vector.broadcast %cst_15 : f32 to vector<16x1xf32>
    %23 = arith.divf %21, %22 : vector<16x1xf32>
    %24 = arith.mulf %1, %1 : vector<16x32xf32>
    %cst_16 = arith.constant dense<0.000000e+00> : vector<16xf32>
    %25 = vector.multi_reduction <add>, %24, %cst_16 [1] : vector<16x32xf32> to vector<16xf32>
    %26 = vector.shape_cast %25 : vector<16xf32> to vector<16x1xf32>
    %cst_17 = arith.constant 3.200000e+01 : f32
    %27 = vector.broadcast %cst_17 : f32 to vector<16x1xf32>
    %28 = arith.divf %26, %27 : vector<16x1xf32>
    %29 = arith.mulf %23, %23 : vector<16x1xf32>
    %30 = arith.subf %28, %29 : vector<16x1xf32>
    %cst_18 = arith.constant 0.000000e+00 : f32
    %31 = vector.broadcast %cst_18 : f32 to vector<16x1xf32>
    %32 = arith.maximumf %30, %31 : vector<16x1xf32>
    %33 = vector.broadcast %23 : vector<16x1xf32> to vector<16x32xf32>
    %34 = arith.subf %1, %33 : vector<16x32xf32>
    %cst_19 = arith.constant 9.99999996E-13 : f32
    %35 = vector.broadcast %cst_19 : f32 to vector<16x1xf32>
    %36 = arith.addf %32, %35 : vector<16x1xf32>
    %37 = math.rsqrt %36 : vector<16x1xf32>
    %38 = vector.broadcast %37 : vector<16x1xf32> to vector<16x32xf32>
    %39 = arith.mulf %34, %38 : vector<16x32xf32>
    %40 = vector.broadcast %18 : vector<1x32xf32> to vector<16x32xf32>
    %41 = arith.mulf %39, %40 : vector<16x32xf32>
    %42 = vector.broadcast %19 : vector<1x32xf32> to vector<16x32xf32>
    %43 = arith.addf %41, %42 : vector<16x32xf32>
    %44 = arith.truncf %43 : vector<16x32xf32> to vector<16x32xbf16>
    %c0_20 = arith.constant 0 : index
    %c0_21 = arith.constant 0 : index
    %c0_22 = arith.constant 0 : index
    %45 = vector.load %arg6[%c0_20, %c0_21, %c0_22] : memref<2x32x96xbf16, #tpu.memory_space<vmem>>, vector<1x32x96xbf16>
    %46 = vector.shape_cast %45 : vector<1x32x96xbf16> to vector<32x96xbf16>
    %cst_23 = arith.constant dense<0.000000e+00> : vector<16x96xf32>
    %47 = tpu.matmul %44, %46, %cst_23 {dimension_numbers = #tpu.dot_dimension_numbers<[1], [0], [0], [1], [0, 0, 1, 1], [], []>} : vector<16x32xbf16>, vector<32x96xbf16>, vector<16x96xf32> -> vector<16x96xf32>
    %c0_24 = arith.constant 0 : index
    %c0_25 = arith.constant 0 : index
    %c0_26 = arith.constant 0 : index
    %48 = vector.load %arg7[%c0_24, %c0_25, %c0_26] : memref<2x1x96xf32, #tpu.memory_space<vmem>>, vector<1x1x96xf32>
    %49 = vector.shape_cast %48 : vector<1x1x96xf32> to vector<1x96xf32>
    %50 = vector.broadcast %49 : vector<1x96xf32> to vector<16x96xf32>
    %51 = arith.addf %47, %50 : vector<16x96xf32>
    %c0_27 = arith.constant 0 : index
    %c0_28 = arith.constant 0 : index
    %c0_29 = arith.constant 0 : index
    %52 = vector.load %arg8[%c0_27, %c0_28, %c0_29] : memref<2x32x32xbf16, #tpu.memory_space<vmem>>, vector<1x32x32xbf16>
    %53 = vector.shape_cast %52 : vector<1x32x32xbf16> to vector<32x32xbf16>
    %54 = vector.extract_strided_slice %51 {offsets = [0, 0], sizes = [16, 8], strides = [1, 1]} : vector<16x96xf32> to vector<16x8xf32>
    %55 = vector.extract_strided_slice %51 {offsets = [0, 32], sizes = [16, 8], strides = [1, 1]} : vector<16x96xf32> to vector<16x8xf32>
    %56 = vector.extract_strided_slice %51 {offsets = [0, 64], sizes = [16, 8], strides = [1, 1]} : vector<16x96xf32> to vector<16x8xf32>
    %57 = vector.extract_strided_slice %53 {offsets = [0, 0], sizes = [8, 32], strides = [1, 1]} : vector<32x32xbf16> to vector<8x32xbf16>
    %58 = vector.extract_strided_slice %54 {offsets = [0, 0], sizes = [8, 8], strides = [1, 1]} : vector<16x8xf32> to vector<8x8xf32>
    %59 = vector.extract_strided_slice %55 {offsets = [0, 0], sizes = [8, 8], strides = [1, 1]} : vector<16x8xf32> to vector<8x8xf32>
    %cst_30 = arith.constant dense<0.000000e+00> : vector<8x8xf32>
    %60 = tpu.matmul %58, %59, %cst_30 {dimension_numbers = #tpu.dot_dimension_numbers<[1], [1], [0], [0], [0, 0, 1, 0], [], []>} : vector<8x8xf32>, vector<8x8xf32>, vector<8x8xf32> -> vector<8x8xf32>
    %cst_31 = arith.constant 0.353553385 : f32
    %61 = vector.broadcast %cst_31 : f32 to vector<8x8xf32>
    %62 = arith.mulf %60, %61 : vector<8x8xf32>
    %63 = arith.addf %62, %9 : vector<8x8xf32>
    %cst_32 = arith.constant dense<0xFF800000> : vector<8xf32>
    %64 = vector.multi_reduction <maximumf>, %63, %cst_32 [1] : vector<8x8xf32> to vector<8xf32>
    %65 = vector.shape_cast %64 : vector<8xf32> to vector<8x1xf32>
    %66 = vector.broadcast %65 : vector<8x1xf32> to vector<8x8xf32>
    %67 = arith.subf %63, %66 : vector<8x8xf32>
    %68 = math.exp %67 : vector<8x8xf32>
    %cst_33 = arith.constant dense<0.000000e+00> : vector<8xf32>
    %69 = vector.multi_reduction <add>, %68, %cst_33 [1] : vector<8x8xf32> to vector<8xf32>
    %70 = vector.shape_cast %69 : vector<8xf32> to vector<8x1xf32>
    %71 = tpu.reciprocal %70 {approx = true} : vector<8x1xf32> -> vector<8x1xf32>
    %72 = vector.broadcast %71 : vector<8x1xf32> to vector<8x8xf32>
    %73 = arith.mulf %68, %72 : vector<8x8xf32>
    %74 = vector.extract_strided_slice %56 {offsets = [0, 0], sizes = [8, 8], strides = [1, 1]} : vector<16x8xf32> to vector<8x8xf32>
    %cst_34 = arith.constant dense<0.000000e+00> : vector<8x8xf32>
    %75 = tpu.matmul %73, %74, %cst_34 {dimension_numbers = #tpu.dot_dimension_numbers<[1], [0], [0], [1], [0, 0, 1, 1], [], []>} : vector<8x8xf32>, vector<8x8xf32>, vector<8x8xf32> -> vector<8x8xf32>
    %76 = arith.truncf %75 : vector<8x8xf32> to vector<8x8xbf16>
    %cst_35 = arith.constant dense<0.000000e+00> : vector<8x32xf32>
    %77 = tpu.matmul %76, %57, %cst_35 {dimension_numbers = #tpu.dot_dimension_numbers<[1], [0], [0], [1], [0, 0, 1, 1], [], []>} : vector<8x8xbf16>, vector<8x32xbf16>, vector<8x32xf32> -> vector<8x32xf32>
    %78 = vector.extract_strided_slice %54 {offsets = [8, 0], sizes = [8, 8], strides = [1, 1]} : vector<16x8xf32> to vector<8x8xf32>
    %79 = vector.extract_strided_slice %55 {offsets = [8, 0], sizes = [8, 8], strides = [1, 1]} : vector<16x8xf32> to vector<8x8xf32>
    %cst_36 = arith.constant dense<0.000000e+00> : vector<8x8xf32>
    %80 = tpu.matmul %78, %79, %cst_36 {dimension_numbers = #tpu.dot_dimension_numbers<[1], [1], [0], [0], [0, 0, 1, 0], [], []>} : vector<8x8xf32>, vector<8x8xf32>, vector<8x8xf32> -> vector<8x8xf32>
    %cst_37 = arith.constant 0.353553385 : f32
    %81 = vector.broadcast %cst_37 : f32 to vector<8x8xf32>
    %82 = arith.mulf %80, %81 : vector<8x8xf32>
    %83 = arith.addf %82, %17 : vector<8x8xf32>
    %cst_38 = arith.constant dense<0xFF800000> : vector<8xf32>
    %84 = vector.multi_reduction <maximumf>, %83, %cst_38 [1] : vector<8x8xf32> to vector<8xf32>
    %85 = vector.shape_cast %84 : vector<8xf32> to vector<8x1xf32>
    %86 = vector.broadcast %85 : vector<8x1xf32> to vector<8x8xf32>
    %87 = arith.subf %83, %86 : vector<8x8xf32>
    %88 = math.exp %87 : vector<8x8xf32>
    %cst_39 = arith.constant dense<0.000000e+00> : vector<8xf32>
    %89 = vector.multi_reduction <add>, %88, %cst_39 [1] : vector<8x8xf32> to vector<8xf32>
    %90 = vector.shape_cast %89 : vector<8xf32> to vector<8x1xf32>
    %91 = tpu.reciprocal %90 {approx = true} : vector<8x1xf32> -> vector<8x1xf32>
    %92 = vector.broadcast %91 : vector<8x1xf32> to vector<8x8xf32>
    %93 = arith.mulf %88, %92 : vector<8x8xf32>
    %94 = vector.extract_strided_slice %56 {offsets = [8, 0], sizes = [8, 8], strides = [1, 1]} : vector<16x8xf32> to vector<8x8xf32>
    %cst_40 = arith.constant dense<0.000000e+00> : vector<8x8xf32>
    %95 = tpu.matmul %93, %94, %cst_40 {dimension_numbers = #tpu.dot_dimension_numbers<[1], [0], [0], [1], [0, 0, 1, 1], [], []>} : vector<8x8xf32>, vector<8x8xf32>, vector<8x8xf32> -> vector<8x8xf32>
    %96 = arith.truncf %95 : vector<8x8xf32> to vector<8x8xbf16>
    %cst_41 = arith.constant dense<0.000000e+00> : vector<8x32xf32>
    %97 = tpu.matmul %96, %57, %cst_41 {dimension_numbers = #tpu.dot_dimension_numbers<[1], [0], [0], [1], [0, 0, 1, 1], [], []>} : vector<8x8xbf16>, vector<8x32xbf16>, vector<8x32xf32> -> vector<8x32xf32>
    %98 = vector.extract_strided_slice %51 {offsets = [0, 8], sizes = [16, 8], strides = [1, 1]} : vector<16x96xf32> to vector<16x8xf32>
    %99 = vector.extract_strided_slice %51 {offsets = [0, 40], sizes = [16, 8], strides = [1, 1]} : vector<16x96xf32> to vector<16x8xf32>
    %100 = vector.extract_strided_slice %51 {offsets = [0, 72], sizes = [16, 8], strides = [1, 1]} : vector<16x96xf32> to vector<16x8xf32>
    %101 = vector.extract_strided_slice %53 {offsets = [8, 0], sizes = [8, 32], strides = [1, 1]} : vector<32x32xbf16> to vector<8x32xbf16>
    %102 = vector.extract_strided_slice %98 {offsets = [0, 0], sizes = [8, 8], strides = [1, 1]} : vector<16x8xf32> to vector<8x8xf32>
    %103 = vector.extract_strided_slice %99 {offsets = [0, 0], sizes = [8, 8], strides = [1, 1]} : vector<16x8xf32> to vector<8x8xf32>
    %cst_42 = arith.constant dense<0.000000e+00> : vector<8x8xf32>
    %104 = tpu.matmul %102, %103, %cst_42 {dimension_numbers = #tpu.dot_dimension_numbers<[1], [1], [0], [0], [0, 0, 1, 0], [], []>} : vector<8x8xf32>, vector<8x8xf32>, vector<8x8xf32> -> vector<8x8xf32>
    %cst_43 = arith.constant 0.353553385 : f32
    %105 = vector.broadcast %cst_43 : f32 to vector<8x8xf32>
    %106 = arith.mulf %104, %105 : vector<8x8xf32>
    %107 = arith.addf %106, %9 : vector<8x8xf32>
    %cst_44 = arith.constant dense<0xFF800000> : vector<8xf32>
    %108 = vector.multi_reduction <maximumf>, %107, %cst_44 [1] : vector<8x8xf32> to vector<8xf32>
    %109 = vector.shape_cast %108 : vector<8xf32> to vector<8x1xf32>
    %110 = vector.broadcast %109 : vector<8x1xf32> to vector<8x8xf32>
    %111 = arith.subf %107, %110 : vector<8x8xf32>
    %112 = math.exp %111 : vector<8x8xf32>
    %cst_45 = arith.constant dense<0.000000e+00> : vector<8xf32>
    %113 = vector.multi_reduction <add>, %112, %cst_45 [1] : vector<8x8xf32> to vector<8xf32>
    %114 = vector.shape_cast %113 : vector<8xf32> to vector<8x1xf32>
    %115 = tpu.reciprocal %114 {approx = true} : vector<8x1xf32> -> vector<8x1xf32>
    %116 = vector.broadcast %115 : vector<8x1xf32> to vector<8x8xf32>
    %117 = arith.mulf %112, %116 : vector<8x8xf32>
    %118 = vector.extract_strided_slice %100 {offsets = [0, 0], sizes = [8, 8], strides = [1, 1]} : vector<16x8xf32> to vector<8x8xf32>
    %cst_46 = arith.constant dense<0.000000e+00> : vector<8x8xf32>
    %119 = tpu.matmul %117, %118, %cst_46 {dimension_numbers = #tpu.dot_dimension_numbers<[1], [0], [0], [1], [0, 0, 1, 1], [], []>} : vector<8x8xf32>, vector<8x8xf32>, vector<8x8xf32> -> vector<8x8xf32>
    %120 = arith.truncf %119 : vector<8x8xf32> to vector<8x8xbf16>
    %cst_47 = arith.constant dense<0.000000e+00> : vector<8x32xf32>
    %121 = tpu.matmul %120, %101, %cst_47 {dimension_numbers = #tpu.dot_dimension_numbers<[1], [0], [0], [1], [0, 0, 1, 1], [], []>} : vector<8x8xbf16>, vector<8x32xbf16>, vector<8x32xf32> -> vector<8x32xf32>
    %122 = arith.addf %77, %121 : vector<8x32xf32>
    %123 = vector.extract_strided_slice %98 {offsets = [8, 0], sizes = [8, 8], strides = [1, 1]} : vector<16x8xf32> to vector<8x8xf32>
    %124 = vector.extract_strided_slice %99 {offsets = [8, 0], sizes = [8, 8], strides = [1, 1]} : vector<16x8xf32> to vector<8x8xf32>
    %cst_48 = arith.constant dense<0.000000e+00> : vector<8x8xf32>
    %125 = tpu.matmul %123, %124, %cst_48 {dimension_numbers = #tpu.dot_dimension_numbers<[1], [1], [0], [0], [0, 0, 1, 0], [], []>} : vector<8x8xf32>, vector<8x8xf32>, vector<8x8xf32> -> vector<8x8xf32>
    %cst_49 = arith.constant 0.353553385 : f32
    %126 = vector.broadcast %cst_49 : f32 to vector<8x8xf32>
    %127 = arith.mulf %125, %126 : vector<8x8xf32>
    %128 = arith.addf %127, %17 : vector<8x8xf32>
    %cst_50 = arith.constant dense<0xFF800000> : vector<8xf32>
    %129 = vector.multi_reduction <maximumf>, %128, %cst_50 [1] : vector<8x8xf32> to vector<8xf32>
    %130 = vector.shape_cast %129 : vector<8xf32> to vector<8x1xf32>
    %131 = vector.broadcast %130 : vector<8x1xf32> to vector<8x8xf32>
    %132 = arith.subf %128, %131 : vector<8x8xf32>
    %133 = math.exp %132 : vector<8x8xf32>
    %cst_51 = arith.constant dense<0.000000e+00> : vector<8xf32>
    %134 = vector.multi_reduction <add>, %133, %cst_51 [1] : vector<8x8xf32> to vector<8xf32>
    %135 = vector.shape_cast %134 : vector<8xf32> to vector<8x1xf32>
    %136 = tpu.reciprocal %135 {approx = true} : vector<8x1xf32> -> vector<8x1xf32>
    %137 = vector.broadcast %136 : vector<8x1xf32> to vector<8x8xf32>
    %138 = arith.mulf %133, %137 : vector<8x8xf32>
    %139 = vector.extract_strided_slice %100 {offsets = [8, 0], sizes = [8, 8], strides = [1, 1]} : vector<16x8xf32> to vector<8x8xf32>
    %cst_52 = arith.constant dense<0.000000e+00> : vector<8x8xf32>
    %140 = tpu.matmul %138, %139, %cst_52 {dimension_numbers = #tpu.dot_dimension_numbers<[1], [0], [0], [1], [0, 0, 1, 1], [], []>} : vector<8x8xf32>, vector<8x8xf32>, vector<8x8xf32> -> vector<8x8xf32>
    %141 = arith.truncf %140 : vector<8x8xf32> to vector<8x8xbf16>
    %cst_53 = arith.constant dense<0.000000e+00> : vector<8x32xf32>
    %142 = tpu.matmul %141, %101, %cst_53 {dimension_numbers = #tpu.dot_dimension_numbers<[1], [0], [0], [1], [0, 0, 1, 1], [], []>} : vector<8x8xbf16>, vector<8x32xbf16>, vector<8x32xf32> -> vector<8x32xf32>
    %143 = arith.addf %97, %142 : vector<8x32xf32>
    %144 = vector.extract_strided_slice %51 {offsets = [0, 16], sizes = [16, 8], strides = [1, 1]} : vector<16x96xf32> to vector<16x8xf32>
    %145 = vector.extract_strided_slice %51 {offsets = [0, 48], sizes = [16, 8], strides = [1, 1]} : vector<16x96xf32> to vector<16x8xf32>
    %146 = vector.extract_strided_slice %51 {offsets = [0, 80], sizes = [16, 8], strides = [1, 1]} : vector<16x96xf32> to vector<16x8xf32>
    %147 = vector.extract_strided_slice %53 {offsets = [16, 0], sizes = [8, 32], strides = [1, 1]} : vector<32x32xbf16> to vector<8x32xbf16>
    %148 = vector.extract_strided_slice %144 {offsets = [0, 0], sizes = [8, 8], strides = [1, 1]} : vector<16x8xf32> to vector<8x8xf32>
    %149 = vector.extract_strided_slice %145 {offsets = [0, 0], sizes = [8, 8], strides = [1, 1]} : vector<16x8xf32> to vector<8x8xf32>
    %cst_54 = arith.constant dense<0.000000e+00> : vector<8x8xf32>
    %150 = tpu.matmul %148, %149, %cst_54 {dimension_numbers = #tpu.dot_dimension_numbers<[1], [1], [0], [0], [0, 0, 1, 0], [], []>} : vector<8x8xf32>, vector<8x8xf32>, vector<8x8xf32> -> vector<8x8xf32>
    %cst_55 = arith.constant 0.353553385 : f32
    %151 = vector.broadcast %cst_55 : f32 to vector<8x8xf32>
    %152 = arith.mulf %150, %151 : vector<8x8xf32>
    %153 = arith.addf %152, %9 : vector<8x8xf32>
    %cst_56 = arith.constant dense<0xFF800000> : vector<8xf32>
    %154 = vector.multi_reduction <maximumf>, %153, %cst_56 [1] : vector<8x8xf32> to vector<8xf32>
    %155 = vector.shape_cast %154 : vector<8xf32> to vector<8x1xf32>
    %156 = vector.broadcast %155 : vector<8x1xf32> to vector<8x8xf32>
    %157 = arith.subf %153, %156 : vector<8x8xf32>
    %158 = math.exp %157 : vector<8x8xf32>
    %cst_57 = arith.constant dense<0.000000e+00> : vector<8xf32>
    %159 = vector.multi_reduction <add>, %158, %cst_57 [1] : vector<8x8xf32> to vector<8xf32>
    %160 = vector.shape_cast %159 : vector<8xf32> to vector<8x1xf32>
    %161 = tpu.reciprocal %160 {approx = true} : vector<8x1xf32> -> vector<8x1xf32>
    %162 = vector.broadcast %161 : vector<8x1xf32> to vector<8x8xf32>
    %163 = arith.mulf %158, %162 : vector<8x8xf32>
    %164 = vector.extract_strided_slice %146 {offsets = [0, 0], sizes = [8, 8], strides = [1, 1]} : vector<16x8xf32> to vector<8x8xf32>
    %cst_58 = arith.constant dense<0.000000e+00> : vector<8x8xf32>
    %165 = tpu.matmul %163, %164, %cst_58 {dimension_numbers = #tpu.dot_dimension_numbers<[1], [0], [0], [1], [0, 0, 1, 1], [], []>} : vector<8x8xf32>, vector<8x8xf32>, vector<8x8xf32> -> vector<8x8xf32>
    %166 = arith.truncf %165 : vector<8x8xf32> to vector<8x8xbf16>
    %cst_59 = arith.constant dense<0.000000e+00> : vector<8x32xf32>
    %167 = tpu.matmul %166, %147, %cst_59 {dimension_numbers = #tpu.dot_dimension_numbers<[1], [0], [0], [1], [0, 0, 1, 1], [], []>} : vector<8x8xbf16>, vector<8x32xbf16>, vector<8x32xf32> -> vector<8x32xf32>
    %168 = arith.addf %122, %167 : vector<8x32xf32>
    %169 = vector.extract_strided_slice %144 {offsets = [8, 0], sizes = [8, 8], strides = [1, 1]} : vector<16x8xf32> to vector<8x8xf32>
    %170 = vector.extract_strided_slice %145 {offsets = [8, 0], sizes = [8, 8], strides = [1, 1]} : vector<16x8xf32> to vector<8x8xf32>
    %cst_60 = arith.constant dense<0.000000e+00> : vector<8x8xf32>
    %171 = tpu.matmul %169, %170, %cst_60 {dimension_numbers = #tpu.dot_dimension_numbers<[1], [1], [0], [0], [0, 0, 1, 0], [], []>} : vector<8x8xf32>, vector<8x8xf32>, vector<8x8xf32> -> vector<8x8xf32>
    %cst_61 = arith.constant 0.353553385 : f32
    %172 = vector.broadcast %cst_61 : f32 to vector<8x8xf32>
    %173 = arith.mulf %171, %172 : vector<8x8xf32>
    %174 = arith.addf %173, %17 : vector<8x8xf32>
    %cst_62 = arith.constant dense<0xFF800000> : vector<8xf32>
    %175 = vector.multi_reduction <maximumf>, %174, %cst_62 [1] : vector<8x8xf32> to vector<8xf32>
    %176 = vector.shape_cast %175 : vector<8xf32> to vector<8x1xf32>
    %177 = vector.broadcast %176 : vector<8x1xf32> to vector<8x8xf32>
    %178 = arith.subf %174, %177 : vector<8x8xf32>
    %179 = math.exp %178 : vector<8x8xf32>
    %cst_63 = arith.constant dense<0.000000e+00> : vector<8xf32>
    %180 = vector.multi_reduction <add>, %179, %cst_63 [1] : vector<8x8xf32> to vector<8xf32>
    %181 = vector.shape_cast %180 : vector<8xf32> to vector<8x1xf32>
    %182 = tpu.reciprocal %181 {approx = true} : vector<8x1xf32> -> vector<8x1xf32>
    %183 = vector.broadcast %182 : vector<8x1xf32> to vector<8x8xf32>
    %184 = arith.mulf %179, %183 : vector<8x8xf32>
    %185 = vector.extract_strided_slice %146 {offsets = [8, 0], sizes = [8, 8], strides = [1, 1]} : vector<16x8xf32> to vector<8x8xf32>
    %cst_64 = arith.constant dense<0.000000e+00> : vector<8x8xf32>
    %186 = tpu.matmul %184, %185, %cst_64 {dimension_numbers = #tpu.dot_dimension_numbers<[1], [0], [0], [1], [0, 0, 1, 1], [], []>} : vector<8x8xf32>, vector<8x8xf32>, vector<8x8xf32> -> vector<8x8xf32>
    %187 = arith.truncf %186 : vector<8x8xf32> to vector<8x8xbf16>
    %cst_65 = arith.constant dense<0.000000e+00> : vector<8x32xf32>
    %188 = tpu.matmul %187, %147, %cst_65 {dimension_numbers = #tpu.dot_dimension_numbers<[1], [0], [0], [1], [0, 0, 1, 1], [], []>} : vector<8x8xbf16>, vector<8x32xbf16>, vector<8x32xf32> -> vector<8x32xf32>
    %189 = arith.addf %143, %188 : vector<8x32xf32>
    %190 = vector.extract_strided_slice %51 {offsets = [0, 24], sizes = [16, 8], strides = [1, 1]} : vector<16x96xf32> to vector<16x8xf32>
    %191 = vector.extract_strided_slice %51 {offsets = [0, 56], sizes = [16, 8], strides = [1, 1]} : vector<16x96xf32> to vector<16x8xf32>
    %192 = vector.extract_strided_slice %51 {offsets = [0, 88], sizes = [16, 8], strides = [1, 1]} : vector<16x96xf32> to vector<16x8xf32>
    %193 = vector.extract_strided_slice %53 {offsets = [24, 0], sizes = [8, 32], strides = [1, 1]} : vector<32x32xbf16> to vector<8x32xbf16>
    %194 = vector.extract_strided_slice %190 {offsets = [0, 0], sizes = [8, 8], strides = [1, 1]} : vector<16x8xf32> to vector<8x8xf32>
    %195 = vector.extract_strided_slice %191 {offsets = [0, 0], sizes = [8, 8], strides = [1, 1]} : vector<16x8xf32> to vector<8x8xf32>
    %cst_66 = arith.constant dense<0.000000e+00> : vector<8x8xf32>
    %196 = tpu.matmul %194, %195, %cst_66 {dimension_numbers = #tpu.dot_dimension_numbers<[1], [1], [0], [0], [0, 0, 1, 0], [], []>} : vector<8x8xf32>, vector<8x8xf32>, vector<8x8xf32> -> vector<8x8xf32>
    %cst_67 = arith.constant 0.353553385 : f32
    %197 = vector.broadcast %cst_67 : f32 to vector<8x8xf32>
    %198 = arith.mulf %196, %197 : vector<8x8xf32>
    %199 = arith.addf %198, %9 : vector<8x8xf32>
    %cst_68 = arith.constant dense<0xFF800000> : vector<8xf32>
    %200 = vector.multi_reduction <maximumf>, %199, %cst_68 [1] : vector<8x8xf32> to vector<8xf32>
    %201 = vector.shape_cast %200 : vector<8xf32> to vector<8x1xf32>
    %202 = vector.broadcast %201 : vector<8x1xf32> to vector<8x8xf32>
    %203 = arith.subf %199, %202 : vector<8x8xf32>
    %204 = math.exp %203 : vector<8x8xf32>
    %cst_69 = arith.constant dense<0.000000e+00> : vector<8xf32>
    %205 = vector.multi_reduction <add>, %204, %cst_69 [1] : vector<8x8xf32> to vector<8xf32>
    %206 = vector.shape_cast %205 : vector<8xf32> to vector<8x1xf32>
    %207 = tpu.reciprocal %206 {approx = true} : vector<8x1xf32> -> vector<8x1xf32>
    %208 = vector.broadcast %207 : vector<8x1xf32> to vector<8x8xf32>
    %209 = arith.mulf %204, %208 : vector<8x8xf32>
    %210 = vector.extract_strided_slice %192 {offsets = [0, 0], sizes = [8, 8], strides = [1, 1]} : vector<16x8xf32> to vector<8x8xf32>
    %cst_70 = arith.constant dense<0.000000e+00> : vector<8x8xf32>
    %211 = tpu.matmul %209, %210, %cst_70 {dimension_numbers = #tpu.dot_dimension_numbers<[1], [0], [0], [1], [0, 0, 1, 1], [], []>} : vector<8x8xf32>, vector<8x8xf32>, vector<8x8xf32> -> vector<8x8xf32>
    %212 = arith.truncf %211 : vector<8x8xf32> to vector<8x8xbf16>
    %cst_71 = arith.constant dense<0.000000e+00> : vector<8x32xf32>
    %213 = tpu.matmul %212, %193, %cst_71 {dimension_numbers = #tpu.dot_dimension_numbers<[1], [0], [0], [1], [0, 0, 1, 1], [], []>} : vector<8x8xbf16>, vector<8x32xbf16>, vector<8x32xf32> -> vector<8x32xf32>
    %214 = arith.addf %168, %213 : vector<8x32xf32>
    %215 = vector.extract_strided_slice %190 {offsets = [8, 0], sizes = [8, 8], strides = [1, 1]} : vector<16x8xf32> to vector<8x8xf32>
    %216 = vector.extract_strided_slice %191 {offsets = [8, 0], sizes = [8, 8], strides = [1, 1]} : vector<16x8xf32> to vector<8x8xf32>
    %cst_72 = arith.constant dense<0.000000e+00> : vector<8x8xf32>
    %217 = tpu.matmul %215, %216, %cst_72 {dimension_numbers = #tpu.dot_dimension_numbers<[1], [1], [0], [0], [0, 0, 1, 0], [], []>} : vector<8x8xf32>, vector<8x8xf32>, vector<8x8xf32> -> vector<8x8xf32>
    %cst_73 = arith.constant 0.353553385 : f32
    %218 = vector.broadcast %cst_73 : f32 to vector<8x8xf32>
    %219 = arith.mulf %217, %218 : vector<8x8xf32>
    %220 = arith.addf %219, %17 : vector<8x8xf32>
    %cst_74 = arith.constant dense<0xFF800000> : vector<8xf32>
    %221 = vector.multi_reduction <maximumf>, %220, %cst_74 [1] : vector<8x8xf32> to vector<8xf32>
    %222 = vector.shape_cast %221 : vector<8xf32> to vector<8x1xf32>
    %223 = vector.broadcast %222 : vector<8x1xf32> to vector<8x8xf32>
    %224 = arith.subf %220, %223 : vector<8x8xf32>
    %225 = math.exp %224 : vector<8x8xf32>
    %cst_75 = arith.constant dense<0.000000e+00> : vector<8xf32>
    %226 = vector.multi_reduction <add>, %225, %cst_75 [1] : vector<8x8xf32> to vector<8xf32>
    %227 = vector.shape_cast %226 : vector<8xf32> to vector<8x1xf32>
    %228 = tpu.reciprocal %227 {approx = true} : vector<8x1xf32> -> vector<8x1xf32>
    %229 = vector.broadcast %228 : vector<8x1xf32> to vector<8x8xf32>
    %230 = arith.mulf %225, %229 : vector<8x8xf32>
    %231 = vector.extract_strided_slice %192 {offsets = [8, 0], sizes = [8, 8], strides = [1, 1]} : vector<16x8xf32> to vector<8x8xf32>
    %cst_76 = arith.constant dense<0.000000e+00> : vector<8x8xf32>
    %232 = tpu.matmul %230, %231, %cst_76 {dimension_numbers = #tpu.dot_dimension_numbers<[1], [0], [0], [1], [0, 0, 1, 1], [], []>} : vector<8x8xf32>, vector<8x8xf32>, vector<8x8xf32> -> vector<8x8xf32>
    %233 = arith.truncf %232 : vector<8x8xf32> to vector<8x8xbf16>
    %cst_77 = arith.constant dense<0.000000e+00> : vector<8x32xf32>
    %234 = tpu.matmul %233, %193, %cst_77 {dimension_numbers = #tpu.dot_dimension_numbers<[1], [0], [0], [1], [0, 0, 1, 1], [], []>} : vector<8x8xbf16>, vector<8x32xbf16>, vector<8x32xf32> -> vector<8x32xf32>
    %235 = arith.addf %189, %234 : vector<8x32xf32>
    %236 = tpu.concatenate %214, %235 in 0 : vector<8x32xf32>, vector<8x32xf32> -> vector<16x32xf32>
    %c0_78 = arith.constant 0 : index
    %c0_79 = arith.constant 0 : index
    %c0_80 = arith.constant 0 : index
    %237 = vector.load %arg9[%c0_78, %c0_79, %c0_80] : memref<2x1x32xf32, #tpu.memory_space<vmem>>, vector<1x1x32xf32>
    %238 = vector.shape_cast %237 : vector<1x1x32xf32> to vector<1x32xf32>
    %239 = vector.broadcast %238 : vector<1x32xf32> to vector<16x32xf32>
    %240 = arith.addf %236, %239 : vector<16x32xf32>
    %241 = arith.addf %240, %43 : vector<16x32xf32>
    %c0_81 = arith.constant 0 : index
    %c0_82 = arith.constant 0 : index
    %c0_83 = arith.constant 0 : index
    %242 = vector.load %arg10[%c0_81, %c0_82, %c0_83] : memref<2x1x32xf32, #tpu.memory_space<vmem>>, vector<1x1x32xf32>
    %243 = vector.shape_cast %242 : vector<1x1x32xf32> to vector<1x32xf32>
    %c0_84 = arith.constant 0 : index
    %c0_85 = arith.constant 0 : index
    %c0_86 = arith.constant 0 : index
    %244 = vector.load %arg11[%c0_84, %c0_85, %c0_86] : memref<2x1x32xf32, #tpu.memory_space<vmem>>, vector<1x1x32xf32>
    %245 = vector.shape_cast %244 : vector<1x1x32xf32> to vector<1x32xf32>
    %cst_87 = arith.constant dense<0.000000e+00> : vector<16xf32>
    %246 = vector.multi_reduction <add>, %241, %cst_87 [1] : vector<16x32xf32> to vector<16xf32>
    %247 = vector.shape_cast %246 : vector<16xf32> to vector<16x1xf32>
    %cst_88 = arith.constant 3.200000e+01 : f32
    %248 = vector.broadcast %cst_88 : f32 to vector<16x1xf32>
    %249 = arith.divf %247, %248 : vector<16x1xf32>
    %250 = arith.mulf %241, %241 : vector<16x32xf32>
    %cst_89 = arith.constant dense<0.000000e+00> : vector<16xf32>
    %251 = vector.multi_reduction <add>, %250, %cst_89 [1] : vector<16x32xf32> to vector<16xf32>
    %252 = vector.shape_cast %251 : vector<16xf32> to vector<16x1xf32>
    %cst_90 = arith.constant 3.200000e+01 : f32
    %253 = vector.broadcast %cst_90 : f32 to vector<16x1xf32>
    %254 = arith.divf %252, %253 : vector<16x1xf32>
    %255 = arith.mulf %249, %249 : vector<16x1xf32>
    %256 = arith.subf %254, %255 : vector<16x1xf32>
    %cst_91 = arith.constant 0.000000e+00 : f32
    %257 = vector.broadcast %cst_91 : f32 to vector<16x1xf32>
    %258 = arith.maximumf %256, %257 : vector<16x1xf32>
    %259 = vector.broadcast %249 : vector<16x1xf32> to vector<16x32xf32>
    %260 = arith.subf %241, %259 : vector<16x32xf32>
    %cst_92 = arith.constant 9.99999996E-13 : f32
    %261 = vector.broadcast %cst_92 : f32 to vector<16x1xf32>
    %262 = arith.addf %258, %261 : vector<16x1xf32>
    %263 = math.rsqrt %262 : vector<16x1xf32>
    %264 = vector.broadcast %263 : vector<16x1xf32> to vector<16x32xf32>
    %265 = arith.mulf %260, %264 : vector<16x32xf32>
    %266 = vector.broadcast %243 : vector<1x32xf32> to vector<16x32xf32>
    %267 = arith.mulf %265, %266 : vector<16x32xf32>
    %268 = vector.broadcast %245 : vector<1x32xf32> to vector<16x32xf32>
    %269 = arith.addf %267, %268 : vector<16x32xf32>
    %270 = arith.truncf %269 : vector<16x32xf32> to vector<16x32xbf16>
    %c0_93 = arith.constant 0 : index
    %c0_94 = arith.constant 0 : index
    %c0_95 = arith.constant 0 : index
    %271 = vector.load %arg12[%c0_93, %c0_94, %c0_95] : memref<2x32x64xbf16, #tpu.memory_space<vmem>>, vector<1x32x64xbf16>
    %272 = vector.shape_cast %271 : vector<1x32x64xbf16> to vector<32x64xbf16>
    %cst_96 = arith.constant dense<0.000000e+00> : vector<16x64xf32>
    %273 = tpu.matmul %270, %272, %cst_96 {dimension_numbers = #tpu.dot_dimension_numbers<[1], [0], [0], [1], [0, 0, 1, 1], [], []>} : vector<16x32xbf16>, vector<32x64xbf16>, vector<16x64xf32> -> vector<16x64xf32>
    %c0_97 = arith.constant 0 : index
    %c0_98 = arith.constant 0 : index
    %c0_99 = arith.constant 0 : index
    %274 = vector.load %arg13[%c0_97, %c0_98, %c0_99] : memref<2x1x64xf32, #tpu.memory_space<vmem>>, vector<1x1x64xf32>
    %275 = vector.shape_cast %274 : vector<1x1x64xf32> to vector<1x64xf32>
    %276 = vector.broadcast %275 : vector<1x64xf32> to vector<16x64xf32>
    %277 = arith.addf %273, %276 : vector<16x64xf32>
    %278 = arith.mulf %277, %277 : vector<16x64xf32>
    %279 = arith.mulf %277, %278 : vector<16x64xf32>
    %cst_100 = arith.constant 4.471500e-02 : f32
    %280 = vector.broadcast %cst_100 : f32 to vector<16x64xf32>
    %281 = arith.mulf %280, %279 : vector<16x64xf32>
    %282 = arith.addf %277, %281 : vector<16x64xf32>
    %cst_101 = arith.constant 0.797884583 : f32
    %283 = vector.broadcast %cst_101 : f32 to vector<16x64xf32>
    %284 = arith.mulf %283, %282 : vector<16x64xf32>
    %285 = math.tanh %284 : vector<16x64xf32>
    %cst_102 = arith.constant 1.000000e+00 : f32
    %286 = vector.broadcast %cst_102 : f32 to vector<16x64xf32>
    %287 = arith.addf %286, %285 : vector<16x64xf32>
    %cst_103 = arith.constant 5.000000e-01 : f32
    %288 = vector.broadcast %cst_103 : f32 to vector<16x64xf32>
    %289 = arith.mulf %288, %287 : vector<16x64xf32>
    %290 = arith.mulf %277, %289 : vector<16x64xf32>
    %291 = arith.truncf %290 : vector<16x64xf32> to vector<16x64xbf16>
    %c0_104 = arith.constant 0 : index
    %c0_105 = arith.constant 0 : index
    %c0_106 = arith.constant 0 : index
    %292 = vector.load %arg14[%c0_104, %c0_105, %c0_106] : memref<2x64x32xbf16, #tpu.memory_space<vmem>>, vector<1x64x32xbf16>
    %293 = vector.shape_cast %292 : vector<1x64x32xbf16> to vector<64x32xbf16>
    %cst_107 = arith.constant dense<0.000000e+00> : vector<16x32xf32>
    %294 = tpu.matmul %291, %293, %cst_107 {dimension_numbers = #tpu.dot_dimension_numbers<[1], [0], [0], [1], [0, 0, 1, 1], [], []>} : vector<16x64xbf16>, vector<64x32xbf16>, vector<16x32xf32> -> vector<16x32xf32>
    %c0_108 = arith.constant 0 : index
    %c0_109 = arith.constant 0 : index
    %c0_110 = arith.constant 0 : index
    %295 = vector.load %arg15[%c0_108, %c0_109, %c0_110] : memref<2x1x32xf32, #tpu.memory_space<vmem>>, vector<1x1x32xf32>
    %296 = vector.shape_cast %295 : vector<1x1x32xf32> to vector<1x32xf32>
    %297 = vector.broadcast %296 : vector<1x32xf32> to vector<16x32xf32>
    %298 = arith.addf %294, %297 : vector<16x32xf32>
    %299 = arith.addf %298, %269 : vector<16x32xf32>
    %c0_111 = arith.constant 0 : index
    %c0_112 = arith.constant 0 : index
    %c0_113 = arith.constant 0 : index
    %300 = vector.load %arg16[%c0_111, %c0_112, %c0_113] : memref<2x1x32xf32, #tpu.memory_space<vmem>>, vector<1x1x32xf32>
    %301 = vector.shape_cast %300 : vector<1x1x32xf32> to vector<1x32xf32>
    %c0_114 = arith.constant 0 : index
    %c0_115 = arith.constant 0 : index
    %c0_116 = arith.constant 0 : index
    %302 = vector.load %arg17[%c0_114, %c0_115, %c0_116] : memref<2x1x32xf32, #tpu.memory_space<vmem>>, vector<1x1x32xf32>
    %303 = vector.shape_cast %302 : vector<1x1x32xf32> to vector<1x32xf32>
    %cst_117 = arith.constant dense<0.000000e+00> : vector<16xf32>
    %304 = vector.multi_reduction <add>, %299, %cst_117 [1] : vector<16x32xf32> to vector<16xf32>
    %305 = vector.shape_cast %304 : vector<16xf32> to vector<16x1xf32>
    %cst_118 = arith.constant 3.200000e+01 : f32
    %306 = vector.broadcast %cst_118 : f32 to vector<16x1xf32>
    %307 = arith.divf %305, %306 : vector<16x1xf32>
    %308 = arith.mulf %299, %299 : vector<16x32xf32>
    %cst_119 = arith.constant dense<0.000000e+00> : vector<16xf32>
    %309 = vector.multi_reduction <add>, %308, %cst_119 [1] : vector<16x32xf32> to vector<16xf32>
    %310 = vector.shape_cast %309 : vector<16xf32> to vector<16x1xf32>
    %cst_120 = arith.constant 3.200000e+01 : f32
    %311 = vector.broadcast %cst_120 : f32 to vector<16x1xf32>
    %312 = arith.divf %310, %311 : vector<16x1xf32>
    %313 = arith.mulf %307, %307 : vector<16x1xf32>
    %314 = arith.subf %312, %313 : vector<16x1xf32>
    %cst_121 = arith.constant 0.000000e+00 : f32
    %315 = vector.broadcast %cst_121 : f32 to vector<16x1xf32>
    %316 = arith.maximumf %314, %315 : vector<16x1xf32>
    %317 = vector.broadcast %307 : vector<16x1xf32> to vector<16x32xf32>
    %318 = arith.subf %299, %317 : vector<16x32xf32>
    %cst_122 = arith.constant 9.99999996E-13 : f32
    %319 = vector.broadcast %cst_122 : f32 to vector<16x1xf32>
    %320 = arith.addf %316, %319 : vector<16x1xf32>
    %321 = math.rsqrt %320 : vector<16x1xf32>
    %322 = vector.broadcast %321 : vector<16x1xf32> to vector<16x32xf32>
    %323 = arith.mulf %318, %322 : vector<16x32xf32>
    %324 = vector.broadcast %301 : vector<1x32xf32> to vector<16x32xf32>
    %325 = arith.mulf %323, %324 : vector<16x32xf32>
    %326 = vector.broadcast %303 : vector<1x32xf32> to vector<16x32xf32>
    %327 = arith.addf %325, %326 : vector<16x32xf32>
    %328 = arith.truncf %327 : vector<16x32xf32> to vector<16x32xbf16>
    %c1_123 = arith.constant 1 : index
    %c0_124 = arith.constant 0 : index
    %c0_125 = arith.constant 0 : index
    %329 = vector.load %arg6[%c1_123, %c0_124, %c0_125] : memref<2x32x96xbf16, #tpu.memory_space<vmem>>, vector<1x32x96xbf16>
    %330 = vector.shape_cast %329 : vector<1x32x96xbf16> to vector<32x96xbf16>
    %cst_126 = arith.constant dense<0.000000e+00> : vector<16x96xf32>
    %331 = tpu.matmul %328, %330, %cst_126 {dimension_numbers = #tpu.dot_dimension_numbers<[1], [0], [0], [1], [0, 0, 1, 1], [], []>} : vector<16x32xbf16>, vector<32x96xbf16>, vector<16x96xf32> -> vector<16x96xf32>
    %c1_127 = arith.constant 1 : index
    %c0_128 = arith.constant 0 : index
    %c0_129 = arith.constant 0 : index
    %332 = vector.load %arg7[%c1_127, %c0_128, %c0_129] : memref<2x1x96xf32, #tpu.memory_space<vmem>>, vector<1x1x96xf32>
    %333 = vector.shape_cast %332 : vector<1x1x96xf32> to vector<1x96xf32>
    %334 = vector.broadcast %333 : vector<1x96xf32> to vector<16x96xf32>
    %335 = arith.addf %331, %334 : vector<16x96xf32>
    %c1_130 = arith.constant 1 : index
    %c0_131 = arith.constant 0 : index
    %c0_132 = arith.constant 0 : index
    %336 = vector.load %arg8[%c1_130, %c0_131, %c0_132] : memref<2x32x32xbf16, #tpu.memory_space<vmem>>, vector<1x32x32xbf16>
    %337 = vector.shape_cast %336 : vector<1x32x32xbf16> to vector<32x32xbf16>
    %338 = vector.extract_strided_slice %335 {offsets = [0, 0], sizes = [16, 8], strides = [1, 1]} : vector<16x96xf32> to vector<16x8xf32>
    %339 = vector.extract_strided_slice %335 {offsets = [0, 32], sizes = [16, 8], strides = [1, 1]} : vector<16x96xf32> to vector<16x8xf32>
    %340 = vector.extract_strided_slice %335 {offsets = [0, 64], sizes = [16, 8], strides = [1, 1]} : vector<16x96xf32> to vector<16x8xf32>
    %341 = vector.extract_strided_slice %337 {offsets = [0, 0], sizes = [8, 32], strides = [1, 1]} : vector<32x32xbf16> to vector<8x32xbf16>
    %342 = vector.extract_strided_slice %338 {offsets = [0, 0], sizes = [8, 8], strides = [1, 1]} : vector<16x8xf32> to vector<8x8xf32>
    %343 = vector.extract_strided_slice %339 {offsets = [0, 0], sizes = [8, 8], strides = [1, 1]} : vector<16x8xf32> to vector<8x8xf32>
    %cst_133 = arith.constant dense<0.000000e+00> : vector<8x8xf32>
    %344 = tpu.matmul %342, %343, %cst_133 {dimension_numbers = #tpu.dot_dimension_numbers<[1], [1], [0], [0], [0, 0, 1, 0], [], []>} : vector<8x8xf32>, vector<8x8xf32>, vector<8x8xf32> -> vector<8x8xf32>
    %cst_134 = arith.constant 0.353553385 : f32
    %345 = vector.broadcast %cst_134 : f32 to vector<8x8xf32>
    %346 = arith.mulf %344, %345 : vector<8x8xf32>
    %347 = arith.addf %346, %9 : vector<8x8xf32>
    %cst_135 = arith.constant dense<0xFF800000> : vector<8xf32>
    %348 = vector.multi_reduction <maximumf>, %347, %cst_135 [1] : vector<8x8xf32> to vector<8xf32>
    %349 = vector.shape_cast %348 : vector<8xf32> to vector<8x1xf32>
    %350 = vector.broadcast %349 : vector<8x1xf32> to vector<8x8xf32>
    %351 = arith.subf %347, %350 : vector<8x8xf32>
    %352 = math.exp %351 : vector<8x8xf32>
    %cst_136 = arith.constant dense<0.000000e+00> : vector<8xf32>
    %353 = vector.multi_reduction <add>, %352, %cst_136 [1] : vector<8x8xf32> to vector<8xf32>
    %354 = vector.shape_cast %353 : vector<8xf32> to vector<8x1xf32>
    %355 = tpu.reciprocal %354 {approx = true} : vector<8x1xf32> -> vector<8x1xf32>
    %356 = vector.broadcast %355 : vector<8x1xf32> to vector<8x8xf32>
    %357 = arith.mulf %352, %356 : vector<8x8xf32>
    %358 = vector.extract_strided_slice %340 {offsets = [0, 0], sizes = [8, 8], strides = [1, 1]} : vector<16x8xf32> to vector<8x8xf32>
    %cst_137 = arith.constant dense<0.000000e+00> : vector<8x8xf32>
    %359 = tpu.matmul %357, %358, %cst_137 {dimension_numbers = #tpu.dot_dimension_numbers<[1], [0], [0], [1], [0, 0, 1, 1], [], []>} : vector<8x8xf32>, vector<8x8xf32>, vector<8x8xf32> -> vector<8x8xf32>
    %360 = arith.truncf %359 : vector<8x8xf32> to vector<8x8xbf16>
    %cst_138 = arith.constant dense<0.000000e+00> : vector<8x32xf32>
    %361 = tpu.matmul %360, %341, %cst_138 {dimension_numbers = #tpu.dot_dimension_numbers<[1], [0], [0], [1], [0, 0, 1, 1], [], []>} : vector<8x8xbf16>, vector<8x32xbf16>, vector<8x32xf32> -> vector<8x32xf32>
    %362 = vector.extract_strided_slice %338 {offsets = [8, 0], sizes = [8, 8], strides = [1, 1]} : vector<16x8xf32> to vector<8x8xf32>
    %363 = vector.extract_strided_slice %339 {offsets = [8, 0], sizes = [8, 8], strides = [1, 1]} : vector<16x8xf32> to vector<8x8xf32>
    %cst_139 = arith.constant dense<0.000000e+00> : vector<8x8xf32>
    %364 = tpu.matmul %362, %363, %cst_139 {dimension_numbers = #tpu.dot_dimension_numbers<[1], [1], [0], [0], [0, 0, 1, 0], [], []>} : vector<8x8xf32>, vector<8x8xf32>, vector<8x8xf32> -> vector<8x8xf32>
    %cst_140 = arith.constant 0.353553385 : f32
    %365 = vector.broadcast %cst_140 : f32 to vector<8x8xf32>
    %366 = arith.mulf %364, %365 : vector<8x8xf32>
    %367 = arith.addf %366, %17 : vector<8x8xf32>
    %cst_141 = arith.constant dense<0xFF800000> : vector<8xf32>
    %368 = vector.multi_reduction <maximumf>, %367, %cst_141 [1] : vector<8x8xf32> to vector<8xf32>
    %369 = vector.shape_cast %368 : vector<8xf32> to vector<8x1xf32>
    %370 = vector.broadcast %369 : vector<8x1xf32> to vector<8x8xf32>
    %371 = arith.subf %367, %370 : vector<8x8xf32>
    %372 = math.exp %371 : vector<8x8xf32>
    %cst_142 = arith.constant dense<0.000000e+00> : vector<8xf32>
    %373 = vector.multi_reduction <add>, %372, %cst_142 [1] : vector<8x8xf32> to vector<8xf32>
    %374 = vector.shape_cast %373 : vector<8xf32> to vector<8x1xf32>
    %375 = tpu.reciprocal %374 {approx = true} : vector<8x1xf32> -> vector<8x1xf32>
    %376 = vector.broadcast %375 : vector<8x1xf32> to vector<8x8xf32>
    %377 = arith.mulf %372, %376 : vector<8x8xf32>
    %378 = vector.extract_strided_slice %340 {offsets = [8, 0], sizes = [8, 8], strides = [1, 1]} : vector<16x8xf32> to vector<8x8xf32>
    %cst_143 = arith.constant dense<0.000000e+00> : vector<8x8xf32>
    %379 = tpu.matmul %377, %378, %cst_143 {dimension_numbers = #tpu.dot_dimension_numbers<[1], [0], [0], [1], [0, 0, 1, 1], [], []>} : vector<8x8xf32>, vector<8x8xf32>, vector<8x8xf32> -> vector<8x8xf32>
    %380 = arith.truncf %379 : vector<8x8xf32> to vector<8x8xbf16>
    %cst_144 = arith.constant dense<0.000000e+00> : vector<8x32xf32>
    %381 = tpu.matmul %380, %341, %cst_144 {dimension_numbers = #tpu.dot_dimension_numbers<[1], [0], [0], [1], [0, 0, 1, 1], [], []>} : vector<8x8xbf16>, vector<8x32xbf16>, vector<8x32xf32> -> vector<8x32xf32>
    %382 = vector.extract_strided_slice %335 {offsets = [0, 8], sizes = [16, 8], strides = [1, 1]} : vector<16x96xf32> to vector<16x8xf32>
    %383 = vector.extract_strided_slice %335 {offsets = [0, 40], sizes = [16, 8], strides = [1, 1]} : vector<16x96xf32> to vector<16x8xf32>
    %384 = vector.extract_strided_slice %335 {offsets = [0, 72], sizes = [16, 8], strides = [1, 1]} : vector<16x96xf32> to vector<16x8xf32>
    %385 = vector.extract_strided_slice %337 {offsets = [8, 0], sizes = [8, 32], strides = [1, 1]} : vector<32x32xbf16> to vector<8x32xbf16>
    %386 = vector.extract_strided_slice %382 {offsets = [0, 0], sizes = [8, 8], strides = [1, 1]} : vector<16x8xf32> to vector<8x8xf32>
    %387 = vector.extract_strided_slice %383 {offsets = [0, 0], sizes = [8, 8], strides = [1, 1]} : vector<16x8xf32> to vector<8x8xf32>
    %cst_145 = arith.constant dense<0.000000e+00> : vector<8x8xf32>
    %388 = tpu.matmul %386, %387, %cst_145 {dimension_numbers = #tpu.dot_dimension_numbers<[1], [1], [0], [0], [0, 0, 1, 0], [], []>} : vector<8x8xf32>, vector<8x8xf32>, vector<8x8xf32> -> vector<8x8xf32>
    %cst_146 = arith.constant 0.353553385 : f32
    %389 = vector.broadcast %cst_146 : f32 to vector<8x8xf32>
    %390 = arith.mulf %388, %389 : vector<8x8xf32>
    %391 = arith.addf %390, %9 : vector<8x8xf32>
    %cst_147 = arith.constant dense<0xFF800000> : vector<8xf32>
    %392 = vector.multi_reduction <maximumf>, %391, %cst_147 [1] : vector<8x8xf32> to vector<8xf32>
    %393 = vector.shape_cast %392 : vector<8xf32> to vector<8x1xf32>
    %394 = vector.broadcast %393 : vector<8x1xf32> to vector<8x8xf32>
    %395 = arith.subf %391, %394 : vector<8x8xf32>
    %396 = math.exp %395 : vector<8x8xf32>
    %cst_148 = arith.constant dense<0.000000e+00> : vector<8xf32>
    %397 = vector.multi_reduction <add>, %396, %cst_148 [1] : vector<8x8xf32> to vector<8xf32>
    %398 = vector.shape_cast %397 : vector<8xf32> to vector<8x1xf32>
    %399 = tpu.reciprocal %398 {approx = true} : vector<8x1xf32> -> vector<8x1xf32>
    %400 = vector.broadcast %399 : vector<8x1xf32> to vector<8x8xf32>
    %401 = arith.mulf %396, %400 : vector<8x8xf32>
    %402 = vector.extract_strided_slice %384 {offsets = [0, 0], sizes = [8, 8], strides = [1, 1]} : vector<16x8xf32> to vector<8x8xf32>
    %cst_149 = arith.constant dense<0.000000e+00> : vector<8x8xf32>
    %403 = tpu.matmul %401, %402, %cst_149 {dimension_numbers = #tpu.dot_dimension_numbers<[1], [0], [0], [1], [0, 0, 1, 1], [], []>} : vector<8x8xf32>, vector<8x8xf32>, vector<8x8xf32> -> vector<8x8xf32>
    %404 = arith.truncf %403 : vector<8x8xf32> to vector<8x8xbf16>
    %cst_150 = arith.constant dense<0.000000e+00> : vector<8x32xf32>
    %405 = tpu.matmul %404, %385, %cst_150 {dimension_numbers = #tpu.dot_dimension_numbers<[1], [0], [0], [1], [0, 0, 1, 1], [], []>} : vector<8x8xbf16>, vector<8x32xbf16>, vector<8x32xf32> -> vector<8x32xf32>
    %406 = arith.addf %361, %405 : vector<8x32xf32>
    %407 = vector.extract_strided_slice %382 {offsets = [8, 0], sizes = [8, 8], strides = [1, 1]} : vector<16x8xf32> to vector<8x8xf32>
    %408 = vector.extract_strided_slice %383 {offsets = [8, 0], sizes = [8, 8], strides = [1, 1]} : vector<16x8xf32> to vector<8x8xf32>
    %cst_151 = arith.constant dense<0.000000e+00> : vector<8x8xf32>
    %409 = tpu.matmul %407, %408, %cst_151 {dimension_numbers = #tpu.dot_dimension_numbers<[1], [1], [0], [0], [0, 0, 1, 0], [], []>} : vector<8x8xf32>, vector<8x8xf32>, vector<8x8xf32> -> vector<8x8xf32>
    %cst_152 = arith.constant 0.353553385 : f32
    %410 = vector.broadcast %cst_152 : f32 to vector<8x8xf32>
    %411 = arith.mulf %409, %410 : vector<8x8xf32>
    %412 = arith.addf %411, %17 : vector<8x8xf32>
    %cst_153 = arith.constant dense<0xFF800000> : vector<8xf32>
    %413 = vector.multi_reduction <maximumf>, %412, %cst_153 [1] : vector<8x8xf32> to vector<8xf32>
    %414 = vector.shape_cast %413 : vector<8xf32> to vector<8x1xf32>
    %415 = vector.broadcast %414 : vector<8x1xf32> to vector<8x8xf32>
    %416 = arith.subf %412, %415 : vector<8x8xf32>
    %417 = math.exp %416 : vector<8x8xf32>
    %cst_154 = arith.constant dense<0.000000e+00> : vector<8xf32>
    %418 = vector.multi_reduction <add>, %417, %cst_154 [1] : vector<8x8xf32> to vector<8xf32>
    %419 = vector.shape_cast %418 : vector<8xf32> to vector<8x1xf32>
    %420 = tpu.reciprocal %419 {approx = true} : vector<8x1xf32> -> vector<8x1xf32>
    %421 = vector.broadcast %420 : vector<8x1xf32> to vector<8x8xf32>
    %422 = arith.mulf %417, %421 : vector<8x8xf32>
    %423 = vector.extract_strided_slice %384 {offsets = [8, 0], sizes = [8, 8], strides = [1, 1]} : vector<16x8xf32> to vector<8x8xf32>
    %cst_155 = arith.constant dense<0.000000e+00> : vector<8x8xf32>
    %424 = tpu.matmul %422, %423, %cst_155 {dimension_numbers = #tpu.dot_dimension_numbers<[1], [0], [0], [1], [0, 0, 1, 1], [], []>} : vector<8x8xf32>, vector<8x8xf32>, vector<8x8xf32> -> vector<8x8xf32>
    %425 = arith.truncf %424 : vector<8x8xf32> to vector<8x8xbf16>
    %cst_156 = arith.constant dense<0.000000e+00> : vector<8x32xf32>
    %426 = tpu.matmul %425, %385, %cst_156 {dimension_numbers = #tpu.dot_dimension_numbers<[1], [0], [0], [1], [0, 0, 1, 1], [], []>} : vector<8x8xbf16>, vector<8x32xbf16>, vector<8x32xf32> -> vector<8x32xf32>
    %427 = arith.addf %381, %426 : vector<8x32xf32>
    %428 = vector.extract_strided_slice %335 {offsets = [0, 16], sizes = [16, 8], strides = [1, 1]} : vector<16x96xf32> to vector<16x8xf32>
    %429 = vector.extract_strided_slice %335 {offsets = [0, 48], sizes = [16, 8], strides = [1, 1]} : vector<16x96xf32> to vector<16x8xf32>
    %430 = vector.extract_strided_slice %335 {offsets = [0, 80], sizes = [16, 8], strides = [1, 1]} : vector<16x96xf32> to vector<16x8xf32>
    %431 = vector.extract_strided_slice %337 {offsets = [16, 0], sizes = [8, 32], strides = [1, 1]} : vector<32x32xbf16> to vector<8x32xbf16>
    %432 = vector.extract_strided_slice %428 {offsets = [0, 0], sizes = [8, 8], strides = [1, 1]} : vector<16x8xf32> to vector<8x8xf32>
    %433 = vector.extract_strided_slice %429 {offsets = [0, 0], sizes = [8, 8], strides = [1, 1]} : vector<16x8xf32> to vector<8x8xf32>
    %cst_157 = arith.constant dense<0.000000e+00> : vector<8x8xf32>
    %434 = tpu.matmul %432, %433, %cst_157 {dimension_numbers = #tpu.dot_dimension_numbers<[1], [1], [0], [0], [0, 0, 1, 0], [], []>} : vector<8x8xf32>, vector<8x8xf32>, vector<8x8xf32> -> vector<8x8xf32>
    %cst_158 = arith.constant 0.353553385 : f32
    %435 = vector.broadcast %cst_158 : f32 to vector<8x8xf32>
    %436 = arith.mulf %434, %435 : vector<8x8xf32>
    %437 = arith.addf %436, %9 : vector<8x8xf32>
    %cst_159 = arith.constant dense<0xFF800000> : vector<8xf32>
    %438 = vector.multi_reduction <maximumf>, %437, %cst_159 [1] : vector<8x8xf32> to vector<8xf32>
    %439 = vector.shape_cast %438 : vector<8xf32> to vector<8x1xf32>
    %440 = vector.broadcast %439 : vector<8x1xf32> to vector<8x8xf32>
    %441 = arith.subf %437, %440 : vector<8x8xf32>
    %442 = math.exp %441 : vector<8x8xf32>
    %cst_160 = arith.constant dense<0.000000e+00> : vector<8xf32>
    %443 = vector.multi_reduction <add>, %442, %cst_160 [1] : vector<8x8xf32> to vector<8xf32>
    %444 = vector.shape_cast %443 : vector<8xf32> to vector<8x1xf32>
    %445 = tpu.reciprocal %444 {approx = true} : vector<8x1xf32> -> vector<8x1xf32>
    %446 = vector.broadcast %445 : vector<8x1xf32> to vector<8x8xf32>
    %447 = arith.mulf %442, %446 : vector<8x8xf32>
    %448 = vector.extract_strided_slice %430 {offsets = [0, 0], sizes = [8, 8], strides = [1, 1]} : vector<16x8xf32> to vector<8x8xf32>
    %cst_161 = arith.constant dense<0.000000e+00> : vector<8x8xf32>
    %449 = tpu.matmul %447, %448, %cst_161 {dimension_numbers = #tpu.dot_dimension_numbers<[1], [0], [0], [1], [0, 0, 1, 1], [], []>} : vector<8x8xf32>, vector<8x8xf32>, vector<8x8xf32> -> vector<8x8xf32>
    %450 = arith.truncf %449 : vector<8x8xf32> to vector<8x8xbf16>
    %cst_162 = arith.constant dense<0.000000e+00> : vector<8x32xf32>
    %451 = tpu.matmul %450, %431, %cst_162 {dimension_numbers = #tpu.dot_dimension_numbers<[1], [0], [0], [1], [0, 0, 1, 1], [], []>} : vector<8x8xbf16>, vector<8x32xbf16>, vector<8x32xf32> -> vector<8x32xf32>
    %452 = arith.addf %406, %451 : vector<8x32xf32>
    %453 = vector.extract_strided_slice %428 {offsets = [8, 0], sizes = [8, 8], strides = [1, 1]} : vector<16x8xf32> to vector<8x8xf32>
    %454 = vector.extract_strided_slice %429 {offsets = [8, 0], sizes = [8, 8], strides = [1, 1]} : vector<16x8xf32> to vector<8x8xf32>
    %cst_163 = arith.constant dense<0.000000e+00> : vector<8x8xf32>
    %455 = tpu.matmul %453, %454, %cst_163 {dimension_numbers = #tpu.dot_dimension_numbers<[1], [1], [0], [0], [0, 0, 1, 0], [], []>} : vector<8x8xf32>, vector<8x8xf32>, vector<8x8xf32> -> vector<8x8xf32>
    %cst_164 = arith.constant 0.353553385 : f32
    %456 = vector.broadcast %cst_164 : f32 to vector<8x8xf32>
    %457 = arith.mulf %455, %456 : vector<8x8xf32>
    %458 = arith.addf %457, %17 : vector<8x8xf32>
    %cst_165 = arith.constant dense<0xFF800000> : vector<8xf32>
    %459 = vector.multi_reduction <maximumf>, %458, %cst_165 [1] : vector<8x8xf32> to vector<8xf32>
    %460 = vector.shape_cast %459 : vector<8xf32> to vector<8x1xf32>
    %461 = vector.broadcast %460 : vector<8x1xf32> to vector<8x8xf32>
    %462 = arith.subf %458, %461 : vector<8x8xf32>
    %463 = math.exp %462 : vector<8x8xf32>
    %cst_166 = arith.constant dense<0.000000e+00> : vector<8xf32>
    %464 = vector.multi_reduction <add>, %463, %cst_166 [1] : vector<8x8xf32> to vector<8xf32>
    %465 = vector.shape_cast %464 : vector<8xf32> to vector<8x1xf32>
    %466 = tpu.reciprocal %465 {approx = true} : vector<8x1xf32> -> vector<8x1xf32>
    %467 = vector.broadcast %466 : vector<8x1xf32> to vector<8x8xf32>
    %468 = arith.mulf %463, %467 : vector<8x8xf32>
    %469 = vector.extract_strided_slice %430 {offsets = [8, 0], sizes = [8, 8], strides = [1, 1]} : vector<16x8xf32> to vector<8x8xf32>
    %cst_167 = arith.constant dense<0.000000e+00> : vector<8x8xf32>
    %470 = tpu.matmul %468, %469, %cst_167 {dimension_numbers = #tpu.dot_dimension_numbers<[1], [0], [0], [1], [0, 0, 1, 1], [], []>} : vector<8x8xf32>, vector<8x8xf32>, vector<8x8xf32> -> vector<8x8xf32>
    %471 = arith.truncf %470 : vector<8x8xf32> to vector<8x8xbf16>
    %cst_168 = arith.constant dense<0.000000e+00> : vector<8x32xf32>
    %472 = tpu.matmul %471, %431, %cst_168 {dimension_numbers = #tpu.dot_dimension_numbers<[1], [0], [0], [1], [0, 0, 1, 1], [], []>} : vector<8x8xbf16>, vector<8x32xbf16>, vector<8x32xf32> -> vector<8x32xf32>
    %473 = arith.addf %427, %472 : vector<8x32xf32>
    %474 = vector.extract_strided_slice %335 {offsets = [0, 24], sizes = [16, 8], strides = [1, 1]} : vector<16x96xf32> to vector<16x8xf32>
    %475 = vector.extract_strided_slice %335 {offsets = [0, 56], sizes = [16, 8], strides = [1, 1]} : vector<16x96xf32> to vector<16x8xf32>
    %476 = vector.extract_strided_slice %335 {offsets = [0, 88], sizes = [16, 8], strides = [1, 1]} : vector<16x96xf32> to vector<16x8xf32>
    %477 = vector.extract_strided_slice %337 {offsets = [24, 0], sizes = [8, 32], strides = [1, 1]} : vector<32x32xbf16> to vector<8x32xbf16>
    %478 = vector.extract_strided_slice %474 {offsets = [0, 0], sizes = [8, 8], strides = [1, 1]} : vector<16x8xf32> to vector<8x8xf32>
    %479 = vector.extract_strided_slice %475 {offsets = [0, 0], sizes = [8, 8], strides = [1, 1]} : vector<16x8xf32> to vector<8x8xf32>
    %cst_169 = arith.constant dense<0.000000e+00> : vector<8x8xf32>
    %480 = tpu.matmul %478, %479, %cst_169 {dimension_numbers = #tpu.dot_dimension_numbers<[1], [1], [0], [0], [0, 0, 1, 0], [], []>} : vector<8x8xf32>, vector<8x8xf32>, vector<8x8xf32> -> vector<8x8xf32>
    %cst_170 = arith.constant 0.353553385 : f32
    %481 = vector.broadcast %cst_170 : f32 to vector<8x8xf32>
    %482 = arith.mulf %480, %481 : vector<8x8xf32>
    %483 = arith.addf %482, %9 : vector<8x8xf32>
    %cst_171 = arith.constant dense<0xFF800000> : vector<8xf32>
    %484 = vector.multi_reduction <maximumf>, %483, %cst_171 [1] : vector<8x8xf32> to vector<8xf32>
    %485 = vector.shape_cast %484 : vector<8xf32> to vector<8x1xf32>
    %486 = vector.broadcast %485 : vector<8x1xf32> to vector<8x8xf32>
    %487 = arith.subf %483, %486 : vector<8x8xf32>
    %488 = math.exp %487 : vector<8x8xf32>
    %cst_172 = arith.constant dense<0.000000e+00> : vector<8xf32>
    %489 = vector.multi_reduction <add>, %488, %cst_172 [1] : vector<8x8xf32> to vector<8xf32>
    %490 = vector.shape_cast %489 : vector<8xf32> to vector<8x1xf32>
    %491 = tpu.reciprocal %490 {approx = true} : vector<8x1xf32> -> vector<8x1xf32>
    %492 = vector.broadcast %491 : vector<8x1xf32> to vector<8x8xf32>
    %493 = arith.mulf %488, %492 : vector<8x8xf32>
    %494 = vector.extract_strided_slice %476 {offsets = [0, 0], sizes = [8, 8], strides = [1, 1]} : vector<16x8xf32> to vector<8x8xf32>
    %cst_173 = arith.constant dense<0.000000e+00> : vector<8x8xf32>
    %495 = tpu.matmul %493, %494, %cst_173 {dimension_numbers = #tpu.dot_dimension_numbers<[1], [0], [0], [1], [0, 0, 1, 1], [], []>} : vector<8x8xf32>, vector<8x8xf32>, vector<8x8xf32> -> vector<8x8xf32>
    %496 = arith.truncf %495 : vector<8x8xf32> to vector<8x8xbf16>
    %cst_174 = arith.constant dense<0.000000e+00> : vector<8x32xf32>
    %497 = tpu.matmul %496, %477, %cst_174 {dimension_numbers = #tpu.dot_dimension_numbers<[1], [0], [0], [1], [0, 0, 1, 1], [], []>} : vector<8x8xbf16>, vector<8x32xbf16>, vector<8x32xf32> -> vector<8x32xf32>
    %498 = arith.addf %452, %497 : vector<8x32xf32>
    %499 = vector.extract_strided_slice %474 {offsets = [8, 0], sizes = [8, 8], strides = [1, 1]} : vector<16x8xf32> to vector<8x8xf32>
    %500 = vector.extract_strided_slice %475 {offsets = [8, 0], sizes = [8, 8], strides = [1, 1]} : vector<16x8xf32> to vector<8x8xf32>
    %cst_175 = arith.constant dense<0.000000e+00> : vector<8x8xf32>
    %501 = tpu.matmul %499, %500, %cst_175 {dimension_numbers = #tpu.dot_dimension_numbers<[1], [1], [0], [0], [0, 0, 1, 0], [], []>} : vector<8x8xf32>, vector<8x8xf32>, vector<8x8xf32> -> vector<8x8xf32>
    %cst_176 = arith.constant 0.353553385 : f32
    %502 = vector.broadcast %cst_176 : f32 to vector<8x8xf32>
    %503 = arith.mulf %501, %502 : vector<8x8xf32>
    %504 = arith.addf %503, %17 : vector<8x8xf32>
    %cst_177 = arith.constant dense<0xFF800000> : vector<8xf32>
    %505 = vector.multi_reduction <maximumf>, %504, %cst_177 [1] : vector<8x8xf32> to vector<8xf32>
    %506 = vector.shape_cast %505 : vector<8xf32> to vector<8x1xf32>
    %507 = vector.broadcast %506 : vector<8x1xf32> to vector<8x8xf32>
    %508 = arith.subf %504, %507 : vector<8x8xf32>
    %509 = math.exp %508 : vector<8x8xf32>
    %cst_178 = arith.constant dense<0.000000e+00> : vector<8xf32>
    %510 = vector.multi_reduction <add>, %509, %cst_178 [1] : vector<8x8xf32> to vector<8xf32>
    %511 = vector.shape_cast %510 : vector<8xf32> to vector<8x1xf32>
    %512 = tpu.reciprocal %511 {approx = true} : vector<8x1xf32> -> vector<8x1xf32>
    %513 = vector.broadcast %512 : vector<8x1xf32> to vector<8x8xf32>
    %514 = arith.mulf %509, %513 : vector<8x8xf32>
    %515 = vector.extract_strided_slice %476 {offsets = [8, 0], sizes = [8, 8], strides = [1, 1]} : vector<16x8xf32> to vector<8x8xf32>
    %cst_179 = arith.constant dense<0.000000e+00> : vector<8x8xf32>
    %516 = tpu.matmul %514, %515, %cst_179 {dimension_numbers = #tpu.dot_dimension_numbers<[1], [0], [0], [1], [0, 0, 1, 1], [], []>} : vector<8x8xf32>, vector<8x8xf32>, vector<8x8xf32> -> vector<8x8xf32>
    %517 = arith.truncf %516 : vector<8x8xf32> to vector<8x8xbf16>
    %cst_180 = arith.constant dense<0.000000e+00> : vector<8x32xf32>
    %518 = tpu.matmul %517, %477, %cst_180 {dimension_numbers = #tpu.dot_dimension_numbers<[1], [0], [0], [1], [0, 0, 1, 1], [], []>} : vector<8x8xbf16>, vector<8x32xbf16>, vector<8x32xf32> -> vector<8x32xf32>
    %519 = arith.addf %473, %518 : vector<8x32xf32>
    %520 = tpu.concatenate %498, %519 in 0 : vector<8x32xf32>, vector<8x32xf32> -> vector<16x32xf32>
    %c1_181 = arith.constant 1 : index
    %c0_182 = arith.constant 0 : index
    %c0_183 = arith.constant 0 : index
    %521 = vector.load %arg9[%c1_181, %c0_182, %c0_183] : memref<2x1x32xf32, #tpu.memory_space<vmem>>, vector<1x1x32xf32>
    %522 = vector.shape_cast %521 : vector<1x1x32xf32> to vector<1x32xf32>
    %523 = vector.broadcast %522 : vector<1x32xf32> to vector<16x32xf32>
    %524 = arith.addf %520, %523 : vector<16x32xf32>
    %525 = arith.addf %524, %327 : vector<16x32xf32>
    %c1_184 = arith.constant 1 : index
    %c0_185 = arith.constant 0 : index
    %c0_186 = arith.constant 0 : index
    %526 = vector.load %arg10[%c1_184, %c0_185, %c0_186] : memref<2x1x32xf32, #tpu.memory_space<vmem>>, vector<1x1x32xf32>
    %527 = vector.shape_cast %526 : vector<1x1x32xf32> to vector<1x32xf32>
    %c1_187 = arith.constant 1 : index
    %c0_188 = arith.constant 0 : index
    %c0_189 = arith.constant 0 : index
    %528 = vector.load %arg11[%c1_187, %c0_188, %c0_189] : memref<2x1x32xf32, #tpu.memory_space<vmem>>, vector<1x1x32xf32>
    %529 = vector.shape_cast %528 : vector<1x1x32xf32> to vector<1x32xf32>
    %cst_190 = arith.constant dense<0.000000e+00> : vector<16xf32>
    %530 = vector.multi_reduction <add>, %525, %cst_190 [1] : vector<16x32xf32> to vector<16xf32>
    %531 = vector.shape_cast %530 : vector<16xf32> to vector<16x1xf32>
    %cst_191 = arith.constant 3.200000e+01 : f32
    %532 = vector.broadcast %cst_191 : f32 to vector<16x1xf32>
    %533 = arith.divf %531, %532 : vector<16x1xf32>
    %534 = arith.mulf %525, %525 : vector<16x32xf32>
    %cst_192 = arith.constant dense<0.000000e+00> : vector<16xf32>
    %535 = vector.multi_reduction <add>, %534, %cst_192 [1] : vector<16x32xf32> to vector<16xf32>
    %536 = vector.shape_cast %535 : vector<16xf32> to vector<16x1xf32>
    %cst_193 = arith.constant 3.200000e+01 : f32
    %537 = vector.broadcast %cst_193 : f32 to vector<16x1xf32>
    %538 = arith.divf %536, %537 : vector<16x1xf32>
    %539 = arith.mulf %533, %533 : vector<16x1xf32>
    %540 = arith.subf %538, %539 : vector<16x1xf32>
    %cst_194 = arith.constant 0.000000e+00 : f32
    %541 = vector.broadcast %cst_194 : f32 to vector<16x1xf32>
    %542 = arith.maximumf %540, %541 : vector<16x1xf32>
    %543 = vector.broadcast %533 : vector<16x1xf32> to vector<16x32xf32>
    %544 = arith.subf %525, %543 : vector<16x32xf32>
    %cst_195 = arith.constant 9.99999996E-13 : f32
    %545 = vector.broadcast %cst_195 : f32 to vector<16x1xf32>
    %546 = arith.addf %542, %545 : vector<16x1xf32>
    %547 = math.rsqrt %546 : vector<16x1xf32>
    %548 = vector.broadcast %547 : vector<16x1xf32> to vector<16x32xf32>
    %549 = arith.mulf %544, %548 : vector<16x32xf32>
    %550 = vector.broadcast %527 : vector<1x32xf32> to vector<16x32xf32>
    %551 = arith.mulf %549, %550 : vector<16x32xf32>
    %552 = vector.broadcast %529 : vector<1x32xf32> to vector<16x32xf32>
    %553 = arith.addf %551, %552 : vector<16x32xf32>
    %554 = arith.truncf %553 : vector<16x32xf32> to vector<16x32xbf16>
    %c1_196 = arith.constant 1 : index
    %c0_197 = arith.constant 0 : index
    %c0_198 = arith.constant 0 : index
    %555 = vector.load %arg12[%c1_196, %c0_197, %c0_198] : memref<2x32x64xbf16, #tpu.memory_space<vmem>>, vector<1x32x64xbf16>
    %556 = vector.shape_cast %555 : vector<1x32x64xbf16> to vector<32x64xbf16>
    %cst_199 = arith.constant dense<0.000000e+00> : vector<16x64xf32>
    %557 = tpu.matmul %554, %556, %cst_199 {dimension_numbers = #tpu.dot_dimension_numbers<[1], [0], [0], [1], [0, 0, 1, 1], [], []>} : vector<16x32xbf16>, vector<32x64xbf16>, vector<16x64xf32> -> vector<16x64xf32>
    %c1_200 = arith.constant 1 : index
    %c0_201 = arith.constant 0 : index
    %c0_202 = arith.constant 0 : index
    %558 = vector.load %arg13[%c1_200, %c0_201, %c0_202] : memref<2x1x64xf32, #tpu.memory_space<vmem>>, vector<1x1x64xf32>
    %559 = vector.shape_cast %558 : vector<1x1x64xf32> to vector<1x64xf32>
    %560 = vector.broadcast %559 : vector<1x64xf32> to vector<16x64xf32>
    %561 = arith.addf %557, %560 : vector<16x64xf32>
    %562 = arith.mulf %561, %561 : vector<16x64xf32>
    %563 = arith.mulf %561, %562 : vector<16x64xf32>
    %cst_203 = arith.constant 4.471500e-02 : f32
    %564 = vector.broadcast %cst_203 : f32 to vector<16x64xf32>
    %565 = arith.mulf %564, %563 : vector<16x64xf32>
    %566 = arith.addf %561, %565 : vector<16x64xf32>
    %cst_204 = arith.constant 0.797884583 : f32
    %567 = vector.broadcast %cst_204 : f32 to vector<16x64xf32>
    %568 = arith.mulf %567, %566 : vector<16x64xf32>
    %569 = math.tanh %568 : vector<16x64xf32>
    %cst_205 = arith.constant 1.000000e+00 : f32
    %570 = vector.broadcast %cst_205 : f32 to vector<16x64xf32>
    %571 = arith.addf %570, %569 : vector<16x64xf32>
    %cst_206 = arith.constant 5.000000e-01 : f32
    %572 = vector.broadcast %cst_206 : f32 to vector<16x64xf32>
    %573 = arith.mulf %572, %571 : vector<16x64xf32>
    %574 = arith.mulf %561, %573 : vector<16x64xf32>
    %575 = arith.truncf %574 : vector<16x64xf32> to vector<16x64xbf16>
    %c1_207 = arith.constant 1 : index
    %c0_208 = arith.constant 0 : index
    %c0_209 = arith.constant 0 : index
    %576 = vector.load %arg14[%c1_207, %c0_208, %c0_209] : memref<2x64x32xbf16, #tpu.memory_space<vmem>>, vector<1x64x32xbf16>
    %577 = vector.shape_cast %576 : vector<1x64x32xbf16> to vector<64x32xbf16>
    %cst_210 = arith.constant dense<0.000000e+00> : vector<16x32xf32>
    %578 = tpu.matmul %575, %577, %cst_210 {dimension_numbers = #tpu.dot_dimension_numbers<[1], [0], [0], [1], [0, 0, 1, 1], [], []>} : vector<16x64xbf16>, vector<64x32xbf16>, vector<16x32xf32> -> vector<16x32xf32>
    %c1_211 = arith.constant 1 : index
    %c0_212 = arith.constant 0 : index
    %c0_213 = arith.constant 0 : index
    %579 = vector.load %arg15[%c1_211, %c0_212, %c0_213] : memref<2x1x32xf32, #tpu.memory_space<vmem>>, vector<1x1x32xf32>
    %580 = vector.shape_cast %579 : vector<1x1x32xf32> to vector<1x32xf32>
    %581 = vector.broadcast %580 : vector<1x32xf32> to vector<16x32xf32>
    %582 = arith.addf %578, %581 : vector<16x32xf32>
    %583 = arith.addf %582, %553 : vector<16x32xf32>
    %c1_214 = arith.constant 1 : index
    %c0_215 = arith.constant 0 : index
    %c0_216 = arith.constant 0 : index
    %584 = vector.load %arg16[%c1_214, %c0_215, %c0_216] : memref<2x1x32xf32, #tpu.memory_space<vmem>>, vector<1x1x32xf32>
    %585 = vector.shape_cast %584 : vector<1x1x32xf32> to vector<1x32xf32>
    %c1_217 = arith.constant 1 : index
    %c0_218 = arith.constant 0 : index
    %c0_219 = arith.constant 0 : index
    %586 = vector.load %arg17[%c1_217, %c0_218, %c0_219] : memref<2x1x32xf32, #tpu.memory_space<vmem>>, vector<1x1x32xf32>
    %587 = vector.shape_cast %586 : vector<1x1x32xf32> to vector<1x32xf32>
    %cst_220 = arith.constant dense<0.000000e+00> : vector<16xf32>
    %588 = vector.multi_reduction <add>, %583, %cst_220 [1] : vector<16x32xf32> to vector<16xf32>
    %589 = vector.shape_cast %588 : vector<16xf32> to vector<16x1xf32>
    %cst_221 = arith.constant 3.200000e+01 : f32
    %590 = vector.broadcast %cst_221 : f32 to vector<16x1xf32>
    %591 = arith.divf %589, %590 : vector<16x1xf32>
    %592 = arith.mulf %583, %583 : vector<16x32xf32>
    %cst_222 = arith.constant dense<0.000000e+00> : vector<16xf32>
    %593 = vector.multi_reduction <add>, %592, %cst_222 [1] : vector<16x32xf32> to vector<16xf32>
    %594 = vector.shape_cast %593 : vector<16xf32> to vector<16x1xf32>
    %cst_223 = arith.constant 3.200000e+01 : f32
    %595 = vector.broadcast %cst_223 : f32 to vector<16x1xf32>
    %596 = arith.divf %594, %595 : vector<16x1xf32>
    %597 = arith.mulf %591, %591 : vector<16x1xf32>
    %598 = arith.subf %596, %597 : vector<16x1xf32>
    %cst_224 = arith.constant 0.000000e+00 : f32
    %599 = vector.broadcast %cst_224 : f32 to vector<16x1xf32>
    %600 = arith.maximumf %598, %599 : vector<16x1xf32>
    %601 = vector.broadcast %591 : vector<16x1xf32> to vector<16x32xf32>
    %602 = arith.subf %583, %601 : vector<16x32xf32>
    %cst_225 = arith.constant 9.99999996E-13 : f32
    %603 = vector.broadcast %cst_225 : f32 to vector<16x1xf32>
    %604 = arith.addf %600, %603 : vector<16x1xf32>
    %605 = math.rsqrt %604 : vector<16x1xf32>
    %606 = vector.broadcast %605 : vector<16x1xf32> to vector<16x32xf32>
    %607 = arith.mulf %602, %606 : vector<16x32xf32>
    %608 = vector.broadcast %585 : vector<1x32xf32> to vector<16x32xf32>
    %609 = arith.mulf %607, %608 : vector<16x32xf32>
    %610 = vector.broadcast %587 : vector<1x32xf32> to vector<16x32xf32>
    %611 = arith.addf %609, %610 : vector<16x32xf32>
    %c0_226 = arith.constant 0 : index
    %c0_227 = arith.constant 0 : index
    %c0_228 = arith.constant 0 : index
    %612 = vector.load %arg3[%c0_226, %c0_227, %c0_228] : memref<2x8x8xf32, #tpu.memory_space<vmem>>, vector<1x8x8xf32>
    %613 = vector.shape_cast %612 : vector<1x8x8xf32> to vector<8x8xf32>
    %614 = vector.extract_strided_slice %611 {offsets = [0, 0], sizes = [8, 32], strides = [1, 1]} : vector<16x32xf32> to vector<8x32xf32>
    %cst_229 = arith.constant dense<0.000000e+00> : vector<8x32xf32>
    %615 = tpu.matmul %613, %614, %cst_229 {dimension_numbers = #tpu.dot_dimension_numbers<[1], [0], [0], [1], [0, 0, 1, 1], [], []>} : vector<8x8xf32>, vector<8x32xf32>, vector<8x32xf32> -> vector<8x32xf32>
    %616 = arith.truncf %615 : vector<8x32xf32> to vector<8x32xbf16>
    %c0_230 = arith.constant 0 : index
    %c0_231 = arith.constant 0 : index
    %617 = vector.load %arg18[%c0_230, %c0_231] : memref<32x128xbf16, #tpu.memory_space<vmem>>, vector<32x128xbf16>
    %cst_232 = arith.constant dense<0.000000e+00> : vector<8x128xf32>
    %618 = tpu.matmul %616, %617, %cst_232 {dimension_numbers = #tpu.dot_dimension_numbers<[1], [0], [0], [1], [0, 0, 1, 1], [], []>} : vector<8x32xbf16>, vector<32x128xbf16>, vector<8x128xf32> -> vector<8x128xf32>
    %c0_233 = arith.constant 0 : index
    %c0_234 = arith.constant 0 : index
    %619 = vector.load %arg19[%c0_233, %c0_234] : memref<1x128xf32, #tpu.memory_space<vmem>>, vector<1x128xf32>
    %620 = vector.broadcast %619 : vector<1x128xf32> to vector<8x128xf32>
    %621 = arith.addf %618, %620 : vector<8x128xf32>
    %c0_235 = arith.constant 0 : index
    %c0_236 = arith.constant 0 : index
    %c0_237 = arith.constant 0 : index
    %622 = vector.load %arg20[%c0_235, %c0_236, %c0_237] : memref<2x8x128xf32, #tpu.memory_space<vmem>>, vector<1x8x128xf32>
    %623 = vector.shape_cast %622 : vector<1x8x128xf32> to vector<8x128xf32>
    %624 = vector.shape_cast %621 : vector<8x128xf32> to vector<1x8x128xf32>
    tpu.vector_store %arg20[%c0_235, %c0_236, %c0_237], %624 {strides = array<i32>} : memref<2x8x128xf32, #tpu.memory_space<vmem>>, vector<1x8x128xf32>,
    %c1_238 = arith.constant 1 : index
    %c0_239 = arith.constant 0 : index
    %c0_240 = arith.constant 0 : index
    %625 = vector.load %arg3[%c1_238, %c0_239, %c0_240] : memref<2x8x8xf32, #tpu.memory_space<vmem>>, vector<1x8x8xf32>
    %626 = vector.shape_cast %625 : vector<1x8x8xf32> to vector<8x8xf32>
    %627 = vector.extract_strided_slice %611 {offsets = [8, 0], sizes = [8, 32], strides = [1, 1]} : vector<16x32xf32> to vector<8x32xf32>
    %cst_241 = arith.constant dense<0.000000e+00> : vector<8x32xf32>
    %628 = tpu.matmul %626, %627, %cst_241 {dimension_numbers = #tpu.dot_dimension_numbers<[1], [0], [0], [1], [0, 0, 1, 1], [], []>} : vector<8x8xf32>, vector<8x32xf32>, vector<8x32xf32> -> vector<8x32xf32>
    %629 = arith.truncf %628 : vector<8x32xf32> to vector<8x32xbf16>
    %c0_242 = arith.constant 0 : index
    %c0_243 = arith.constant 0 : index
    %630 = vector.load %arg18[%c0_242, %c0_243] : memref<32x128xbf16, #tpu.memory_space<vmem>>, vector<32x128xbf16>
    %cst_244 = arith.constant dense<0.000000e+00> : vector<8x128xf32>
    %631 = tpu.matmul %629, %630, %cst_244 {dimension_numbers = #tpu.dot_dimension_numbers<[1], [0], [0], [1], [0, 0, 1, 1], [], []>} : vector<8x32xbf16>, vector<32x128xbf16>, vector<8x128xf32> -> vector<8x128xf32>
    %c0_245 = arith.constant 0 : index
    %c0_246 = arith.constant 0 : index
    %632 = vector.load %arg19[%c0_245, %c0_246] : memref<1x128xf32, #tpu.memory_space<vmem>>, vector<1x128xf32>
    %633 = vector.broadcast %632 : vector<1x128xf32> to vector<8x128xf32>
    %634 = arith.addf %631, %633 : vector<8x128xf32>
    %c1_247 = arith.constant 1 : index
    %c0_248 = arith.constant 0 : index
    %c0_249 = arith.constant 0 : index
    %635 = vector.load %arg20[%c1_247, %c0_248, %c0_249] : memref<2x8x128xf32, #tpu.memory_space<vmem>>, vector<1x8x128xf32>
    %636 = vector.shape_cast %635 : vector<1x8x128xf32> to vector<8x128xf32>
    %637 = vector.shape_cast %634 : vector<8x128xf32> to vector<1x8x128xf32>
    tpu.vector_store %arg20[%c1_247, %c0_248, %c0_249], %637 {strides = array<i32>} : memref<2x8x128xf32, #tpu.memory_space<vmem>>, vector<1x8x128xf32>,
    return
  }
  func.func @transform_0(%arg0: i32) -> (i32, i32, i32) {
    %c0_i32 = arith.constant 0 : i32
    %c0_i32_0 = arith.constant 0 : i32
    %c0_i32_1 = arith.constant 0 : i32
    return %arg0, %c0_i32, %c0_i32_0 : i32, i32, i32
  }
  func.func @transform_1(%arg0: i32) -> (i32, i32, i32) {
    %c0_i32 = arith.constant 0 : i32
    %c0_i32_0 = arith.constant 0 : i32
    %c0_i32_1 = arith.constant 0 : i32
    return %arg0, %c0_i32, %c0_i32_0 : i32, i32, i32
  }
  func.func @transform_2(%arg0: i32) -> (i32, i32, i32) {
    %c0_i32 = arith.constant 0 : i32
    %c0_i32_0 = arith.constant 0 : i32
    %c0_i32_1 = arith.constant 0 : i32
    return %arg0, %c0_i32, %c0_i32_0 : i32, i32, i32
  }
  func.func @transform_3(%arg0: i32) -> (i32, i32) {
    %c0_i32 = arith.constant 0 : i32
    %c0_i32_0 = arith.constant 0 : i32
    %c0_i32_1 = arith.constant 0 : i32
    return %c0_i32, %c0_i32_0 : i32, i32
  }
  func.func @transform_4(%arg0: i32) -> (i32, i32) {
    %c0_i32 = arith.constant 0 : i32
    %c0_i32_0 = arith.constant 0 : i32
    %c0_i32_1 = arith.constant 0 : i32
    return %c0_i32, %c0_i32_0 : i32, i32
  }
  func.func @transform_5(%arg0: i32) -> (i32, i32, i32) {
    %c0_i32 = arith.constant 0 : i32
    %c0_i32_0 = arith.constant 0 : i32
    %c0_i32_1 = arith.constant 0 : i32
    %c0_i32_2 = arith.constant 0 : i32
    return %c0_i32, %c0_i32_0, %c0_i32_1 : i32, i32, i32
  }
  func.func @transform_6(%arg0: i32) -> (i32, i32, i32) {
    %c0_i32 = arith.constant 0 : i32
    %c0_i32_0 = arith.constant 0 : i32
    %c0_i32_1 = arith.constant 0 : i32
    %c0_i32_2 = arith.constant 0 : i32
    return %c0_i32, %c0_i32_0, %c0_i32_1 : i32, i32, i32
  }
  func.func @transform_7(%arg0: i32) -> (i32, i32, i32) {
    %c0_i32 = arith.constant 0 : i32
    %c0_i32_0 = arith.constant 0 : i32
    %c0_i32_1 = arith.constant 0 : i32
    %c0_i32_2 = arith.constant 0 : i32
    return %c0_i32, %c0_i32_0, %c0_i32_1 : i32, i32, i32
  }
  func.func @transform_8(%arg0: i32) -> (i32, i32, i32) {
    %c0_i32 = arith.constant 0 : i32
    %c0_i32_0 = arith.constant 0 : i32
    %c0_i32_1 = arith.constant 0 : i32
    %c0_i32_2 = arith.constant 0 : i32
    return %c0_i32, %c0_i32_0, %c0_i32_1 : i32, i32, i32
  }
  func.func @transform_9(%arg0: i32) -> (i32, i32, i32) {
    %c0_i32 = arith.constant 0 : i32
    %c0_i32_0 = arith.constant 0 : i32
    %c0_i32_1 = arith.constant 0 : i32
    %c0_i32_2 = arith.constant 0 : i32
    return %c0_i32, %c0_i32_0, %c0_i32_1 : i32, i32, i32
  }
  func.func @transform_10(%arg0: i32) -> (i32, i32, i32) {
    %c0_i32 = arith.constant 0 : i32
    %c0_i32_0 = arith.constant 0 : i32
    %c0_i32_1 = arith.constant 0 : i32
    %c0_i32_2 = arith.constant 0 : i32
    return %c0_i32, %c0_i32_0, %c0_i32_1 : i32, i32, i32
  }
  func.func @transform_11(%arg0: i32) -> (i32, i32, i32) {
    %c0_i32 = arith.constant 0 : i32
    %c0_i32_0 = arith.constant 0 : i32
    %c0_i32_1 = arith.constant 0 : i32
    %c0_i32_2 = arith.constant 0 : i32
    return %c0_i32, %c0_i32_0, %c0_i32_1 : i32, i32, i32
  }
  func.func @transform_12(%arg0: i32) -> (i32, i32, i32) {
    %c0_i32 = arith.constant 0 : i32
    %c0_i32_0 = arith.constant 0 : i32
    %c0_i32_1 = arith.constant 0 : i32
    %c0_i32_2 = arith.constant 0 : i32
    return %c0_i32, %c0_i32_0, %c0_i32_1 : i32, i32, i32
  }
  func.func @transform_13(%arg0: i32) -> (i32, i32, i32) {
    %c0_i32 = arith.constant 0 : i32
    %c0_i32_0 = arith.constant 0 : i32
    %c0_i32_1 = arith.constant 0 : i32
    %c0_i32_2 = arith.constant 0 : i32
    return %c0_i32, %c0_i32_0, %c0_i32_1 : i32, i32, i32
  }
  func.func @transform_14(%arg0: i32) -> (i32, i32, i32) {
    %c0_i32 = arith.constant 0 : i32
    %c0_i32_0 = arith.constant 0 : i32
    %c0_i32_1 = arith.constant 0 : i32
    %c0_i32_2 = arith.constant 0 : i32
    return %c0_i32, %c0_i32_0, %c0_i32_1 : i32, i32, i32
  }
  func.func @transform_15(%arg0: i32) -> (i32, i32, i32) {
    %c0_i32 = arith.constant 0 : i32
    %c0_i32_0 = arith.constant 0 : i32
    %c0_i32_1 = arith.constant 0 : i32
    %c0_i32_2 = arith.constant 0 : i32
    return %c0_i32, %c0_i32_0, %c0_i32_1 : i32, i32, i32
  }
  func.func @transform_16(%arg0: i32) -> (i32, i32, i32) {
    %c0_i32 = arith.constant 0 : i32
    %c0_i32_0 = arith.constant 0 : i32
    %c0_i32_1 = arith.constant 0 : i32
    %c0_i32_2 = arith.constant 0 : i32
    return %c0_i32, %c0_i32_0, %c0_i32_1 : i32, i32, i32
  }
  func.func @transform_17(%arg0: i32) -> (i32, i32) {
    %c0_i32 = arith.constant 0 : i32
    %c0_i32_0 = arith.constant 0 : i32
    %c0_i32_1 = arith.constant 0 : i32
    return %c0_i32, %c0_i32_0 : i32, i32
  }
  func.func @transform_18(%arg0: i32) -> (i32, i32) {
    %c0_i32 = arith.constant 0 : i32
    %c0_i32_0 = arith.constant 0 : i32
    %c0_i32_1 = arith.constant 0 : i32
    return %c0_i32, %c0_i32_0 : i32, i32
  }
  func.func @transform_19(%arg0: i32) -> (i32, i32, i32) {
    %c0_i32 = arith.constant 0 : i32
    %c0_i32_0 = arith.constant 0 : i32
    %c0_i32_1 = arith.constant 0 : i32
    return %arg0, %c0_i32, %c0_i32_0 : i32, i32, i32
  }
}

</mosaic_0001>

<bundles_post_ra>
// kernel: forward.1
= control target key start
LH: loop header
LB: loop body
LE: loop exit
PB: predicated region body
PF: predicated region fallthrough
CT: control target
= control target key end

     0   :  { %vm86_vm0 = vcmask 261120   ;;  %v5291_v8 = vmov 0.0   ;;  %vm5292_vm1 = vmmov 0   ;;  %s5293_s21 = smov 96   ;;  %vm211_vm2 = vcmask 64512   ;;  %s5295_s24 = smov 64   ;;  %s6053_s0 = inlined_call_operand.vmem [shape: f32[2,8,32], index: 0, kind: input, shape index: {}]   ;;  %s6054_s5 = inlined_call_operand.vmem [shape: bf16[2,32,96], index: 5, kind: input, shape index: {}]   ;;  %s6055_s3 = inlined_call_operand.vmem [shape: f32[1,32], index: 3, kind: input, shape index: {}]   ;;  %s6056_s4 = inlined_call_operand.vmem [shape: f32[1,32], index: 4, kind: input, shape index: {}]   ;;  %s6057_s6 = inlined_call_operand.vmem [shape: f32[2,1,96], index: 6, kind: input, shape index: {}]   ;;  %s6058_s1 = inlined_call_operand.vmem [shape: f32[2,1,8], index: 1, kind: input, shape index: {}]   ;;  %s6059_s7 = inlined_call_operand.vmem [shape: bf16[2,32,32], index: 7, kind: input, shape index: {}]   ;;  %s6060_s8 = inlined_call_operand.vmem [shape: f32[2,1,32], index: 8, kind: input, shape index: {}]   ;;  %s6061_s11 = inlined_call_operand.vmem [shape: bf16[2,32,64], index: 11, kind: input, shape index: {}]   ;;  %s6062_s9 = inlined_call_operand.vmem [shape: f32[2,1,32], index: 9, kind: input, shape index: {}]   ;;  %s6063_s10 = inlined_call_operand.vmem [shape: f32[2,1,32], index: 10, kind: input, shape index: {}]   ;;  %s6064_s13 = inlined_call_operand.vmem [shape: bf16[2,64,32], index: 13, kind: input, shape index: {}]   ;;  %s6065_s12 = inlined_call_operand.vmem [shape: f32[2,1,64], index: 12, kind: input, shape index: {}]   ;;  %s6066_s14 = inlined_call_operand.vmem [shape: f32[2,1,32], index: 14, kind: input, shape index: {}]   ;;  %s6067_s15 = inlined_call_operand.vmem [shape: f32[2,1,32], index: 15, kind: input, shape index: {}]   ;;  %s6068_s16 = inlined_call_operand.vmem [shape: f32[2,1,32], index: 16, kind: input, shape index: {}]   ;;  %s6069_s17 = inlined_call_operand.vmem [shape: bf16[32,128], index: 17, kind: input, shape index: {}]   ;;  %s6070_s2 = inlined_call_operand.vmem [shape: f32[2,8,8], index: 2, kind: input, shape index: {}]   ;;  %s6071_s18 = inlined_call_operand.vmem [shape: f32[1,128], index: 18, kind: input, shape index: {}]   ;;  %s6072_s19 = inlined_call_operand.vmem [shape: f32[2,8,128], index: 19, kind: output, shape index: {}]  }
   0x1   :  { %6081 = sst [smem:[#allocation2_spill]] %s6053_s0  ;;  %4828 = vmatprep.subr.bf16.mxu0 %v5291_v8  ;;  %4832 = vmatprep.mubr.msk.bf16.mxu0 %vm5292_vm1, %v5291_v8  ;;  %v4558_v40 = vld [vmem:[%s6057_s6] ss:$0 sm:$0xff]  ;;  %v69_v48 = vlaneseq  ;;  %s5296_s25 = smov 88   ;;  %vm714_vm3 = vcmask 1043456   ;;  %vm2099_vm4 = vcmask 523264  }
   0x2   :  { %6082 = sst [smem:[#allocation3_spill]] %s6054_s5  ;;  %s6085_s20 = sld [smem:[#allocation2_spill]]  ;;  %4841 = vmatprep.subr.mxu1 %v5291_v8  ;;  %4843 = vmatprep.mubr.msk.f32.mxu1 %vm5292_vm1, %v5291_v8  ;;  %v65_v49 = vld [vmem:[%s6058_s1] sm:$0x1] }
   0x3   :  { %6083 = sst [smem:[#allocation4_spill]] %s6055_s3  ;;  %s6086_s23 = sld [smem:[#allocation3_spill]]  ;;  %v66_v50 = vsub.f32 1.0, %v65_v49  ;;  %v70_v51 = vshrl.u32 %v69_v48, 7 }
   0x4   :  { %6084 = sst [smem:[#allocation5_spill]] %s6056_s4  ;;  %s6087_s27 = sld [smem:[#allocation4_spill]] }
   0x5   :  { %s6088_s0 = sld [smem:[#allocation5_spill]]  ;;  %s5294_s5 = smov 120   ;;  %v67_v52 = vmul.f32 -10000.0, %v66_v50  ;;  %v71_v53 = vsub.s32 0, %v70_v51 }
   0x6   :  { %s5298_s30 = smov 80   ;;  %s5300_s22 = smov 48  }
   0x7   :  { %v5465_v54 = vrot.slane %v67_v52, %v71_v53  ;;  %s6077_s26 = smov 72   ;;  %s6075_s28 = smov 40  }
   0x8   :  { %v63_v0 = vld [vmem:[%s6085_s20] sm:$0xff]  ;;  %v64_v1 = vld [vmem:[%s6085_s20 + $0x8] sm:$0xff]  ;;  %s5299_s20 = smov 112  }
   0x9   :  { %v87_v2 = vsel %vm86_vm0, %v63_v0, 0.0  ;;  %v96_v3 = vmul.f32 %v63_v0, %v63_v0  ;;  %v97_v4 = vmul.f32 %v64_v1, %v64_v1  ;;  %v90_v6 = vsel %vm86_vm0, %v64_v1, 0.0  ;;  %v5179_v9 = vld [vmem:[%s6086_s23] sm:$0xff]   ;;  %v5180_v10 = vld [vmem:[%s6086_s23 + $0x8] sm:$0xff]  }
   0xa   :  { %88 = vadd.xlane.f32.xlu0 %v87_v2  ;;  %4829 = vmatpush3.bf16.msra.mxu0 %v5179_v9  ;;  %v4556_v30 = vld [vmem:[%s6087_s27] ss:$0 sm:$0xff]  ;;  %v4555_v9 = vld [vmem:[%s6058_s1 + $0x1] sm:$0x1]  ;;  %s5297_s1 = smov 56   ;;  %s6079_s27 = smov 104  }
   0xb   :  { %v98_v5 = vsel %vm86_vm0, %v96_v3, 0.0  ;;  %v101_v7 = vsel %vm86_vm0, %v97_v4, 0.0  ;;  %4830 = vmatprep.subr.bf16.mxu0 %v5291_v8  ;;  %v4557_v35 = vld [vmem:[%s6088_s0] ss:$0 sm:$0xff] }
   0xc   :  { %99 = vadd.xlane.f32.xlu1 %v98_v5 }
   0xe   :  { %91 = vadd.xlane.f32.xlu0 %v90_v6  ;;  %4831 = vmatpush3.bf16.msra.mxu0 %v5180_v10  ;;  %v76_v10 = vsub.f32 1.0, %v4555_v9 }
   0xf   :  { %4836 = vmatprep.subr.mxu0 %v5291_v8 }
  0x10   :  { %102 = vadd.xlane.f32.xlu1 %v101_v7 }
  0x97   :  { %v89_v11 = vpop.xlane.xlu0 %88 }
  0x98   :  { %v94_v12 = vmul.f32 0.03125, %v89_v11  ;;  %v77_v11 = vmul.f32 -10000.0, %v76_v10 }
  0x99   :  { %v100_v13 = vpop.xlane.xlu1 %99 }
  0x9a   :  { %v106_v14 = vmul.f32 %v94_v12, %v94_v12  ;;  %v104_v15 = vmul.f32 0.03125, %v100_v13  ;;  %v112_v27 = vsub.f32 %v63_v0, %v94_v12 }
  0x9b   :  { %v92_v16 = vpop.xlane.xlu0 %91 }
  0x9c   :  { %v108_v17 = vsub.f32 %v104_v15, %v106_v14  ;;  %v95_v18 = vmul.f32 0.03125, %v92_v16  ;;  %v5494_v14 = vrot.slane %v77_v11, %v71_v53 }
  0x9d   :  { %v103_v19 = vpop.xlane.xlu1 %102 }
  0x9e   :  { %v110_v20 = vmax.f32 %v108_v17, 0.0  ;;  %v107_v21 = vmul.f32 %v95_v18, %v95_v18  ;;  %v105_v22 = vmul.f32 0.03125, %v103_v19  ;;  %v113_v31 = vsub.f32 %v64_v1, %v95_v18 }
  0xa0   :  { %v114_v23 = vadd.f32 1e-12, %v110_v20  ;;  %v109_v24 = vsub.f32 %v105_v22, %v107_v21 }
  0xa2   :  { %5199 = vrsqrt.f32 %v114_v23  ;;  %v111_v25 = vmax.f32 %v109_v24, 0.0 }
  0xa4   :  { %v115_v26 = vadd.f32 1e-12, %v111_v25 }
  0xa6   :  { %5201 = vrsqrt.f32 %v115_v26 }
  0xac   :  { %v5200_v28 = vpop.eup %5199 }
  0xad   :  { %v118_v29 = vmul.f32 %v5200_v28, %v112_v27 }
  0xaf   :  { %v126_v34 = vmul.f32 %v4556_v30, %v118_v29 }
  0xb0   :  { %v5202_v32 = vpop.eup %5201 }
  0xb1   :  { %v119_v33 = vmul.f32 %v5202_v32, %v113_v31  ;;  %v5434_v37 = vadd.f32 %v4557_v35, %v126_v34 }
  0xb3   :  { %v127_v36 = vmul.f32 %v4556_v30, %v119_v33 }
  0xb5   :  { %v5436_v38 = vadd.f32 %v4557_v35, %v127_v36  ;;  %v205_v36 = vld [vmem:[%s6059_s7 + $0x4] sm:$0xf] }
  0xb7   :  { %v136_v39 = vpack.c.bf16 %v5436_v38, %v5434_v37 }
  0xb9   :  { %4833 = vmatmul.mubr.msk.bf16.vlgmr.msra.gmra.mrb[0].mxu0 %vm86_vm0, %v136_v39  ;;  %v716_v39 = vsel %vm714_vm3, %v205_v36, 0 }
  0xba   :  { %4838 = vmatprep.mubr.msk.f32.mxu0 %vm5292_vm1, %v5291_v8 }
 0x18c   :  { %v197_v41 = vpop.f32.mrb[0].mxu0 }
 0x18d   :  { %v5446_v42 = vadd.f32 %v4558_v40, %v197_v41  ;;  %v4834_v43 = vpop.f32.mrb[1].mxu0 }
 0x18e   :  { %v200_v44 = vpop.f32.mrb[2].mxu0 }
 0x18f   :  { %209 = vrot.lane.b32.xlu0 %v5446_v42, %s5293_s21  ;;  %v4835_v45 = vpop.f32.mrb[3].mxu0  ;;  %v5450_v46 = vadd.f32 %v4558_v40, %v200_v44 }
 0x190   :  { %v204_v45 = vld [vmem:[%s6059_s7] sm:$0xf] }
 0x191   :  { %v762_v50 = vsel %vm714_vm3, %v204_v45, 0 }
 0x193   :  { %377 = vrot.lane.b32.xlu0 %v5450_v46, %s5293_s21 }
 0x197   :  { %543 = vrot.lane.b32.xlu0 %v5446_v42, %s5294_s5 }
 0x201   :  { %v210_v47 = vpop.permute.xlu0 %209 }
 0x202   :  { %4837 = vmatpush3.xpose.msk.msra.mxu0 %vm211_vm2, %v210_v47 }
 0x203   :  { %4851 = vmatprep.subr.mxu0 %v5291_v8 }
 0x205   :  { %4839 = vmatmul.mubr.msk.f32.vlgmr.msra.gmra.mrb[4].mxu0 %vm211_vm2, %v5446_v42  ;;  %v378_v5 = vpop.permute.xlu0 %377 }
 0x206   :  { %4853 = vmatprep.mubr.msk.f32.mxu0 %vm5292_vm1, %v5291_v8 }
 0x209   :  { %v544_v7 = vpop.permute.xlu0 %543 }
 0x2d8   :  { %v282_v55 = vpop.f32.mrb[4].mxu0 }
 0x2d9   :  { %v286_v56 = vmul.f32 0.35355338, %v282_v55  ;;  %v4840_v57 = vpop.f32.mrb[5].mxu0 }
 0x2db   :  { %v287_v58 = vadd.f32 %v286_v56, %v5465_v54 }
 0x2dd   :  { %v288_v59 = vsel %vm211_vm2, %v287_v58, -inf }
 0x2de   :  { %289 = vmax.xlane.f32.xlu1 %v288_v59 }
 0x2ef   :  { %299 = vrot.lane.b32.xlu1 %v5446_v42, %s5295_s24 }
 0x36b   :  { %v290_v60 = vpop.xlane.xlu1 %289 }
 0x36c   :  { %v291_v61 = vsub.f32 %v287_v58, %v290_v60 }
 0x36e   :  { %v292_v62 = vmul.f32 1.442695, %v291_v61 }
 0x36f   :  { %v300_v63 = vpop.permute.xlu1 %299 }
 0x370   :  { %5203 = vpow2.f32 %v292_v62  ;;  %4842 = vmatpush3.msra.mxu1 %v300_v63 }
 0x371   :  { %4846 = vmatprep.subr.mxu1 %v5291_v8 }
 0x37a   :  { %v5204_v0 = vpop.eup %5203 }
 0x37b   :  { %v294_v1 = vsel %vm211_vm2, %v5204_v0, 0.0 }
 0x37c   :  { %295 = vadd.xlane.f32.xlu1 %v294_v1 }
 0x38d   :  { %545 = vrot.lane.b32.xlu1 %v5446_v42, %s5296_s25 }
 0x409   :  { %v296_v2 = vpop.xlane.xlu1 %295 }
 0x40a   :  { %5205 = vrcp.f32 %v296_v2 }
 0x40d   :  { %v546_v6 = vpop.permute.xlu1 %545 }
 0x414   :  { %v5206_v3 = vpop.eup %5205 }
 0x415   :  { %v298_v4 = vmul.f32 %v5206_v3, %v5204_v0 }
 0x417   :  { %4844 = vmatmul.mubr.msk.f32.vlgmr.msra.gmra.mrb[0].mxu1 %vm211_vm2, %v298_v4 }
 0x418   :  { %4847 = vmatpush3.xpose.msk.msra.mxu1 %vm211_vm2, %v378_v5  ;;  %4848 = vmatprep.mubr.msk.f32.mxu1 %vm5292_vm1, %v5291_v8 }
 0x419   :  { %4856 = vmatprep.subr.mxu1 %v5291_v8 }
 0x41b   :  { %4849 = vmatmul.mubr.msk.f32.vlgmr.msra.gmra.mrb[2].mxu1 %vm211_vm2, %v5450_v46 }
 0x41c   :  { %4857 = vmatpush3.xpose.msk.msra.mxu1 %vm211_vm2, %v546_v6  ;;  %4858 = vmatprep.mubr.msk.f32.mxu1 %vm5292_vm1, %v5291_v8 }
 0x41d   :  { %4866 = vmatprep.subr.bf16.mxu1 %v5291_v8 }
 0x41f   :  { %4859 = vmatmul.mubr.msk.f32.vlgmr.msra.gmra.mrb[4].mxu1 %vm211_vm2, %v544_v7 }
 0x420   :  { %4868 = vmatprep.mubr.msk.bf16.mxu1 %vm5292_vm1, %v5291_v8  ;;  %4867 = vmatpush3.bf16.msra.mxu1 %v716_v39 }
 0x421   :  { %4878 = vmatprep.subr.mxu1 %v5291_v8 }
 0x4ea   :  { %v5492_v12 = vpop.f32.mrb[0].mxu1 }
 0x4eb   :  { %v4845_v13 = vpop.f32.mrb[1].mxu1  ;;  %v375_v51 = vpack.c.bf16 %v5492_v12, %v5492_v12 }
 0x4ee   :  { %v449_v15 = vpop.f32.mrb[2].mxu1 }
 0x4ef   :  { %v453_v16 = vmul.f32 0.35355338, %v449_v15  ;;  %v4850_v17 = vpop.f32.mrb[3].mxu1 }
 0x4f1   :  { %v454_v18 = vadd.f32 %v453_v16, %v5494_v14 }
 0x4f2   :  { %v617_v19 = vpop.f32.mrb[4].mxu1 }
 0x4f3   :  { %v621_v20 = vmul.f32 0.35355338, %v617_v19  ;;  %v4860_v21 = vpop.f32.mrb[5].mxu1  ;;  %v455_v22 = vsel %vm211_vm2, %v454_v18, -inf }
 0x4f4   :  { %456 = vmax.xlane.f32.xlu1 %v455_v22 }
 0x4f5   :  { %v622_v23 = vadd.f32 %v621_v20, %v5465_v54 }
 0x4f7   :  { %v623_v24 = vsel %vm211_vm2, %v622_v23, -inf }
 0x4f8   :  { %624 = vmax.xlane.f32.xlu0 %v623_v24 }
 0x505   :  { %466 = vrot.lane.b32.xlu1 %v5450_v46, %s5295_s24 }
 0x509   :  { %806 = vrot.lane.b32.xlu1 %v5450_v46, %s5296_s25 }
 0x50d   :  { %804 = vrot.lane.b32.xlu1 %v5450_v46, %s5294_s5 }
 0x581   :  { %v457_v25 = vpop.xlane.xlu1 %456 }
 0x582   :  { %v458_v26 = vsub.f32 %v454_v18, %v457_v25 }
 0x584   :  { %v459_v27 = vmul.f32 1.442695, %v458_v26 }
 0x585   :  { %v625_v28 = vpop.xlane.xlu0 %624  ;;  %v467_v29 = vpop.permute.xlu1 %466 }
 0x586   :  { %5207 = vpow2.f32 %v459_v27  ;;  %v626_v30 = vsub.f32 %v622_v23, %v625_v28  ;;  %4852 = vmatpush3.msra.mxu0 %v467_v29 }
 0x587   :  { %4861 = vmatprep.subr.mxu0 %v5291_v8 }
 0x588   :  { %v627_v31 = vmul.f32 1.442695, %v626_v30 }
 0x589   :  { %v807_v58 = vpop.permute.xlu1 %806 }
 0x58a   :  { %5209 = vpow2.f32 %v627_v31 }
 0x58d   :  { %v805_v63 = vpop.permute.xlu1 %804 }
 0x590   :  { %v5208_v32 = vpop.eup %5207 }
 0x591   :  { %v461_v33 = vsel %vm211_vm2, %v5208_v32, 0.0 }
 0x592   :  { %462 = vadd.xlane.f32.xlu0 %v461_v33 }
 0x594   :  { %v5210_v34 = vpop.eup %5209 }
 0x595   :  { %v629_v35 = vsel %vm211_vm2, %v5210_v34, 0.0 }
 0x596   :  { %630 = vadd.xlane.f32.xlu0 %v629_v35 }
 0x5ac   :  { %634 = vrot.lane.b32.xlu0 %v5446_v42, %s5297_s1 }
 0x61f   :  { %v463_v40 = vpop.xlane.xlu0 %462 }
 0x620   :  { %5211 = vrcp.f32 %v463_v40 }
 0x623   :  { %v631_v41 = vpop.xlane.xlu0 %630 }
 0x624   :  { %5213 = vrcp.f32 %v631_v41 }
 0x627   :  { %v635_v47 = vpop.permute.xlu0 %634 }
 0x62a   :  { %v5212_v43 = vpop.eup %5211 }
 0x62b   :  { %v465_v44 = vmul.f32 %v5212_v43, %v5208_v32 }
 0x62d   :  { %4854 = vmatmul.mubr.msk.f32.vlgmr.msra.gmra.mrb[6].mxu0 %vm211_vm2, %v465_v44 }
 0x62e   :  { %v5214_v48 = vpop.eup %5213  ;;  %4862 = vmatpush3.msra.mxu0 %v635_v47  ;;  %4863 = vmatprep.mubr.msk.f32.mxu0 %vm5292_vm1, %v5291_v8 }
 0x62f   :  { %v633_v49 = vmul.f32 %v5214_v48, %v5210_v34  ;;  %4872 = vmatprep.subr.bf16.mxu0 %v5291_v8 }
 0x631   :  { %4864 = vmatmul.mubr.msk.f32.vlgmr.msra.gmra.mrb[8].mxu0 %vm211_vm2, %v633_v49 }
 0x632   :  { %4873 = vmatpush3.bf16.msra.mxu0 %v762_v50  ;;  %4874 = vmatprep.mubr.msk.bf16.mxu0 %vm5292_vm1, %v5291_v8 }
 0x633   :  { %4883 = vmatprep.subr.mxu0 %v5291_v8 }
 0x635   :  { %4875 = vmatmul.mubr.msk.bf16.vlgmr.msra.gmra.mrb[12].mxu0 %vm211_vm2, %v375_v51 }
 0x636   :  { %4885 = vmatprep.mubr.msk.f32.mxu0 %vm5292_vm1, %v5291_v8 }
 0x700   :  { %v538_v52 = vpop.f32.mrb[6].mxu0 }
 0x701   :  { %v4855_v53 = vpop.f32.mrb[7].mxu0  ;;  %v542_v21 = vpack.c.bf16 %v538_v52, %v538_v52 }
 0x704   :  { %v706_v55 = vpop.f32.mrb[8].mxu0 }
 0x705   :  { %v710_v56 = vpack.c.bf16 %v706_v55, %v706_v55  ;;  %v4865_v57 = vpop.f32.mrb[9].mxu0 }
 0x706   :  { %v206_v57 = vld [vmem:[%s6059_s7 + $0x8] sm:$0xf] }
 0x707   :  { %4869 = vmatmul.mubr.msk.bf16.vlgmr.msra.gmra.mrb[8].mxu1 %vm211_vm2, %v710_v56 }
 0x708   :  { %4879 = vmatpush3.xpose.msk.msra.mxu1 %vm211_vm2, %v807_v58  ;;  %v798_v59 = vpop.f32.mrb[12].mxu0  ;;  %4880 = vmatprep.mubr.msk.f32.mxu1 %vm5292_vm1, %v5291_v8  ;;  %v1230_v58 = vsel %vm714_vm3, %v206_v57, 0 }
 0x709   :  { %v4876_v60 = vpop.f32.mrb[13].mxu0  ;;  %4888 = vmatprep.subr.bf16.mxu1 %v5291_v8 }
 0x70a   :  { %v801_v61 = vpop.f32.mrb[14].mxu0 }
 0x70b   :  { %v4877_v62 = vpop.f32.mrb[15].mxu0 }
 0x70f   :  { %4881 = vmatmul.mubr.msk.f32.vlgmr.msra.gmra.mrb[6].mxu1 %vm211_vm2, %v805_v63 }
 0x710   :  { %4889 = vmatpush3.bf16.msra.mxu1 %v716_v39  ;;  %4890 = vmatprep.mubr.msk.bf16.mxu1 %vm5292_vm1, %v5291_v8 }
 0x711   :  { %4900 = vmatprep.subr.mxu1 %v5291_v8 }
 0x7da   :  { %v752_v0 = vpop.f32.mrb[8].mxu1 }
 0x7db   :  { %v5542_v1 = vadd.f32 %v798_v59, %v752_v0  ;;  %v4870_v2 = vpop.f32.mrb[9].mxu1 }
 0x7dc   :  { %v755_v3 = vpop.f32.mrb[10].mxu1 }
 0x7dd   :  { %v4871_v4 = vpop.f32.mrb[11].mxu1 }
 0x7e2   :  { %v878_v5 = vpop.f32.mrb[6].mxu1 }
 0x7e3   :  { %v882_v6 = vmul.f32 0.35355338, %v878_v5  ;;  %v4882_v7 = vpop.f32.mrb[7].mxu1 }
 0x7e5   :  { %v883_v9 = vadd.f32 %v882_v6, %v5494_v14 }
 0x7e7   :  { %v884_v10 = vsel %vm211_vm2, %v883_v9, -inf }
 0x7e8   :  { %885 = vmax.xlane.f32.xlu1 %v884_v10 }
 0x7f9   :  { %1060 = vrot.lane.b32.xlu1 %v5446_v42, %s5298_s30 }
 0x7fd   :  { %1058 = vrot.lane.b32.xlu1 %v5446_v42, %s5299_s20 }
 0x875   :  { %v886_v11 = vpop.xlane.xlu1 %885 }
 0x876   :  { %v887_v12 = vsub.f32 %v883_v9, %v886_v11 }
 0x878   :  { %v888_v13 = vmul.f32 1.442695, %v887_v12 }
 0x879   :  { %v1061_v25 = vpop.permute.xlu1 %1060 }
 0x87a   :  { %5215 = vpow2.f32 %v888_v13 }
 0x87d   :  { %v1059_v30 = vpop.permute.xlu1 %1058 }
 0x884   :  { %v5216_v15 = vpop.eup %5215 }
 0x885   :  { %v890_v16 = vsel %vm211_vm2, %v5216_v15, 0.0 }
 0x886   :  { %891 = vadd.xlane.f32.xlu0 %v890_v16 }
 0x89c   :  { %895 = vrot.lane.b32.xlu0 %v5450_v46, %s5297_s1 }
 0x913   :  { %v892_v17 = vpop.xlane.xlu0 %891 }
 0x914   :  { %5217 = vrcp.f32 %v892_v17 }
 0x917   :  { %v896_v18 = vpop.permute.xlu0 %895 }
 0x918   :  { %4884 = vmatpush3.msra.mxu0 %v896_v18 }
 0x919   :  { %4894 = vmatprep.subr.bf16.mxu0 %v5291_v8 }
 0x91e   :  { %v5218_v19 = vpop.eup %5217 }
 0x91f   :  { %v894_v20 = vmul.f32 %v5218_v19, %v5216_v15 }
 0x921   :  { %4886 = vmatmul.mubr.msk.f32.vlgmr.msra.gmra.mrb[10].mxu0 %vm211_vm2, %v894_v20 }
 0x922   :  { %4895 = vmatpush3.bf16.msra.mxu0 %v762_v50  ;;  %4896 = vmatprep.mubr.msk.bf16.mxu0 %vm5292_vm1, %v5291_v8 }
 0x923   :  { %4905 = vmatprep.subr.mxu0 %v5291_v8 }
 0x925   :  { %4897 = vmatmul.mubr.msk.bf16.vlgmr.msra.gmra.mrb[16].mxu0 %vm211_vm2, %v542_v21 }
 0x926   :  { %4907 = vmatprep.mubr.msk.f32.mxu0 %vm5292_vm1, %v5291_v8 }
 0x9f4   :  { %v967_v22 = vpop.f32.mrb[10].mxu0 }
 0x9f5   :  { %v971_v23 = vpack.c.bf16 %v967_v22, %v967_v22  ;;  %v4887_v24 = vpop.f32.mrb[11].mxu0 }
 0x9f7   :  { %4891 = vmatmul.mubr.msk.bf16.vlgmr.msra.gmra.mrb[12].mxu1 %vm211_vm2, %v971_v23 }
 0x9f8   :  { %4901 = vmatpush3.xpose.msk.msra.mxu1 %vm211_vm2, %v1061_v25  ;;  %v1052_v26 = vpop.f32.mrb[16].mxu0  ;;  %4902 = vmatprep.mubr.msk.f32.mxu1 %vm5292_vm1, %v5291_v8 }
 0x9f9   :  { %v4898_v27 = vpop.f32.mrb[17].mxu0  ;;  %4910 = vmatprep.subr.bf16.mxu1 %v5291_v8 }
 0x9fa   :  { %v1055_v28 = vpop.f32.mrb[18].mxu0 }
 0x9fb   :  { %v4899_v29 = vpop.f32.mrb[19].mxu0 }
 0x9ff   :  { %4903 = vmatmul.mubr.msk.f32.vlgmr.msra.gmra.mrb[16].mxu1 %vm211_vm2, %v1059_v30 }
 0xa00   :  { %4912 = vmatprep.mubr.msk.bf16.mxu1 %vm5292_vm1, %v5291_v8  ;;  %4911 = vmatpush3.bf16.msra.mxu1 %v1230_v58 }
 0xa01   :  { %4926 = vmatprep.subr.bf16.mxu1 %v5291_v8 }
 0xaca   :  { %v1009_v31 = vpop.f32.mrb[12].mxu1 }
 0xacb   :  { %v5569_v32 = vadd.f32 %v1052_v26, %v1009_v31  ;;  %v4892_v33 = vpop.f32.mrb[13].mxu1 }
 0xacc   :  { %v1012_v34 = vpop.f32.mrb[14].mxu1 }
 0xacd   :  { %v4893_v35 = vpop.f32.mrb[15].mxu1 }
 0xad2   :  { %v1132_v36 = vpop.f32.mrb[16].mxu1 }
 0xad3   :  { %v1136_v39 = vmul.f32 0.35355338, %v1132_v36  ;;  %v4904_v40 = vpop.f32.mrb[17].mxu1 }
 0xad5   :  { %v1137_v41 = vadd.f32 %v1136_v39, %v5465_v54 }
 0xad7   :  { %v1138_v43 = vsel %vm211_vm2, %v1137_v41, -inf }
 0xad8   :  { %1139 = vmax.xlane.f32.xlu0 %v1138_v43 }
 0xaee   :  { %1149 = vrot.lane.b32.xlu0 %v5446_v42, %s5300_s22 }
 0xaf2   :  { %1273 = vrot.lane.b32.xlu0 %v5450_v46, %s5299_s20 }
 0xb65   :  { %v1140_v44 = vpop.xlane.xlu0 %1139 }
 0xb66   :  { %v1141_v45 = vsub.f32 %v1137_v41, %v1140_v44 }
 0xb68   :  { %v1142_v47 = vmul.f32 1.442695, %v1141_v45 }
 0xb69   :  { %v1150_v48 = vpop.permute.xlu0 %1149 }
 0xb6a   :  { %5219 = vpow2.f32 %v1142_v47  ;;  %4906 = vmatpush3.msra.mxu0 %v1150_v48 }
 0xb6b   :  { %4916 = vmatprep.subr.mxu0 %v5291_v8 }
 0xb6d   :  { %v1274_v56 = vpop.permute.xlu0 %1273 }
 0xb74   :  { %v5220_v49 = vpop.eup %5219 }
 0xb75   :  { %v1144_v50 = vsel %vm211_vm2, %v5220_v49, 0.0 }
 0xb76   :  { %1145 = vadd.xlane.f32.xlu1 %v1144_v50 }
 0xb87   :  { %1275 = vrot.lane.b32.xlu1 %v5450_v46, %s5298_s30 }
 0xc03   :  { %v1146_v51 = vpop.xlane.xlu1 %1145 }
 0xc04   :  { %5221 = vrcp.f32 %v1146_v51 }
 0xc07   :  { %v1276_v55 = vpop.permute.xlu1 %1275 }
 0xc0e   :  { %v5222_v52 = vpop.eup %5221 }
 0xc0f   :  { %v1148_v53 = vmul.f32 %v5222_v52, %v5220_v49 }
 0xc11   :  { %4908 = vmatmul.mubr.msk.f32.vlgmr.msra.gmra.mrb[20].mxu0 %vm211_vm2, %v1148_v53 }
 0xc12   :  { %4917 = vmatpush3.xpose.msk.msra.mxu0 %vm211_vm2, %v1276_v55  ;;  %4918 = vmatprep.mubr.msk.f32.mxu0 %vm5292_vm1, %v5291_v8 }
 0xc13   :  { %4921 = vmatprep.subr.mxu0 %v5291_v8 }
 0xc15   :  { %4919 = vmatmul.mubr.msk.f32.vlgmr.msra.gmra.mrb[22].mxu0 %vm211_vm2, %v1274_v56 }
 0xc16   :  { %4923 = vmatprep.mubr.msk.f32.mxu0 %vm5292_vm1, %v5291_v8 }
 0xce4   :  { %v1221_v59 = vpop.f32.mrb[20].mxu0 }
 0xce5   :  { %v1225_v60 = vpack.c.bf16 %v1221_v59, %v1221_v59  ;;  %v4909_v61 = vpop.f32.mrb[21].mxu0 }
 0xce7   :  { %4913 = vmatmul.mubr.msk.bf16.vlgmr.msra.gmra.mrb[20].mxu1 %vm211_vm2, %v1225_v60 }
 0xce8   :  { %v1347_v62 = vpop.f32.mrb[22].mxu0  ;;  %4927 = vmatpush3.bf16.msra.mxu1 %v1230_v58  ;;  %4928 = vmatprep.mubr.msk.bf16.mxu1 %vm5292_vm1, %v5291_v8 }
 0xce9   :  { %v1351_v63 = vmul.f32 0.35355338, %v1347_v62  ;;  %v4920_v0 = vpop.f32.mrb[23].mxu0  ;;  %4942 = vmatprep.subr.bf16.mxu1 %v5291_v8 }
 0xceb   :  { %v1352_v2 = vadd.f32 %v1351_v63, %v5494_v14 }
 0xced   :  { %v1353_v3 = vsel %vm211_vm2, %v1352_v2, -inf }
 0xcee   :  { %1354 = vmax.xlane.f32.xlu1 %v1353_v3 }
 0xcff   :  { %1487 = vrot.lane.b32.xlu1 %v5446_v42, %s6077_s26 }
 0xd03   :  { %1485 = vrot.lane.b32.xlu1 %v5446_v42, %s6079_s27 }
 0xd7b   :  { %v1355_v4 = vpop.xlane.xlu1 %1354 }
 0xd7c   :  { %v1356_v5 = vsub.f32 %v1352_v2, %v1355_v4  ;;  %v4594_v2 = vld [vmem:[%s6060_s8] ss:$0 sm:$0xff] }
 0xd7e   :  { %v1357_v6 = vmul.f32 1.442695, %v1356_v5 }
 0xd7f   :  { %v1488_v19 = vpop.permute.xlu1 %1487 }
 0xd80   :  { %5223 = vpow2.f32 %v1357_v6 }
 0xd8a   :  { %v5224_v7 = vpop.eup %5223 }
 0xd8b   :  { %v1359_v9 = vsel %vm211_vm2, %v5224_v7, 0.0 }
 0xd8c   :  { %1360 = vadd.xlane.f32.xlu0 %v1359_v9 }
 0xda2   :  { %1364 = vrot.lane.b32.xlu0 %v5450_v46, %s5300_s22 }
 0xdba   :  { %v1266_v10 = vpop.f32.mrb[20].mxu1 }
 0xdbb   :  { %v5608_v11 = vadd.f32 %v1266_v10, %v5542_v1  ;;  %v4914_v12 = vpop.f32.mrb[21].mxu1  ;;  %v1486_v1 = vpop.permute.xlu1 %1485 }
 0xdbc   :  { %v1269_v13 = vpop.f32.mrb[22].mxu1 }
 0xdbd   :  { %v4915_v15 = vpop.f32.mrb[23].mxu1 }
 0xe19   :  { %v1361_v16 = vpop.xlane.xlu0 %1360 }
 0xe1a   :  { %5225 = vrcp.f32 %v1361_v16 }
 0xe1d   :  { %v1365_v17 = vpop.permute.xlu0 %1364 }
 0xe1e   :  { %4922 = vmatpush3.msra.mxu0 %v1365_v17 }
 0xe1f   :  { %4932 = vmatprep.subr.mxu0 %v5291_v8 }
 0xe24   :  { %v5226_v18 = vpop.eup %5225 }
 0xe25   :  { %v1363_v20 = vmul.f32 %v5226_v18, %v5224_v7 }
 0xe27   :  { %4924 = vmatmul.mubr.msk.f32.vlgmr.msra.gmra.mrb[24].mxu0 %vm211_vm2, %v1363_v20 }
 0xe28   :  { %4933 = vmatpush3.xpose.msk.msra.mxu0 %vm211_vm2, %v1488_v19  ;;  %4934 = vmatprep.mubr.msk.f32.mxu0 %vm5292_vm1, %v5291_v8 }
 0xe29   :  { %4937 = vmatprep.subr.mxu0 %v5291_v8 }
 0xe2b   :  { %4935 = vmatmul.mubr.msk.f32.vlgmr.msra.gmra.mrb[26].mxu0 %vm211_vm2, %v1486_v1 }
 0xe2c   :  { %4939 = vmatprep.mubr.msk.f32.mxu0 %vm5292_vm1, %v5291_v8 }
 0xefa   :  { %v1436_v21 = vpop.f32.mrb[24].mxu0 }
 0xefb   :  { %v1440_v22 = vpack.c.bf16 %v1436_v21, %v1436_v21  ;;  %v4925_v23 = vpop.f32.mrb[25].mxu0 }
 0xefd   :  { %4929 = vmatmul.mubr.msk.bf16.vlgmr.msra.gmra.mrb[24].mxu1 %vm211_vm2, %v1440_v22 }
 0xefe   :  { %v1559_v24 = vpop.f32.mrb[26].mxu0  ;;  %4944 = vmatprep.mubr.msk.bf16.mxu1 %vm5292_vm1, %v5291_v8 }
 0xeff   :  { %v1563_v25 = vmul.f32 0.35355338, %v1559_v24  ;;  %v4936_v26 = vpop.f32.mrb[27].mxu0 }
 0xf01   :  { %v1564_v27 = vadd.f32 %v1563_v25, %v5465_v54 }
 0xf03   :  { %v1565_v28 = vsel %vm211_vm2, %v1564_v27, -inf }
 0xf04   :  { %1566 = vmax.xlane.f32.xlu0 %v1565_v28  ;;  %v5181_v28 = vld [vmem:[%s6061_s11] sm:$0xff]  }
 0xf1a   :  { %1576 = vrot.lane.b32.xlu0 %v5446_v42, %s6075_s28 }
 0xf1e   :  { %1700 = vrot.lane.b32.xlu0 %v5450_v46, %s6079_s27 }
 0xf91   :  { %v1567_v29 = vpop.xlane.xlu0 %1566 }
 0xf92   :  { %v1568_v30 = vsub.f32 %v1564_v27, %v1567_v29  ;;  %v5182_v29 = vld [vmem:[%s6061_s11 + $0x8] sm:$0xff]  }
 0xf94   :  { %v1569_v31 = vmul.f32 1.442695, %v1568_v30 }
 0xf95   :  { %v1577_v33 = vpop.permute.xlu0 %1576 }
 0xf96   :  { %5227 = vpow2.f32 %v1569_v31  ;;  %4938 = vmatpush3.msra.mxu0 %v1577_v33 }
 0xf97   :  { %4948 = vmatprep.subr.mxu0 %v5291_v8 }
 0xf99   :  { %v1701_v48 = vpop.permute.xlu0 %1700 }
 0xfa0   :  { %v5228_v34 = vpop.eup %5227 }
 0xfa1   :  { %v1571_v35 = vsel %vm211_vm2, %v5228_v34, 0.0 }
 0xfa2   :  { %1572 = vadd.xlane.f32.xlu1 %v1571_v35 }
 0xfb3   :  { %1702 = vrot.lane.b32.xlu1 %v5450_v46, %s6077_s26 }
 0xfd0   :  { %v1478_v36 = vpop.f32.mrb[24].mxu1 }
 0xfd1   :  { %v5633_v42 = vadd.f32 %v1478_v36, %v5569_v32  ;;  %v4930_v39 = vpop.f32.mrb[25].mxu1  ;;  %v207_v32 = vld [vmem:[%s6059_s7 + $0xc] sm:$0xf] }
 0xfd2   :  { %v1481_v40 = vpop.f32.mrb[26].mxu1  ;;  %v1657_v49 = vsel %vm714_vm3, %v207_v32, 0 }
 0xfd3   :  { %v4931_v41 = vpop.f32.mrb[27].mxu1  ;;  %4943 = vmatpush3.bf16.msra.mxu1 %v1657_v49 }
 0xfd4   :  { %4958 = vmatprep.subr.bf16.mxu1 %v5291_v8 }
0x102f   :  { %v1573_v43 = vpop.xlane.xlu1 %1572 }
0x1030   :  { %5229 = vrcp.f32 %v1573_v43 }
0x1033   :  { %v1703_v47 = vpop.permute.xlu1 %1702 }
0x103a   :  { %v5230_v44 = vpop.eup %5229 }
0x103b   :  { %v1575_v45 = vmul.f32 %v5230_v44, %v5228_v34 }
0x103d   :  { %4940 = vmatmul.mubr.msk.f32.vlgmr.msra.gmra.mrb[28].mxu0 %vm211_vm2, %v1575_v45 }
0x103e   :  { %4949 = vmatpush3.xpose.msk.msra.mxu0 %vm211_vm2, %v1703_v47  ;;  %4950 = vmatprep.mubr.msk.f32.mxu0 %vm5292_vm1, %v5291_v8 }
0x103f   :  { %4953 = vmatprep.subr.mxu0 %v5291_v8 }
0x1041   :  { %4951 = vmatmul.mubr.msk.f32.vlgmr.msra.gmra.mrb[30].mxu0 %vm211_vm2, %v1701_v48 }
0x1042   :  { %4955 = vmatprep.mubr.msk.f32.mxu0 %vm5292_vm1, %v5291_v8 }
0x1110   :  { %v1648_v50 = vpop.f32.mrb[28].mxu0 }
0x1111   :  { %v1652_v51 = vpack.c.bf16 %v1648_v50, %v1648_v50  ;;  %v4941_v52 = vpop.f32.mrb[29].mxu0 }
0x1113   :  { %4945 = vmatmul.mubr.msk.bf16.vlgmr.msra.gmra.mrb[28].mxu1 %vm211_vm2, %v1652_v51  ;;  %v4595_v51 = vld [vmem:[%s6062_s9] ss:$0 sm:$0xff] }
0x1114   :  { %v1774_v53 = vpop.f32.mrb[30].mxu0  ;;  %4959 = vmatpush3.bf16.msra.mxu1 %v1657_v49  ;;  %4960 = vmatprep.mubr.msk.bf16.mxu1 %vm5292_vm1, %v5291_v8 }
0x1115   :  { %v1778_v55 = vmul.f32 0.35355338, %v1774_v53  ;;  %v4952_v56 = vpop.f32.mrb[31].mxu0  ;;  %4972 = vmatprep.subr.bf16.mxu1 %v5291_v8 }
0x1117   :  { %v1779_v57 = vadd.f32 %v1778_v55, %v5494_v14 }
0x1119   :  { %v1780_v58 = vsel %vm211_vm2, %v1779_v57, -inf }
0x111a   :  { %1781 = vmax.xlane.f32.xlu1 %v1780_v58 }
0x11a7   :  { %v1782_v59 = vpop.xlane.xlu1 %1781 }
0x11a8   :  { %v1783_v60 = vsub.f32 %v1779_v57, %v1782_v59  ;;  %v4596_v57 = vld [vmem:[%s6063_s10] ss:$0 sm:$0xff] }
0x11aa   :  { %v1784_v61 = vmul.f32 1.442695, %v1783_v60 }
0x11ac   :  { %5231 = vpow2.f32 %v1784_v61 }
0x11b6   :  { %v5232_v62 = vpop.eup %5231 }
0x11b7   :  { %v1786_v63 = vsel %vm211_vm2, %v5232_v62, 0.0 }
0x11b8   :  { %1787 = vadd.xlane.f32.xlu0 %v1786_v63  ;;  %v5184_v63 = vld [vmem:[%s6064_s13 + $0x8] sm:$0xff]  }
0x11ce   :  { %1791 = vrot.lane.b32.xlu0 %v5450_v46, %s6075_s28 }
0x11e6   :  { %v1693_v0 = vpop.f32.mrb[28].mxu1 }
0x11e7   :  { %v1699_v3 = vadd.f32 %v1693_v0, %v5608_v11  ;;  %v4946_v4 = vpop.f32.mrb[29].mxu1  ;;  %v5185_v0 = vld [vmem:[%s6064_s13 + $0x10] sm:$0xff]  }
0x11e8   :  { %v1696_v5 = vpop.f32.mrb[30].mxu1 }
0x11e9   :  { %v1919_v6 = vadd.f32 %v4594_v2, %v1699_v3  ;;  %v4947_v7 = vpop.f32.mrb[31].mxu1  ;;  %v4597_v3 = vld [vmem:[%s6065_s12] ss:$0 sm:$0xff] }
0x11eb   :  { %v1921_v9 = vadd.f32 %v1919_v6, %v5434_v37 }
0x11ed   :  { %v1925_v10 = vsel %vm86_vm0, %v1921_v9, 0.0  ;;  %v1933_v12 = vmul.f32 %v1921_v9, %v1921_v9 }
0x11ee   :  { %1926 = vadd.xlane.f32.xlu1 %v1925_v10 }
0x11ef   :  { %v1935_v13 = vsel %vm86_vm0, %v1933_v12, 0.0 }
0x11f2   :  { %1936 = vadd.xlane.f32.xlu1 %v1935_v13 }
0x1245   :  { %v1788_v46 = vpop.xlane.xlu0 %1787 }
0x1246   :  { %5233 = vrcp.f32 %v1788_v46 }
0x1249   :  { %v1792_v15 = vpop.permute.xlu0 %1791 }
0x124a   :  { %4954 = vmatpush3.msra.mxu0 %v1792_v15 }
0x124b   :  { %4964 = vmatprep.subr.bf16.mxu0 %v5291_v8 }
0x1250   :  { %v5234_v11 = vpop.eup %5233 }
0x1251   :  { %v1790_v16 = vmul.f32 %v5234_v11, %v5232_v62  ;;  %v5183_v62 = vld [vmem:[%s6064_s13] sm:$0xff]  }
0x1253   :  { %4956 = vmatmul.mubr.msk.f32.vlgmr.msra.gmra.mrb[32].mxu0 %vm211_vm2, %v1790_v16 }
0x1254   :  { %4968 = vmatprep.mubr.msk.bf16.mxu0 %vm5292_vm1, %v5291_v8  ;;  %4965 = vmatpush3.bf16.msra.mxu0 %v5181_v28  ;;  %v4601_v28 = vld [vmem:[%s6066_s14] ss:$0 sm:$0xff] }
0x1255   :  { %4966 = vmatprep.subr.bf16.mxu0 %v5291_v8 }
0x1258   :  { %4967 = vmatpush3.bf16.msra.mxu0 %v5182_v29 }
0x1259   :  { %4984 = vmatprep.subr.bf16.mxu0 %v5291_v8 }
0x1326   :  { %v1863_v37 = vpop.f32.mrb[32].mxu0 }
0x1327   :  { %v1867_v17 = vpack.c.bf16 %v1863_v37, %v1863_v37  ;;  %v4957_v18 = vpop.f32.mrb[33].mxu0 }
0x1329   :  { %4961 = vmatmul.mubr.msk.bf16.vlgmr.msra.gmra.mrb[32].mxu1 %vm211_vm2, %v1867_v17 }
0x132a   :  { %4980 = vmatprep.mubr.msk.bf16.mxu1 %vm5292_vm1, %v5291_v8  ;;  %4973 = vmatpush3.bf16.msra.mxu1 %v5183_v62 }
0x132b   :  { %4974 = vmatprep.subr.bf16.mxu1 %v5291_v8 }
0x132e   :  { %4975 = vmatpush3.bf16.msra.mxu1 %v5184_v63 }
0x132f   :  { %4976 = vmatprep.subr.bf16.mxu1 %v5291_v8 }
0x1332   :  { %4977 = vmatpush3.bf16.msra.mxu1 %v5185_v0 }
0x1333   :  { %4978 = vmatprep.subr.bf16.mxu1 %v5291_v8 }
0x13fc   :  { %v1905_v19 = vpop.f32.mrb[32].mxu1 }
0x13fd   :  { %v1911_v20 = vadd.f32 %v1905_v19, %v5633_v42  ;;  %v4962_v1 = vpop.f32.mrb[33].mxu1 }
0x13fe   :  { %v1908_v21 = vpop.f32.mrb[34].mxu1 }
0x13ff   :  { %v1920_v22 = vadd.f32 %v4594_v2, %v1911_v20  ;;  %v4963_v23 = vpop.f32.mrb[35].mxu1  ;;  %v5186_v2 = vld [vmem:[%s6064_s13 + $0x18] sm:$0xff]  }
0x1400   :  { %4979 = vmatpush3.bf16.msra.mxu1 %v5186_v2 }
0x1401   :  { %v1922_v24 = vadd.f32 %v1920_v22, %v5436_v38  ;;  %v1927_v38 = vpop.xlane.xlu1 %1926  ;;  %4997 = vmatprep.subr.mxu1 %v5291_v8 }
0x1402   :  { %v1931_v31 = vmul.f32 0.03125, %v1927_v38 }
0x1403   :  { %v1928_v25 = vsel %vm86_vm0, %v1922_v24, 0.0  ;;  %v1934_v26 = vmul.f32 %v1922_v24, %v1922_v24 }
0x1404   :  { %1929 = vadd.xlane.f32.xlu1 %v1928_v25  ;;  %v1943_v34 = vmul.f32 %v1931_v31, %v1931_v31  ;;  %v1949_v49 = vsub.f32 %v1921_v9, %v1931_v31 }
0x1405   :  { %v1938_v27 = vsel %vm86_vm0, %v1934_v26, 0.0  ;;  %v1937_v30 = vpop.xlane.xlu1 %1936 }
0x1406   :  { %v1941_v33 = vmul.f32 0.03125, %v1937_v30 }
0x1408   :  { %1939 = vadd.xlane.f32.xlu1 %v1938_v27  ;;  %v1945_v35 = vsub.f32 %v1941_v33, %v1943_v34 }
0x140a   :  { %v1947_v36 = vmax.f32 %v1945_v35, 0.0 }
0x140c   :  { %v1951_v40 = vadd.f32 1e-12, %v1947_v36 }
0x140e   :  { %5235 = vrsqrt.f32 %v1951_v40 }
0x1418   :  { %v5236_v32 = vpop.eup %5235 }
0x1419   :  { %v1955_v50 = vmul.f32 %v5236_v32, %v1949_v49 }
0x141b   :  { %v1963_v56 = vmul.f32 %v4595_v51, %v1955_v50 }
0x141d   :  { %v1971_v59 = vadd.f32 %v4596_v57, %v1963_v56 }
0x1491   :  { %v1930_v42 = vpop.xlane.xlu1 %1929 }
0x1492   :  { %v1932_v39 = vmul.f32 0.03125, %v1930_v42 }
0x1494   :  { %v1944_v43 = vmul.f32 %v1932_v39, %v1932_v39  ;;  %v1950_v52 = vsub.f32 %v1922_v24, %v1932_v39 }
0x1495   :  { %v1940_v41 = vpop.xlane.xlu1 %1939 }
0x1496   :  { %v1942_v44 = vmul.f32 0.03125, %v1940_v41 }
0x1498   :  { %v1946_v45 = vsub.f32 %v1942_v44, %v1944_v43 }
0x149a   :  { %v1948_v47 = vmax.f32 %v1946_v45, 0.0  ;;  %v5187_v45 = vld [vmem:[%s6086_s23 + $0x10] sm:$0xff]  }
0x149c   :  { %v1952_v48 = vadd.f32 1e-12, %v1948_v47  ;;  %v5188_v47 = vld [vmem:[%s6086_s23 + $0x18] sm:$0xff]  }
0x149e   :  { %5237 = vrsqrt.f32 %v1952_v48 }
0x14a8   :  { %v5238_v53 = vpop.eup %5237 }
0x14a9   :  { %v1956_v55 = vmul.f32 %v5238_v53, %v1950_v52 }
0x14ab   :  { %v1964_v58 = vmul.f32 %v4595_v51, %v1956_v55 }
0x14ad   :  { %v1972_v60 = vadd.f32 %v4596_v57, %v1964_v58 }
0x14af   :  { %v1973_v61 = vpack.c.bf16 %v1972_v60, %v1971_v59 }
0x14b1   :  { %4969 = vmatmul.mubr.msk.bf16.vlgmr.msra.gmra.mrb[36].mxu0 %vm86_vm0, %v1973_v61 }
0x14b2   :  { %4988 = vmatprep.mubr.msk.bf16.mxu0 %vm5292_vm1, %v5291_v8  ;;  %4985 = vmatpush3.bf16.msra.mxu0 %v5187_v45 }
0x14b3   :  { %4986 = vmatprep.subr.bf16.mxu0 %v5291_v8 }
0x14b6   :  { %4987 = vmatpush3.bf16.msra.mxu0 %v5188_v47 }
0x14b7   :  { %4992 = vmatprep.subr.mxu0 %v5291_v8 }
0x1584   :  { %v2034_v4 = vpop.f32.mrb[36].mxu0 }
0x1585   :  { %v2035_v5 = vadd.f32 %v4597_v3, %v2034_v4  ;;  %v4970_v6 = vpop.f32.mrb[37].mxu0  ;;  %v4607_v4 = vld [vmem:[%s6067_s15] ss:$0 sm:$0xff] }
0x1586   :  { %v2037_v7 = vpop.f32.mrb[38].mxu0 }
0x1587   :  { %v2041_v9 = vmul.f32 %v2035_v5, %v2035_v5  ;;  %v2038_v10 = vadd.f32 %v4597_v3, %v2037_v7  ;;  %v4971_v12 = vpop.f32.mrb[39].mxu0 }
0x1589   :  { %v2043_v13 = vmul.f32 %v2041_v9, %v2035_v5  ;;  %v2042_v46 = vmul.f32 %v2038_v10, %v2038_v10 }
0x158b   :  { %v2045_v15 = vmul.f32 0.044715, %v2043_v13  ;;  %v2044_v11 = vmul.f32 %v2042_v46, %v2038_v10 }
0x158d   :  { %v2047_v16 = vadd.f32 %v2045_v15, %v2035_v5  ;;  %v2046_v37 = vmul.f32 0.044715, %v2044_v11  ;;  %v4614_v11 = vld [vmem:[%s6057_s6 + $0x1] ss:$0 sm:$0xff] }
0x158f   :  { %v2049_v17 = vmul.f32 0.7978846, %v2047_v16  ;;  %v2048_v18 = vadd.f32 %v2046_v37, %v2038_v10 }
0x1591   :  { %5239 = vtanh.f32 %v2049_v17  ;;  %v2050_v19 = vmul.f32 0.7978846, %v2048_v18 }
0x1593   :  { %5241 = vtanh.f32 %v2050_v19 }
0x159b   :  { %v5240_v20 = vpop.eup %5239 }
0x159c   :  { %v2053_v1 = vadd.f32 1.0, %v5240_v20 }
0x159d   :  { %v5242_v21 = vpop.eup %5241 }
0x159e   :  { %v2055_v22 = vmul.f32 0.5, %v2053_v1  ;;  %v2054_v23 = vadd.f32 1.0, %v5242_v21 }
0x15a0   :  { %v2056_v24 = vmul.f32 0.5, %v2054_v23  ;;  %v2057_v25 = vmul.f32 %v2055_v22, %v2035_v5 }
0x15a2   :  { %v2058_v26 = vmul.f32 %v2056_v24, %v2038_v10  ;;  %v4608_v10 = vld [vmem:[%s6068_s16] ss:$0 sm:$0xff] }
0x15a4   :  { %v2059_v27 = vpack.c.bf16 %v2058_v26, %v2057_v25 }
0x15a6   :  { %4981 = vmatmul.mubr.msk.bf16.vlgmr.msra.gmra.mrb[36].mxu1 %vm2099_vm4, %v2059_v27 }
0x15a7   :  { %4999 = vmatprep.mubr.msk.f32.mxu1 %vm5292_vm1, %v5291_v8 }
0x1679   :  { %v2137_v29 = vpop.f32.mrb[36].mxu1 }
0x167a   :  { %v2138_v38 = vadd.f32 %v4601_v28, %v2137_v29  ;;  %v4982_v30 = vpop.f32.mrb[37].mxu1 }
0x167b   :  { %v2140_v31 = vpop.f32.mrb[38].mxu1 }
0x167c   :  { %v2144_v33 = vadd.f32 %v2138_v38, %v1971_v59  ;;  %v2141_v34 = vadd.f32 %v4601_v28, %v2140_v31  ;;  %v4983_v35 = vpop.f32.mrb[39].mxu1 }
0x167e   :  { %v2145_v36 = vadd.f32 %v2141_v34, %v1972_v60  ;;  %v2148_v42 = vsel %vm86_vm0, %v2144_v33, 0.0  ;;  %v2156_v39 = vmul.f32 %v2144_v33, %v2144_v33 }
0x167f   :  { %2149 = vadd.xlane.f32.xlu1 %v2148_v42 }
0x1680   :  { %v2151_v40 = vsel %vm86_vm0, %v2145_v36, 0.0  ;;  %v2158_v41 = vsel %vm86_vm0, %v2156_v39, 0.0  ;;  %v2157_v43 = vmul.f32 %v2145_v36, %v2145_v36 }
0x1681   :  { %2152 = vadd.xlane.f32.xlu0 %v2151_v40 }
0x1682   :  { %v2161_v44 = vsel %vm86_vm0, %v2157_v43, 0.0 }
0x1683   :  { %2159 = vadd.xlane.f32.xlu1 %v2158_v41 }
0x1687   :  { %2162 = vadd.xlane.f32.xlu1 %v2161_v44 }
0x170c   :  { %v2150_v48 = vpop.xlane.xlu1 %2149 }
0x170d   :  { %v2154_v32 = vmul.f32 0.03125, %v2150_v48 }
0x170e   :  { %v2153_v49 = vpop.xlane.xlu0 %2152 }
0x170f   :  { %v2166_v51 = vmul.f32 %v2154_v32, %v2154_v32  ;;  %v2155_v52 = vmul.f32 0.03125, %v2153_v49  ;;  %v2172_v0 = vsub.f32 %v2144_v33, %v2154_v32 }
0x1710   :  { %v2160_v50 = vpop.xlane.xlu1 %2159 }
0x1711   :  { %v2164_v53 = vmul.f32 0.03125, %v2160_v50  ;;  %v2167_v57 = vmul.f32 %v2155_v52, %v2155_v52  ;;  %v2173_v5 = vsub.f32 %v2145_v36, %v2155_v52 }
0x1713   :  { %v2168_v55 = vsub.f32 %v2164_v53, %v2166_v51 }
0x1714   :  { %v2163_v56 = vpop.xlane.xlu1 %2162 }
0x1715   :  { %v2170_v58 = vmax.f32 %v2168_v55, 0.0  ;;  %v2165_v59 = vmul.f32 0.03125, %v2163_v56 }
0x1717   :  { %v2174_v60 = vadd.f32 1e-12, %v2170_v58  ;;  %v2169_v61 = vsub.f32 %v2165_v59, %v2167_v57 }
0x1719   :  { %5243 = vrsqrt.f32 %v2174_v60  ;;  %v2171_v62 = vmax.f32 %v2169_v61, 0.0 }
0x171b   :  { %v2175_v63 = vadd.f32 1e-12, %v2171_v62 }
0x171d   :  { %5245 = vrsqrt.f32 %v2175_v63 }
0x1723   :  { %v5244_v2 = vpop.eup %5243 }
0x1724   :  { %v2178_v3 = vmul.f32 %v5244_v2, %v2172_v0 }
0x1726   :  { %v2186_v9 = vmul.f32 %v4607_v4, %v2178_v3 }
0x1727   :  { %v5246_v6 = vpop.eup %5245 }
0x1728   :  { %v2179_v7 = vmul.f32 %v5246_v6, %v2173_v5  ;;  %v5735_v13 = vadd.f32 %v4608_v10, %v2186_v9  ;;  %v4618_v6 = vld [vmem:[%s6059_s7 + $0x10] sm:$0xf]  ;;  %v4619_v9 = vld [vmem:[%s6059_s7 + $0x14] sm:$0xf] }
0x172a   :  { %v2187_v12 = vmul.f32 %v4607_v4, %v2179_v7  ;;  %v2823_v7 = vsel %vm714_vm3, %v4618_v6, 0 }
0x172c   :  { %v5737_v46 = vadd.f32 %v4608_v10, %v2187_v12  ;;  %v2777_v10 = vsel %vm714_vm3, %v4619_v9, 0 }
0x172e   :  { %v2196_v15 = vpack.c.bf16 %v5737_v46, %v5735_v13 }
0x1730   :  { %4989 = vmatmul.mubr.msk.bf16.vlgmr.msra.gmra.mrb[40].mxu0 %vm86_vm0, %v2196_v15 }
0x1731   :  { %4994 = vmatprep.mubr.msk.f32.mxu0 %vm5292_vm1, %v5291_v8 }
0x1803   :  { %v2259_v16 = vpop.f32.mrb[40].mxu0 }
0x1804   :  { %v5747_v37 = vadd.f32 %v4614_v11, %v2259_v16  ;;  %v4990_v17 = vpop.f32.mrb[41].mxu0 }
0x1805   :  { %v2262_v18 = vpop.f32.mrb[42].mxu0 }
0x1806   :  { %2607 = vrot.lane.b32.xlu0 %v5747_v37, %s5296_s25  ;;  %2272 = vrot.lane.b32.xlu1 %v5747_v37, %s5293_s21  ;;  %v4991_v19 = vpop.f32.mrb[43].mxu0  ;;  %v5753_v20 = vadd.f32 %v4614_v11, %v2262_v18 }
0x180a   :  { %2439 = vrot.lane.b32.xlu1 %v5753_v20, %s5293_s21 }
0x180e   :  { %2605 = vrot.lane.b32.xlu1 %v5747_v37, %s5294_s5 }
0x1878   :  { %v2273_v1 = vpop.permute.xlu1 %2272  ;;  %v2608_v22 = vpop.permute.xlu0 %2607 }
0x1879   :  { %4993 = vmatpush3.xpose.msk.msra.mxu0 %vm211_vm2, %v2273_v1 }
0x187a   :  { %5002 = vmatprep.subr.mxu0 %v5291_v8 }
0x187c   :  { %4995 = vmatmul.mubr.msk.f32.vlgmr.msra.gmra.mrb[34].mxu0 %vm211_vm2, %v5747_v37  ;;  %v2440_v21 = vpop.permute.xlu1 %2439 }
0x187d   :  { %5003 = vmatpush3.xpose.msk.msra.mxu0 %vm211_vm2, %v2440_v21  ;;  %5004 = vmatprep.mubr.msk.f32.mxu0 %vm5292_vm1, %v5291_v8 }
0x187e   :  { %5012 = vmatprep.subr.mxu0 %v5291_v8 }
0x1880   :  { %5005 = vmatmul.mubr.msk.f32.vlgmr.msra.gmra.mrb[44].mxu0 %vm211_vm2, %v5753_v20  ;;  %v2606_v23 = vpop.permute.xlu1 %2605 }
0x1881   :  { %5013 = vmatpush3.xpose.msk.msra.mxu0 %vm211_vm2, %v2608_v22  ;;  %5014 = vmatprep.mubr.msk.f32.mxu0 %vm5292_vm1, %v5291_v8 }
0x1882   :  { %5022 = vmatprep.subr.bf16.mxu0 %v5291_v8 }
0x1884   :  { %5015 = vmatmul.mubr.msk.f32.vlgmr.msra.gmra.mrb[46].mxu0 %vm211_vm2, %v2606_v23 }
0x1885   :  { %5024 = vmatprep.mubr.msk.bf16.mxu0 %vm5292_vm1, %v5291_v8  ;;  %5023 = vmatpush3.bf16.msra.mxu0 %v2777_v10 }
0x1886   :  { %5034 = vmatprep.subr.mxu0 %v5291_v8 }
0x194f   :  { %v2344_v24 = vpop.f32.mrb[34].mxu0 }
0x1950   :  { %v2348_v25 = vmul.f32 0.35355338, %v2344_v24  ;;  %v4996_v26 = vpop.f32.mrb[35].mxu0 }
0x1952   :  { %v2349_v27 = vadd.f32 %v2348_v25, %v5465_v54 }
0x1953   :  { %v2511_v28 = vpop.f32.mrb[44].mxu0 }
0x1954   :  { %v2515_v29 = vmul.f32 0.35355338, %v2511_v28  ;;  %v5006_v38 = vpop.f32.mrb[45].mxu0  ;;  %v2350_v30 = vsel %vm211_vm2, %v2349_v27, -inf }
0x1955   :  { %2351 = vmax.xlane.f32.xlu1 %v2350_v30 }
0x1956   :  { %v2516_v31 = vadd.f32 %v2515_v29, %v5494_v14 }
0x1957   :  { %v2679_v33 = vpop.f32.mrb[46].mxu0 }
0x1958   :  { %v2683_v34 = vmul.f32 0.35355338, %v2679_v33  ;;  %v5016_v35 = vpop.f32.mrb[47].mxu0  ;;  %v2517_v36 = vsel %vm211_vm2, %v2516_v31, -inf }
0x1959   :  { %2518 = vmax.xlane.f32.xlu0 %v2517_v36 }
0x195a   :  { %v2684_v42 = vadd.f32 %v2683_v34, %v5465_v54 }
0x195c   :  { %v2685_v39 = vsel %vm211_vm2, %v2684_v42, -inf }
0x195d   :  { %2686 = vmax.xlane.f32.xlu1 %v2685_v39 }
0x196e   :  { %2528 = vrot.lane.b32.xlu1 %v5753_v20, %s5295_s24 }
0x196f   :  { %2361 = vrot.lane.b32.xlu0 %v5747_v37, %s5295_s24 }
0x1973   :  { %2867 = vrot.lane.b32.xlu0 %v5753_v20, %s5296_s25 }
0x19e2   :  { %v2352_v40 = vpop.xlane.xlu1 %2351 }
0x19e3   :  { %v2353_v41 = vsub.f32 %v2349_v27, %v2352_v40 }
0x19e5   :  { %v2354_v43 = vmul.f32 1.442695, %v2353_v41 }
0x19e6   :  { %v2519_v44 = vpop.xlane.xlu0 %2518 }
0x19e7   :  { %5247 = vpow2.f32 %v2354_v43  ;;  %v2520_v45 = vsub.f32 %v2516_v31, %v2519_v44 }
0x19e9   :  { %v2521_v47 = vmul.f32 1.442695, %v2520_v45 }
0x19ea   :  { %v2362_v48 = vpop.permute.xlu0 %2361  ;;  %v2687_v32 = vpop.xlane.xlu1 %2686 }
0x19eb   :  { %5249 = vpow2.f32 %v2521_v47  ;;  %v2688_v49 = vsub.f32 %v2684_v42, %v2687_v32  ;;  %4998 = vmatpush3.msra.mxu1 %v2362_v48 }
0x19ec   :  { %5007 = vmatprep.subr.mxu1 %v5291_v8 }
0x19ed   :  { %v2689_v50 = vmul.f32 1.442695, %v2688_v49 }
0x19ee   :  { %v2529_v58 = vpop.permute.xlu1 %2528  ;;  %v2868_v21 = vpop.permute.xlu0 %2867 }
0x19ef   :  { %5251 = vpow2.f32 %v2689_v50 }
0x19f1   :  { %v5248_v51 = vpop.eup %5247 }
0x19f2   :  { %v2356_v52 = vsel %vm211_vm2, %v5248_v51, 0.0 }
0x19f3   :  { %2357 = vadd.xlane.f32.xlu1 %v2356_v52 }
0x19f5   :  { %v5250_v53 = vpop.eup %5249 }
0x19f6   :  { %v2523_v55 = vsel %vm211_vm2, %v5250_v53, 0.0 }
0x19f7   :  { %2524 = vadd.xlane.f32.xlu1 %v2523_v55 }
0x19f9   :  { %v5252_v56 = vpop.eup %5251 }
0x19fa   :  { %v2691_v57 = vsel %vm211_vm2, %v5252_v56, 0.0 }
0x19fb   :  { %2692 = vadd.xlane.f32.xlu1 %v2691_v57 }
0x1a0c   :  { %2696 = vrot.lane.b32.xlu1 %v5747_v37, %s5297_s1 }
0x1a10   :  { %2865 = vrot.lane.b32.xlu1 %v5753_v20, %s5294_s5 }
0x1a80   :  { %v2358_v59 = vpop.xlane.xlu1 %2357 }
0x1a81   :  { %5253 = vrcp.f32 %v2358_v59 }
0x1a84   :  { %v2525_v60 = vpop.xlane.xlu1 %2524 }
0x1a85   :  { %5255 = vrcp.f32 %v2525_v60 }
0x1a88   :  { %v2693_v61 = vpop.xlane.xlu1 %2692 }
0x1a89   :  { %5257 = vrcp.f32 %v2693_v61 }
0x1a8b   :  { %v5254_v62 = vpop.eup %5253 }
0x1a8c   :  { %v2360_v63 = vmul.f32 %v5254_v62, %v5248_v51  ;;  %v2697_v3 = vpop.permute.xlu1 %2696 }
0x1a8e   :  { %5000 = vmatmul.mubr.msk.f32.vlgmr.msra.gmra.mrb[18].mxu1 %vm211_vm2, %v2360_v63 }
0x1a8f   :  { %v5256_v0 = vpop.eup %5255  ;;  %5008 = vmatpush3.msra.mxu1 %v2529_v58  ;;  %5009 = vmatprep.mubr.msk.f32.mxu1 %vm5292_vm1, %v5291_v8 }
0x1a90   :  { %v2527_v2 = vmul.f32 %v5256_v0, %v5250_v53  ;;  %5017 = vmatprep.subr.mxu1 %v5291_v8  ;;  %v2866_v22 = vpop.permute.xlu1 %2865 }
0x1a92   :  { %5010 = vmatmul.mubr.msk.f32.vlgmr.msra.gmra.mrb[40].mxu1 %vm211_vm2, %v2527_v2 }
0x1a93   :  { %v5258_v4 = vpop.eup %5257  ;;  %5018 = vmatpush3.msra.mxu1 %v2697_v3  ;;  %5019 = vmatprep.mubr.msk.f32.mxu1 %vm5292_vm1, %v5291_v8 }
0x1a94   :  { %v2695_v5 = vmul.f32 %v5258_v4, %v5252_v56  ;;  %5028 = vmatprep.subr.bf16.mxu1 %v5291_v8 }
0x1a96   :  { %5020 = vmatmul.mubr.msk.f32.vlgmr.msra.gmra.mrb[42].mxu1 %vm211_vm2, %v2695_v5 }
0x1a97   :  { %5030 = vmatprep.mubr.msk.bf16.mxu1 %vm5292_vm1, %v5291_v8  ;;  %5029 = vmatpush3.bf16.msra.mxu1 %v2823_v7 }
0x1a98   :  { %5039 = vmatprep.subr.mxu1 %v5291_v8 }
0x1b61   :  { %v2433_v12 = vpop.f32.mrb[18].mxu1 }
0x1b62   :  { %v2437_v15 = vpack.c.bf16 %v2433_v12, %v2433_v12  ;;  %v5001_v11 = vpop.f32.mrb[19].mxu1 }
0x1b64   :  { %5031 = vmatmul.mubr.msk.bf16.vlgmr.msra.gmra.mrb[44].mxu1 %vm211_vm2, %v2437_v15 }
0x1b65   :  { %v2600_v16 = vpop.f32.mrb[40].mxu1  ;;  %5041 = vmatprep.mubr.msk.f32.mxu1 %vm5292_vm1, %v5291_v8 }
0x1b66   :  { %v5011_v17 = vpop.f32.mrb[41].mxu1  ;;  %v2604_v32 = vpack.c.bf16 %v2600_v16, %v2600_v16 }
0x1b69   :  { %v2768_v18 = vpop.f32.mrb[42].mxu1 }
0x1b6a   :  { %v2772_v19 = vpack.c.bf16 %v2768_v18, %v2768_v18  ;;  %v5021_v1 = vpop.f32.mrb[43].mxu1 }
0x1b6b   :  { %v4620_v1 = vld [vmem:[%s6059_s7 + $0x18] sm:$0xf] }
0x1b6c   :  { %5025 = vmatmul.mubr.msk.bf16.vlgmr.msra.gmra.mrb[48].mxu0 %vm211_vm2, %v2772_v19 }
0x1b6d   :  { %5035 = vmatpush3.xpose.msk.msra.mxu0 %vm211_vm2, %v2868_v21  ;;  %5036 = vmatprep.mubr.msk.f32.mxu0 %vm5292_vm1, %v5291_v8  ;;  %v3291_v21 = vsel %vm714_vm3, %v4620_v1, 0 }
0x1b6e   :  { %5044 = vmatprep.subr.bf16.mxu0 %v5291_v8 }
0x1b74   :  { %5037 = vmatmul.mubr.msk.f32.vlgmr.msra.gmra.mrb[52].mxu0 %vm211_vm2, %v2866_v22 }
0x1b75   :  { %5045 = vmatpush3.bf16.msra.mxu0 %v2777_v10  ;;  %5046 = vmatprep.mubr.msk.bf16.mxu0 %vm5292_vm1, %v5291_v8 }
0x1b76   :  { %5056 = vmatprep.subr.mxu0 %v5291_v8 }
0x1c37   :  { %v2859_v23 = vpop.f32.mrb[44].mxu1 }
0x1c38   :  { %v5032_v24 = vpop.f32.mrb[45].mxu1 }
0x1c39   :  { %v2862_v25 = vpop.f32.mrb[46].mxu1 }
0x1c3a   :  { %v5033_v26 = vpop.f32.mrb[47].mxu1 }
0x1c3f   :  { %v2813_v27 = vpop.f32.mrb[48].mxu0 }
0x1c40   :  { %v5829_v28 = vadd.f32 %v2859_v23, %v2813_v27  ;;  %v5026_v29 = vpop.f32.mrb[49].mxu0 }
0x1c41   :  { %v2816_v38 = vpop.f32.mrb[50].mxu0 }
0x1c42   :  { %v5027_v30 = vpop.f32.mrb[51].mxu0 }
0x1c47   :  { %v2939_v31 = vpop.f32.mrb[52].mxu0 }
0x1c48   :  { %v2943_v33 = vmul.f32 0.35355338, %v2939_v31  ;;  %v5038_v34 = vpop.f32.mrb[53].mxu0 }
0x1c4a   :  { %v2944_v35 = vadd.f32 %v2943_v33, %v5494_v14 }
0x1c4c   :  { %v2945_v36 = vsel %vm211_vm2, %v2944_v35, -inf }
0x1c4d   :  { %2946 = vmax.xlane.f32.xlu0 %v2945_v36 }
0x1c63   :  { %2956 = vrot.lane.b32.xlu0 %v5753_v20, %s5297_s1 }
0x1c67   :  { %3119 = vrot.lane.b32.xlu0 %v5747_v37, %s5299_s20 }
0x1cda   :  { %v2947_v42 = vpop.xlane.xlu0 %2946 }
0x1cdb   :  { %v2948_v39 = vsub.f32 %v2944_v35, %v2947_v42 }
0x1cdd   :  { %v2949_v40 = vmul.f32 1.442695, %v2948_v39 }
0x1cde   :  { %v2957_v41 = vpop.permute.xlu0 %2956 }
0x1cdf   :  { %5259 = vpow2.f32 %v2949_v40  ;;  %5040 = vmatpush3.msra.mxu1 %v2957_v41 }
0x1ce0   :  { %5050 = vmatprep.subr.bf16.mxu1 %v5291_v8 }
0x1ce2   :  { %v3120_v58 = vpop.permute.xlu0 %3119 }
0x1ce9   :  { %v5260_v43 = vpop.eup %5259 }
0x1cea   :  { %v2951_v44 = vsel %vm211_vm2, %v5260_v43, 0.0 }
0x1ceb   :  { %2952 = vadd.xlane.f32.xlu1 %v2951_v44 }
0x1cfc   :  { %3121 = vrot.lane.b32.xlu1 %v5747_v37, %s5298_s30 }
0x1d78   :  { %v2953_v45 = vpop.xlane.xlu1 %2952 }
0x1d79   :  { %5261 = vrcp.f32 %v2953_v45 }
0x1d7c   :  { %v3122_v52 = vpop.permute.xlu1 %3121 }
0x1d83   :  { %v5262_v47 = vpop.eup %5261 }
0x1d84   :  { %v2955_v48 = vmul.f32 %v5262_v47, %v5260_v43 }
0x1d86   :  { %5042 = vmatmul.mubr.msk.f32.vlgmr.msra.gmra.mrb[48].mxu1 %vm211_vm2, %v2955_v48 }
0x1d87   :  { %5051 = vmatpush3.bf16.msra.mxu1 %v2823_v7  ;;  %5052 = vmatprep.mubr.msk.bf16.mxu1 %vm5292_vm1, %v5291_v8 }
0x1d88   :  { %5061 = vmatprep.subr.mxu1 %v5291_v8 }
0x1d8a   :  { %5053 = vmatmul.mubr.msk.bf16.vlgmr.msra.gmra.mrb[52].mxu1 %vm211_vm2, %v2604_v32 }
0x1d8b   :  { %5063 = vmatprep.mubr.msk.f32.mxu1 %vm5292_vm1, %v5291_v8 }
0x1e59   :  { %v3028_v49 = vpop.f32.mrb[48].mxu1 }
0x1e5a   :  { %v3032_v50 = vpack.c.bf16 %v3028_v49, %v3028_v49  ;;  %v5043_v51 = vpop.f32.mrb[49].mxu1 }
0x1e5c   :  { %5047 = vmatmul.mubr.msk.bf16.vlgmr.msra.gmra.mrb[56].mxu0 %vm211_vm2, %v3032_v50 }
0x1e5d   :  { %5057 = vmatpush3.xpose.msk.msra.mxu0 %vm211_vm2, %v3122_v52  ;;  %v3113_v53 = vpop.f32.mrb[52].mxu1  ;;  %5058 = vmatprep.mubr.msk.f32.mxu0 %vm5292_vm1, %v5291_v8 }
0x1e5e   :  { %v5054_v55 = vpop.f32.mrb[53].mxu1  ;;  %5066 = vmatprep.subr.bf16.mxu0 %v5291_v8 }
0x1e5f   :  { %v3116_v56 = vpop.f32.mrb[54].mxu1 }
0x1e60   :  { %v5055_v57 = vpop.f32.mrb[55].mxu1 }
0x1e64   :  { %5059 = vmatmul.mubr.msk.f32.vlgmr.msra.gmra.mrb[54].mxu0 %vm211_vm2, %v3120_v58 }
0x1e65   :  { %5068 = vmatprep.mubr.msk.bf16.mxu0 %vm5292_vm1, %v5291_v8  ;;  %5067 = vmatpush3.bf16.msra.mxu0 %v3291_v21 }
0x1e66   :  { %5082 = vmatprep.subr.bf16.mxu0 %v5291_v8 }
0x1f2f   :  { %v3070_v59 = vpop.f32.mrb[56].mxu0 }
0x1f30   :  { %v5856_v60 = vadd.f32 %v3113_v53, %v3070_v59  ;;  %v5048_v61 = vpop.f32.mrb[57].mxu0 }
0x1f31   :  { %v3073_v62 = vpop.f32.mrb[58].mxu0 }
0x1f32   :  { %v5049_v63 = vpop.f32.mrb[59].mxu0 }
0x1f37   :  { %v3193_v0 = vpop.f32.mrb[54].mxu0 }
0x1f38   :  { %v3197_v2 = vmul.f32 0.35355338, %v3193_v0  ;;  %v5060_v3 = vpop.f32.mrb[55].mxu0 }
0x1f3a   :  { %v3198_v4 = vadd.f32 %v3197_v2, %v5465_v54 }
0x1f3c   :  { %v3199_v5 = vsel %vm211_vm2, %v3198_v4, -inf }
0x1f3d   :  { %3200 = vmax.xlane.f32.xlu1 %v3199_v5 }
0x1f4e   :  { %3336 = vrot.lane.b32.xlu1 %v5753_v20, %s5298_s30  ;;  %s6089_s30 = smov 104  }
0x1f52   :  { %3334 = vrot.lane.b32.xlu1 %v5753_v20, %s5299_s20  ;;  %s6090_s20 = smov 72  }
0x1fca   :  { %v3201_v6 = vpop.xlane.xlu1 %3200 }
0x1fcb   :  { %v3202_v7 = vsub.f32 %v3198_v4, %v3201_v6 }
0x1fcd   :  { %v3203_v9 = vmul.f32 1.442695, %v3202_v7 }
0x1fce   :  { %v3337_v17 = vpop.permute.xlu1 %3336 }
0x1fcf   :  { %5263 = vpow2.f32 %v3203_v9 }
0x1fd2   :  { %v3335_v19 = vpop.permute.xlu1 %3334 }
0x1fd9   :  { %v5264_v10 = vpop.eup %5263 }
0x1fda   :  { %v3205_v12 = vsel %vm211_vm2, %v5264_v10, 0.0 }
0x1fdb   :  { %3206 = vadd.xlane.f32.xlu0 %v3205_v12 }
0x1ff1   :  { %3210 = vrot.lane.b32.xlu0 %v5747_v37, %s5300_s22 }
0x2068   :  { %v3207_v15 = vpop.xlane.xlu0 %3206 }
0x2069   :  { %5265 = vrcp.f32 %v3207_v15 }
0x206c   :  { %v3211_v11 = vpop.permute.xlu0 %3210 }
0x206d   :  { %5062 = vmatpush3.msra.mxu1 %v3211_v11 }
0x206e   :  { %5072 = vmatprep.subr.mxu1 %v5291_v8 }
0x2073   :  { %v5266_v16 = vpop.eup %5265 }
0x2074   :  { %v3209_v18 = vmul.f32 %v5266_v16, %v5264_v10 }
0x2076   :  { %5064 = vmatmul.mubr.msk.f32.vlgmr.msra.gmra.mrb[50].mxu1 %vm211_vm2, %v3209_v18 }
0x2077   :  { %5073 = vmatpush3.xpose.msk.msra.mxu1 %vm211_vm2, %v3337_v17  ;;  %5074 = vmatprep.mubr.msk.f32.mxu1 %vm5292_vm1, %v5291_v8 }
0x2078   :  { %5077 = vmatprep.subr.mxu1 %v5291_v8 }
0x207a   :  { %5075 = vmatmul.mubr.msk.f32.vlgmr.msra.gmra.mrb[56].mxu1 %vm211_vm2, %v3335_v19 }
0x207b   :  { %5079 = vmatprep.mubr.msk.f32.mxu1 %vm5292_vm1, %v5291_v8 }
0x2149   :  { %v3282_v22 = vpop.f32.mrb[50].mxu1 }
0x214a   :  { %v3286_v23 = vpack.c.bf16 %v3282_v22, %v3282_v22  ;;  %v5065_v24 = vpop.f32.mrb[51].mxu1 }
0x214c   :  { %5069 = vmatmul.mubr.msk.bf16.vlgmr.msra.gmra.mrb[60].mxu0 %vm211_vm2, %v3286_v23 }
0x214d   :  { %v3408_v25 = vpop.f32.mrb[56].mxu1  ;;  %5083 = vmatpush3.bf16.msra.mxu0 %v3291_v21  ;;  %5084 = vmatprep.mubr.msk.bf16.mxu0 %vm5292_vm1, %v5291_v8 }
0x214e   :  { %v3412_v26 = vmul.f32 0.35355338, %v3408_v25  ;;  %v5076_v27 = vpop.f32.mrb[57].mxu1  ;;  %5098 = vmatprep.subr.bf16.mxu0 %v5291_v8 }
0x2150   :  { %v3413_v29 = vadd.f32 %v3412_v26, %v5494_v14 }
0x2152   :  { %v3414_v38 = vsel %vm211_vm2, %v3413_v29, -inf }
0x2153   :  { %3415 = vmax.xlane.f32.xlu0 %v3414_v38 }
0x2169   :  { %3425 = vrot.lane.b32.xlu0 %v5753_v20, %s5300_s22  ;;  %s6091_s22 = smov 40  }
0x216d   :  { %3546 = vrot.lane.b32.xlu0 %v5747_v37, %s6089_s30 }
0x21e0   :  { %v3416_v30 = vpop.xlane.xlu0 %3415 }
0x21e1   :  { %v3417_v31 = vsub.f32 %v3413_v29, %v3416_v30 }
0x21e3   :  { %v3418_v33 = vmul.f32 1.442695, %v3417_v31 }
0x21e4   :  { %v3426_v34 = vpop.permute.xlu0 %3425 }
0x21e5   :  { %5267 = vpow2.f32 %v3418_v33  ;;  %5078 = vmatpush3.msra.mxu1 %v3426_v34 }
0x21e6   :  { %5088 = vmatprep.subr.mxu1 %v5291_v8 }
0x21e8   :  { %v3547_v32 = vpop.permute.xlu0 %3546 }
0x21ef   :  { %v5268_v35 = vpop.eup %5267 }
0x21f0   :  { %v3420_v36 = vsel %vm211_vm2, %v5268_v35, 0.0 }
0x21f1   :  { %3421 = vadd.xlane.f32.xlu1 %v3420_v36 }
0x2202   :  { %3548 = vrot.lane.b32.xlu1 %v5747_v37, %s6090_s20 }
0x221f   :  { %v3327_v42 = vpop.f32.mrb[60].mxu0 }
0x2220   :  { %v5896_v39 = vadd.f32 %v3327_v42, %v5829_v28  ;;  %v5070_v40 = vpop.f32.mrb[61].mxu0 }
0x2221   :  { %v3330_v41 = vpop.f32.mrb[62].mxu0 }
0x2222   :  { %v5071_v43 = vpop.f32.mrb[63].mxu0 }
0x227e   :  { %v3422_v44 = vpop.xlane.xlu1 %3421 }
0x227f   :  { %5269 = vrcp.f32 %v3422_v44 }
0x2282   :  { %v3549_v48 = vpop.permute.xlu1 %3548 }
0x2289   :  { %v5270_v45 = vpop.eup %5269 }
0x228a   :  { %v3424_v47 = vmul.f32 %v5270_v45, %v5268_v35 }
0x228c   :  { %5080 = vmatmul.mubr.msk.f32.vlgmr.msra.gmra.mrb[58].mxu1 %vm211_vm2, %v3424_v47 }
0x228d   :  { %5089 = vmatpush3.xpose.msk.msra.mxu1 %vm211_vm2, %v3549_v48  ;;  %5090 = vmatprep.mubr.msk.f32.mxu1 %vm5292_vm1, %v5291_v8 }
0x228e   :  { %5093 = vmatprep.subr.mxu1 %v5291_v8 }
0x2290   :  { %5091 = vmatmul.mubr.msk.f32.vlgmr.msra.gmra.mrb[60].mxu1 %vm211_vm2, %v3547_v32 }
0x2291   :  { %5095 = vmatprep.mubr.msk.f32.mxu1 %vm5292_vm1, %v5291_v8 }
0x235f   :  { %v3497_v28 = vpop.f32.mrb[58].mxu1 }
0x2360   :  { %v3501_v49 = vpack.c.bf16 %v3497_v28, %v3497_v28  ;;  %v5081_v50 = vpop.f32.mrb[59].mxu1 }
0x2362   :  { %5085 = vmatmul.mubr.msk.bf16.vlgmr.msra.gmra.mrb[64].mxu0 %vm211_vm2, %v3501_v49 }
0x2363   :  { %v3620_v51 = vpop.f32.mrb[60].mxu1  ;;  %5100 = vmatprep.mubr.msk.bf16.mxu0 %vm5292_vm1, %v5291_v8 }
0x2364   :  { %v3624_v52 = vmul.f32 0.35355338, %v3620_v51  ;;  %v5092_v53 = vpop.f32.mrb[61].mxu1 }
0x2365   :  { %v5189_v53 = vld [vmem:[%s6061_s11 + $0x10] sm:$0xff]  }
0x2366   :  { %v3625_v55 = vadd.f32 %v3624_v52, %v5465_v54 }
0x2368   :  { %v3626_v56 = vsel %vm211_vm2, %v3625_v55, -inf }
0x2369   :  { %3627 = vmax.xlane.f32.xlu1 %v3626_v56 }
0x237a   :  { %3763 = vrot.lane.b32.xlu1 %v5753_v20, %s6090_s20 }
0x237e   :  { %3761 = vrot.lane.b32.xlu1 %v5753_v20, %s6089_s30 }
0x23f6   :  { %v3628_v57 = vpop.xlane.xlu1 %3627 }
0x23f7   :  { %v3629_v58 = vsub.f32 %v3625_v55, %v3628_v57  ;;  %v5190_v55 = vld [vmem:[%s6061_s11 + $0x18] sm:$0xff]  }
0x23f9   :  { %v3630_v59 = vmul.f32 1.442695, %v3629_v58 }
0x23fa   :  { %v3764_v7 = vpop.permute.xlu1 %3763 }
0x23fb   :  { %5271 = vpow2.f32 %v3630_v59 }
0x2405   :  { %v5272_v61 = vpop.eup %5271 }
0x2406   :  { %v3632_v62 = vsel %vm211_vm2, %v5272_v61, 0.0 }
0x2407   :  { %3633 = vadd.xlane.f32.xlu0 %v3632_v62 }
0x241d   :  { %3637 = vrot.lane.b32.xlu0 %v5747_v37, %s6091_s22  ;;  %v3762_v37 = vpop.permute.xlu1 %3761 }
0x2435   :  { %v3539_v54 = vpop.f32.mrb[64].mxu0 }
0x2436   :  { %v5919_v63 = vadd.f32 %v3539_v54, %v5856_v60  ;;  %v5086_v0 = vpop.f32.mrb[65].mxu0  ;;  %v4621_v60 = vld [vmem:[%s6059_s7 + $0x1c] sm:$0xf] }
0x2437   :  { %v3542_v2 = vpop.f32.mrb[66].mxu0  ;;  %v3718_v10 = vsel %vm714_vm3, %v4621_v60, 0 }
0x2438   :  { %v5087_v3 = vpop.f32.mrb[67].mxu0  ;;  %5099 = vmatpush3.bf16.msra.mxu0 %v3718_v10 }
0x2439   :  { %5114 = vmatprep.subr.bf16.mxu0 %v5291_v8 }
0x2494   :  { %v3634_v4 = vpop.xlane.xlu0 %3633 }
0x2495   :  { %5273 = vrcp.f32 %v3634_v4 }
0x2498   :  { %v3638_v5 = vpop.permute.xlu0 %3637 }
0x2499   :  { %5094 = vmatpush3.msra.mxu1 %v3638_v5 }
0x249a   :  { %5104 = vmatprep.subr.mxu1 %v5291_v8 }
0x249f   :  { %v5274_v6 = vpop.eup %5273 }
0x24a0   :  { %v3636_v9 = vmul.f32 %v5274_v6, %v5272_v61 }
0x24a2   :  { %5096 = vmatmul.mubr.msk.f32.vlgmr.msra.gmra.mrb[62].mxu1 %vm211_vm2, %v3636_v9 }
0x24a3   :  { %5105 = vmatpush3.xpose.msk.msra.mxu1 %vm211_vm2, %v3764_v7  ;;  %5106 = vmatprep.mubr.msk.f32.mxu1 %vm5292_vm1, %v5291_v8 }
0x24a4   :  { %5109 = vmatprep.subr.mxu1 %v5291_v8 }
0x24a6   :  { %5107 = vmatmul.mubr.msk.f32.vlgmr.msra.gmra.mrb[64].mxu1 %vm211_vm2, %v3762_v37 }
0x24a7   :  { %5111 = vmatprep.mubr.msk.f32.mxu1 %vm5292_vm1, %v5291_v8 }
0x2575   :  { %v3709_v12 = vpop.f32.mrb[62].mxu1 }
0x2576   :  { %v3713_v15 = vpack.c.bf16 %v3709_v12, %v3709_v12  ;;  %v5097_v11 = vpop.f32.mrb[63].mxu1 }
0x2578   :  { %5101 = vmatmul.mubr.msk.bf16.vlgmr.msra.gmra.mrb[68].mxu0 %vm211_vm2, %v3713_v15 }
0x2579   :  { %v3835_v16 = vpop.f32.mrb[64].mxu1  ;;  %5115 = vmatpush3.bf16.msra.mxu0 %v3718_v10  ;;  %5116 = vmatprep.mubr.msk.bf16.mxu0 %vm5292_vm1, %v5291_v8  ;;  %v4658_v10 = vld [vmem:[%s6062_s9 + $0x1] ss:$0 sm:$0xff] }
0x257a   :  { %v3839_v17 = vmul.f32 0.35355338, %v3835_v16  ;;  %v5108_v18 = vpop.f32.mrb[65].mxu1  ;;  %5128 = vmatprep.subr.bf16.mxu0 %v5291_v8 }
0x257c   :  { %v3840_v19 = vadd.f32 %v3839_v17, %v5494_v14  ;;  %v4655_v14 = vld [vmem:[%s6060_s8 + $0x1] ss:$0 sm:$0xff] }
0x257d   :  { %v4659_v17 = vld [vmem:[%s6063_s10 + $0x1] ss:$0 sm:$0xff] }
0x257e   :  { %v3841_v1 = vsel %vm211_vm2, %v3840_v19, -inf }
0x257f   :  { %3842 = vmax.xlane.f32.xlu0 %v3841_v1 }
0x2595   :  { %3852 = vrot.lane.b32.xlu0 %v5753_v20, %s6091_s22 }
0x260c   :  { %v3843_v21 = vpop.xlane.xlu0 %3842 }
0x260d   :  { %v3844_v22 = vsub.f32 %v3840_v19, %v3843_v21 }
0x260f   :  { %v3845_v23 = vmul.f32 1.442695, %v3844_v22  ;;  %v5191_v22 = vld [vmem:[%s6064_s13 + $0x20] sm:$0xff]  }
0x2610   :  { %v3853_v24 = vpop.permute.xlu0 %3852 }
0x2611   :  { %5275 = vpow2.f32 %v3845_v23  ;;  %5110 = vmatpush3.msra.mxu1 %v3853_v24  ;;  %v5192_v23 = vld [vmem:[%s6064_s13 + $0x28] sm:$0xff]   ;;  %v5193_v24 = vld [vmem:[%s6064_s13 + $0x30] sm:$0xff]  }
0x2612   :  { %5120 = vmatprep.subr.bf16.mxu1 %v5291_v8 }
0x261b   :  { %v5276_v25 = vpop.eup %5275 }
0x261c   :  { %v3847_v26 = vsel %vm211_vm2, %v5276_v25, 0.0 }
0x261d   :  { %3848 = vadd.xlane.f32.xlu1 %v3847_v26  ;;  %v4665_v26 = vld [vmem:[%s6065_s12 + $0x1] ss:$0 sm:$0xff] }
0x264b   :  { %v3754_v27 = vpop.f32.mrb[68].mxu0 }
0x264c   :  { %v3760_v29 = vadd.f32 %v3754_v27, %v5896_v39  ;;  %v5102_v20 = vpop.f32.mrb[69].mxu0 }
0x264d   :  { %v3757_v38 = vpop.f32.mrb[70].mxu0 }
0x264e   :  { %v3981_v30 = vadd.f32 %v4655_v14, %v3760_v29  ;;  %v5103_v31 = vpop.f32.mrb[71].mxu0 }
0x2650   :  { %v3983_v33 = vadd.f32 %v3981_v30, %v5735_v13 }
0x2652   :  { %v3989_v34 = vsel %vm86_vm0, %v3983_v33, 0.0  ;;  %v3997_v35 = vmul.f32 %v3983_v33, %v3983_v33 }
0x2653   :  { %3990 = vadd.xlane.f32.xlu1 %v3989_v34 }
0x2654   :  { %v3999_v36 = vsel %vm86_vm0, %v3997_v35, 0.0 }
0x2657   :  { %4000 = vadd.xlane.f32.xlu1 %v3999_v36 }
0x26aa   :  { %v3849_v42 = vpop.xlane.xlu1 %3848 }
0x26ab   :  { %5277 = vrcp.f32 %v3849_v42 }
0x26b5   :  { %v5278_v40 = vpop.eup %5277 }
0x26b6   :  { %v3851_v41 = vmul.f32 %v5278_v40, %v5276_v25  ;;  %v5194_v25 = vld [vmem:[%s6064_s13 + $0x38] sm:$0xff]  }
0x26b8   :  { %5112 = vmatmul.mubr.msk.f32.vlgmr.msra.gmra.mrb[66].mxu1 %vm211_vm2, %v3851_v41 }
0x26b9   :  { %5124 = vmatprep.mubr.msk.bf16.mxu1 %vm5292_vm1, %v5291_v8  ;;  %5121 = vmatpush3.bf16.msra.mxu1 %v5189_v53 }
0x26ba   :  { %5122 = vmatprep.subr.bf16.mxu1 %v5291_v8 }
0x26bd   :  { %5123 = vmatpush3.bf16.msra.mxu1 %v5190_v55 }
0x26be   :  { %5140 = vmatprep.subr.mxu1 %v5291_v8 }
0x278b   :  { %v3924_v39 = vpop.f32.mrb[66].mxu1 }
0x278c   :  { %v3928_v43 = vpack.c.bf16 %v3924_v39, %v3924_v39  ;;  %v5113_v44 = vpop.f32.mrb[67].mxu1 }
0x278e   :  { %5117 = vmatmul.mubr.msk.bf16.vlgmr.msra.gmra.mrb[72].mxu0 %vm211_vm2, %v3928_v43 }
0x278f   :  { %5136 = vmatprep.mubr.msk.bf16.mxu0 %vm5292_vm1, %v5291_v8  ;;  %5129 = vmatpush3.bf16.msra.mxu0 %v5191_v22  ;;  %v4686_v22 = vld [vmem:[%s6067_s15 + $0x1] ss:$0 sm:$0xff] }
0x2790   :  { %5130 = vmatprep.subr.bf16.mxu0 %v5291_v8 }
0x2793   :  { %5131 = vmatpush3.bf16.msra.mxu0 %v5192_v23 }
0x2794   :  { %5132 = vmatprep.subr.bf16.mxu0 %v5291_v8 }
0x2797   :  { %5133 = vmatpush3.bf16.msra.mxu0 %v5193_v24  ;;  %v4687_v24 = vld [vmem:[%s6068_s16 + $0x1] ss:$0 sm:$0xff] }
0x2798   :  { %5134 = vmatprep.subr.bf16.mxu0 %v5291_v8 }
0x279b   :  { %5135 = vmatpush3.bf16.msra.mxu0 %v5194_v25 }
0x279c   :  { %5153 = vmatprep.subr.mxu0 %v5291_v8 }
0x2861   :  { %v3966_v13 = vpop.f32.mrb[72].mxu0 }
0x2862   :  { %v3972_v45 = vadd.f32 %v3966_v13, %v5919_v63  ;;  %v5118_v47 = vpop.f32.mrb[73].mxu0 }
0x2863   :  { %v3969_v48 = vpop.f32.mrb[74].mxu0 }
0x2864   :  { %v3982_v32 = vadd.f32 %v4655_v14, %v3972_v45  ;;  %v5119_v28 = vpop.f32.mrb[75].mxu0 }
0x2866   :  { %v3984_v49 = vadd.f32 %v3982_v32, %v5737_v46  ;;  %v3991_v46 = vpop.xlane.xlu1 %3990 }
0x2867   :  { %v3995_v57 = vmul.f32 0.03125, %v3991_v46 }
0x2868   :  { %v3992_v50 = vsel %vm86_vm0, %v3984_v49, 0.0  ;;  %v3998_v51 = vmul.f32 %v3984_v49, %v3984_v49 }
0x2869   :  { %3993 = vadd.xlane.f32.xlu1 %v3992_v50  ;;  %v4007_v59 = vmul.f32 %v3995_v57, %v3995_v57  ;;  %v4013_v37 = vsub.f32 %v3983_v33, %v3995_v57 }
0x286a   :  { %v4002_v52 = vsel %vm86_vm0, %v3998_v51, 0.0  ;;  %v4001_v56 = vpop.xlane.xlu1 %4000  ;;  %v4678_v51 = vld [vmem:[%s6066_s14 + $0x1] ss:$0 sm:$0xff] }
0x286b   :  { %v4005_v58 = vmul.f32 0.03125, %v4001_v56 }
0x286d   :  { %4003 = vadd.xlane.f32.xlu1 %v4002_v52  ;;  %v4009_v61 = vsub.f32 %v4005_v58, %v4007_v59 }
0x286f   :  { %v4011_v62 = vmax.f32 %v4009_v61, 0.0 }
0x2871   :  { %v4015_v0 = vadd.f32 1e-12, %v4011_v62 }
0x2873   :  { %5279 = vrsqrt.f32 %v4015_v0 }
0x287d   :  { %v5280_v9 = vpop.eup %5279 }
0x287e   :  { %v4019_v60 = vmul.f32 %v5280_v9, %v4013_v37 }
0x2880   :  { %v4027_v16 = vmul.f32 %v4658_v10, %v4019_v60 }
0x2882   :  { %v4035_v19 = vadd.f32 %v4659_v17, %v4027_v16 }
0x28f6   :  { %v3994_v54 = vpop.xlane.xlu1 %3993 }
0x28f7   :  { %v3996_v63 = vmul.f32 0.03125, %v3994_v54 }
0x28f9   :  { %v4008_v3 = vmul.f32 %v3996_v63, %v3996_v63  ;;  %v4014_v12 = vsub.f32 %v3984_v49, %v3996_v63 }
0x28fa   :  { %v4004_v2 = vpop.xlane.xlu1 %4003 }
0x28fb   :  { %v4006_v4 = vmul.f32 0.03125, %v4004_v2 }
0x28fd   :  { %v4010_v5 = vsub.f32 %v4006_v4, %v4008_v3 }
0x28ff   :  { %v4012_v6 = vmax.f32 %v4010_v5, 0.0 }
0x2901   :  { %v4016_v7 = vadd.f32 1e-12, %v4012_v6 }
0x2903   :  { %5281 = vrsqrt.f32 %v4016_v7 }
0x290d   :  { %v5282_v15 = vpop.eup %5281 }
0x290e   :  { %v4020_v11 = vmul.f32 %v5282_v15, %v4014_v12 }
0x2910   :  { %v4028_v18 = vmul.f32 %v4658_v10, %v4020_v11 }
0x2912   :  { %v4036_v1 = vadd.f32 %v4659_v17, %v4028_v18 }
0x2914   :  { %v4037_v21 = vpack.c.bf16 %v4036_v1, %v4035_v19 }
0x2916   :  { %5125 = vmatmul.mubr.msk.bf16.vlgmr.msra.gmra.mrb[68].mxu1 %vm86_vm0, %v4037_v21 }
0x2917   :  { %5142 = vmatprep.mubr.msk.f32.mxu1 %vm5292_vm1, %v5291_v8 }
0x29e9   :  { %v4100_v27 = vpop.f32.mrb[68].mxu1 }
0x29ea   :  { %v4101_v14 = vadd.f32 %v4665_v26, %v4100_v27  ;;  %v5126_v29 = vpop.f32.mrb[69].mxu1  ;;  %v4265_v27 = vld [vmem:[%s6070_s2] sm:$0xff] }
0x29eb   :  { %v4103_v20 = vpop.f32.mrb[70].mxu1 }
0x29ec   :  { %v4107_v38 = vmul.f32 %v4101_v14, %v4101_v14  ;;  %v4104_v30 = vadd.f32 %v4665_v26, %v4103_v20  ;;  %v5127_v31 = vpop.f32.mrb[71].mxu1 }
0x29ee   :  { %v4109_v33 = vmul.f32 %v4107_v38, %v4101_v14  ;;  %v4108_v34 = vmul.f32 %v4104_v30, %v4104_v30 }
0x29f0   :  { %v4111_v35 = vmul.f32 0.044715, %v4109_v33  ;;  %v4110_v36 = vmul.f32 %v4108_v34, %v4104_v30  ;;  %v4693_v33 = vld [vmem:[%s6070_s2 + $0x8] sm:$0xff] }
0x29f1   :  { %v5196_v34 = vld [vmem:[%s6069_s17 + $0x8] sm:$0xff]  }
0x29f2   :  { %v4113_v42 = vadd.f32 %v4111_v35, %v4101_v14  ;;  %v4112_v40 = vmul.f32 0.044715, %v4110_v36  ;;  %v5197_v36 = vld [vmem:[%s6069_s17] sm:$0xff]  }
0x29f4   :  { %v4115_v41 = vmul.f32 0.7978846, %v4113_v42  ;;  %v4114_v39 = vadd.f32 %v4112_v40, %v4104_v30 }
0x29f6   :  { %5283 = vtanh.f32 %v4115_v41  ;;  %v4116_v43 = vmul.f32 0.7978846, %v4114_v39  ;;  %v5198_v41 = vld [vmem:[%s6069_s17 + $0x8] sm:$0xff]  }
0x29f8   :  { %5285 = vtanh.f32 %v4116_v43 }
0x2a00   :  { %v5284_v44 = vpop.eup %5283 }
0x2a01   :  { %v4119_v13 = vadd.f32 1.0, %v5284_v44 }
0x2a02   :  { %v5286_v45 = vpop.eup %5285 }
0x2a03   :  { %v4121_v47 = vmul.f32 0.5, %v4119_v13  ;;  %v4120_v48 = vadd.f32 1.0, %v5286_v45  ;;  %v4689_v13 = vld [vmem:[%s6071_s18] ss:$0 sm:$0xff] }
0x2a05   :  { %v4122_v32 = vmul.f32 0.5, %v4120_v48  ;;  %v4123_v28 = vmul.f32 %v4121_v47, %v4101_v14  ;;  %v5195_v14 = vld [vmem:[%s6069_s17] sm:$0xff]  }
0x2a07   :  { %v4124_v49 = vmul.f32 %v4122_v32, %v4104_v30 }
0x2a09   :  { %v4125_v50 = vpack.c.bf16 %v4124_v49, %v4123_v28 }
0x2a0b   :  { %5137 = vmatmul.mubr.msk.bf16.vlgmr.msra.gmra.mrb[76].mxu0 %vm2099_vm4, %v4125_v50 }
0x2a0c   :  { %5155 = vmatprep.mubr.msk.f32.mxu0 %vm5292_vm1, %v5291_v8 }
0x2ade   :  { %v4204_v52 = vpop.f32.mrb[76].mxu0 }
0x2adf   :  { %v4205_v53 = vadd.f32 %v4678_v51, %v4204_v52  ;;  %v5138_v55 = vpop.f32.mrb[77].mxu0 }
0x2ae0   :  { %v4207_v46 = vpop.f32.mrb[78].mxu0 }
0x2ae1   :  { %v4211_v56 = vadd.f32 %v4205_v53, %v4035_v19  ;;  %v4208_v57 = vadd.f32 %v4678_v51, %v4207_v46  ;;  %v5139_v58 = vpop.f32.mrb[79].mxu0 }
0x2ae3   :  { %v4217_v59 = vsel %vm86_vm0, %v4211_v56, 0.0  ;;  %v4225_v61 = vmul.f32 %v4211_v56, %v4211_v56  ;;  %v4212_v62 = vadd.f32 %v4208_v57, %v4036_v1 }
0x2ae4   :  { %4218 = vadd.xlane.f32.xlu0 %v4217_v59 }
0x2ae5   :  { %v4227_v54 = vsel %vm86_vm0, %v4225_v61, 0.0  ;;  %v4220_v63 = vsel %vm86_vm0, %v4212_v62, 0.0  ;;  %v4226_v0 = vmul.f32 %v4212_v62, %v4212_v62 }
0x2ae6   :  { %4228 = vadd.xlane.f32.xlu1 %v4227_v54 }
0x2ae7   :  { %v4230_v2 = vsel %vm86_vm0, %v4226_v0, 0.0 }
0x2aea   :  { %4221 = vadd.xlane.f32.xlu1 %v4220_v63 }
0x2aee   :  { %4231 = vadd.xlane.f32.xlu1 %v4230_v2 }
0x2b71   :  { %v4219_v3 = vpop.xlane.xlu0 %4218 }
0x2b72   :  { %v4223_v4 = vmul.f32 0.03125, %v4219_v3 }
0x2b73   :  { %v4229_v5 = vpop.xlane.xlu1 %4228 }
0x2b74   :  { %v4235_v6 = vmul.f32 %v4223_v4, %v4223_v4  ;;  %v4233_v7 = vmul.f32 0.03125, %v4229_v5  ;;  %v4241_v1 = vsub.f32 %v4211_v56, %v4223_v4 }
0x2b76   :  { %v4237_v9 = vsub.f32 %v4233_v7, %v4235_v6 }
0x2b77   :  { %v4222_v37 = vpop.xlane.xlu1 %4221 }
0x2b78   :  { %v4239_v60 = vmax.f32 %v4237_v9, 0.0  ;;  %v4224_v10 = vmul.f32 0.03125, %v4222_v37 }
0x2b7a   :  { %v4243_v12 = vadd.f32 1e-12, %v4239_v60  ;;  %v4236_v11 = vmul.f32 %v4224_v10, %v4224_v10  ;;  %v4242_v29 = vsub.f32 %v4212_v62, %v4224_v10 }
0x2b7b   :  { %v4232_v15 = vpop.xlane.xlu1 %4231 }
0x2b7c   :  { %5287 = vrsqrt.f32 %v4243_v12  ;;  %v4234_v16 = vmul.f32 0.03125, %v4232_v15 }
0x2b7e   :  { %v4238_v17 = vsub.f32 %v4234_v16, %v4236_v11 }
0x2b80   :  { %v4240_v18 = vmax.f32 %v4238_v17, 0.0 }
0x2b82   :  { %v4244_v19 = vadd.f32 1e-12, %v4240_v18 }
0x2b84   :  { %5289 = vrsqrt.f32 %v4244_v19 }
0x2b86   :  { %v5288_v21 = vpop.eup %5287 }
0x2b87   :  { %v4247_v23 = vmul.f32 %v5288_v21, %v4241_v1 }
0x2b89   :  { %v4255_v25 = vmul.f32 %v4686_v22, %v4247_v23 }
0x2b8b   :  { %v4263_v26 = vadd.f32 %v4687_v24, %v4255_v25 }
0x2b8d   :  { %5141 = vmatpush3.msra.mxu1 %v4263_v26 }
0x2b8e   :  { %v5290_v20 = vpop.eup %5289  ;;  %5143 = vmatmul.mubr.msk.f32.vlgmr.msra.gmra.mrb[72].mxu1 %vm211_vm2, %v4265_v27  ;;  %5145 = vmatprep.subr.bf16.mxu1 %v5291_v8 }
0x2b8f   :  { %v4248_v38 = vmul.f32 %v5290_v20, %v4242_v29  ;;  %5146 = vmatpush3.bf16.msra.mxu1 %v5195_v14  ;;  %5149 = vmatprep.mubr.msk.bf16.mxu1 %vm5292_vm1, %v5291_v8 }
0x2b90   :  { %5147 = vmatprep.subr.bf16.mxu1 %v5291_v8 }
0x2b91   :  { %v4256_v30 = vmul.f32 %v4686_v22, %v4248_v38 }
0x2b93   :  { %v4264_v31 = vadd.f32 %v4687_v24, %v4256_v30  ;;  %5148 = vmatpush3.bf16.msra.mxu1 %v5196_v34 }
0x2b94   :  { %5158 = vmatprep.subr.bf16.mxu1 %v5291_v8 }
0x2b95   :  { %5154 = vmatpush3.msra.mxu0 %v4264_v31 }
0x2b96   :  { %5156 = vmatmul.mubr.msk.f32.vlgmr.msra.gmra.mrb[80].mxu0 %vm211_vm2, %v4693_v33 }
0x2c61   :  { %v4335_v35 = vpop.f32.mrb[72].mxu1 }
0x2c62   :  { %v4339_v42 = vpack.c.bf16 %v4335_v35, %v4335_v35  ;;  %v5144_v40 = vpop.f32.mrb[73].mxu1 }
0x2c64   :  { %5150 = vmatmul.mubr.msk.bf16.vlgmr.msra.gmra.mrb[76].mxu1 %vm86_vm0, %v4339_v42 }
0x2c65   :  { %5159 = vmatpush3.bf16.msra.mxu1 %v5197_v36  ;;  %5162 = vmatprep.mubr.msk.bf16.mxu1 %vm5292_vm1, %v5291_v8 }
0x2c66   :  { %5160 = vmatprep.subr.bf16.mxu1 %v5291_v8 }
0x2c69   :  { %v4478_v39 = vpop.f32.mrb[80].mxu0  ;;  %5161 = vmatpush3.bf16.msra.mxu1 %v5198_v41 }
0x2c6a   :  { %v4482_v43 = vpack.c.bf16 %v4478_v39, %v4478_v39  ;;  %v5157_v44 = vpop.f32.mrb[81].mxu0 }
0x2c6c   :  { %5163 = vmatmul.mubr.msk.bf16.vlgmr.msra.gmra.mrb[80].mxu1 %vm86_vm0, %v4482_v43 }
0x2d37   :  { %v4400_v45 = vpop.f32.mrb[76].mxu1 }
0x2d38   :  { %v4401_v47 = vadd.f32 %v4689_v13, %v4400_v45  ;;  %v5151_v48 = vpop.f32.mrb[77].mxu1 }
0x2d39   :  { %v4403_v32 = vpop.f32.mrb[78].mxu1 }
0x2d3a   :  { %4406 = vst [vmem:[%s6072_s19] sm:$0xff] %v4401_v47  ;;  %v5152_v28 = vpop.f32.mrb[79].mxu1 }
0x2d3f   :  { %v4543_v8 = vpop.f32.mrb[80].mxu1 }
0x2d40   :  { %v4544_v49 = vadd.f32 %v4689_v13, %v4543_v8  ;;  %v5164_v50 = vpop.f32.mrb[81].mxu1 }
0x2d41   :  { %v4546_v51 = vpop.f32.mrb[82].mxu1 }
0x2d42   :  { %4699 = vst [vmem:[%s6072_s19 + $0x8] sm:$0xff] %v4544_v49  ;;  %v5165_v52 = vpop.f32.mrb[83].mxu1 }

</bundles_post_ra>
